<compile_context>
chip_gen: v6e
topology: v6e:2x2x1
jax: 0.10.0
libtpu: 0.0.40
codegen_flags: <defaults>
</compile_context>

<pallas_src>
import math
from functools import partial

import numpy as np
import jax
import jax.numpy as jnp
from jax import lax
from jax.experimental import pallas as pl
from jax.experimental.pallas import tpu as pltpu

D_MODEL = 32
N_HEADS = 4
HEAD_DIM = D_MODEL // N_HEADS
FFN_DIM = 64
LN_EPS = 1e-5

BATCH = 2
SEQ = 8        # decoder (target) sequence length
TRIP_SEQ = 8   # triples encoder sequence length
ART_SEQ = 16   # article encoder sequence length

# TODO(synk): dropout layers are identity (eval mode); output_attentions probs
# and layer_head_mask scaling are not emitted by this kernel.


def _gelu(x):
    return 0.5 * x * (1.0 + jnp.tanh(math.sqrt(2.0 / math.pi)
                                     * (x + 0.044715 * x * x * x)))


def _layer_norm(x, w, b):
    mu = jnp.mean(x, axis=-1, keepdims=True)
    xc = x - mu
    var = jnp.mean(xc * xc, axis=-1, keepdims=True)
    return xc * lax.rsqrt(var + LN_EPS) * w + b


def _row_tile(a, n):
    # replicate along the sublane (row) axis
    return jnp.concatenate([a] * n, axis=0)


def decoder_layer_kernel(hs_ref, trip_ref, art_ref,
                         m_self_ref, m_trip_ref, m_art_ref, head_mask_ref,
                         self_qkv_w_ref, self_qkv_b_ref,
                         cross_q_w_ref, cross_q_b_ref,
                         cross_kv_w_ref, cross_kv_b_ref,
                         out_w_ref, out_b_ref, ln_w_ref, ln_b_ref,
                         fc1_w_ref, fc1_b_ref, fc2_w_ref, fc2_b_ref,
                         hs_out_ref, kv_out_ref,
                         *, B, S, St, Sa):
    f32 = jnp.float32
    bf16 = jnp.bfloat16
    D = D_MODEL
    H = N_HEADS
    kv_rows = 2 * S + 2 * St + 2 * Sa

    # (H*S, D) 0/1 mask: row-block h keeps only head-h feature columns.
    head_mask = head_mask_ref[...]

    def proj(a_f32, w_bf16, b_f32):
        # bf16 MXU operands, f32 accumulation, f32 bias.
        return jnp.dot(a_f32.astype(bf16), w_bf16,
                       preferred_element_type=f32) + b_f32

    x = hs_ref[...]                                     # (B*S, D) f32

    # Cross-attention K/V (independent of the decoder state): fused k|v matmul.
    trip_kv = proj(trip_ref[...], cross_kv_w_ref[0], cross_kv_b_ref[0])  # (B*St, 2D)
    art_kv = proj(art_ref[...], cross_kv_w_ref[1], cross_kv_b_ref[1])    # (B*Sa, 2D)
    trip_k, trip_v = trip_kv[:, :D], trip_kv[:, D:]
    art_k, art_v = art_kv[:, :D], art_kv[:, D:]

    def attention(q2d, k2d, v2d, mask_ref, Skv):
        # Heads stacked along rows: q_blk[(h,q), :] is Q[q, :] masked to head-h
        # columns, so ONE full-width matmul yields all heads' scores; a second
        # matmul + masked block-sum yields the concatenated-head output.
        outs = []
        for b in range(B):
            q_b = q2d[b * S:(b + 1) * S]                          # (S, D)   f32
            k_b = k2d[b * Skv:(b + 1) * Skv].astype(bf16)         # (Skv, D)
            v_b = v2d[b * Skv:(b + 1) * Skv].astype(bf16)
            q_blk = (_row_tile(q_b, H) * head_mask).astype(bf16)  # (H*S, D)
            # scores[(h,q), k] = <Q_h[q], K_h[k]>  (no 1/sqrt(head_dim) scaling
            # -- FactBart applies none).
            s = lax.dot_general(q_blk, k_b, (((1,), (1,)), ((), ())),
                                preferred_element_type=f32)       # (H*S, Skv)
            s = s + _row_tile(mask_ref[b], H)                     # additive mask
            s = s - jnp.max(s, axis=-1, keepdims=True)
            p = jnp.exp(s)
            p = p * pl.reciprocal(jnp.sum(p, axis=-1, keepdims=True), approx=True)
            o = jnp.dot(p.astype(bf16), v_b,
                        preferred_element_type=f32)               # (H*S, D)
            o = o * head_mask                                     # per-block head cols
            acc = o[0:S]
            for h in range(1, H):
                acc = acc + o[h * S:(h + 1) * S]
            outs.append(acc)                                      # (S, D)
        return jnp.concatenate(outs, axis=0)                      # (B*S, D)

    # ---- self-attention (fused q|k|v) + residual + LayerNorm ----
    residual = x
    qkv = proj(x, self_qkv_w_ref[...], self_qkv_b_ref[...])       # (B*S, 3D)
    self_q, self_k, self_v = qkv[:, :D], qkv[:, D:2 * D], qkv[:, 2 * D:]
    attn = attention(self_q, self_k, self_v, m_self_ref, S)
    attn = jnp.dot(attn.astype(bf16), out_w_ref[0],
                   preferred_element_type=f32) + out_b_ref[0]
    x = _layer_norm(residual + attn, ln_w_ref[0], ln_b_ref[0])

    # ---- triples cross-attention ----
    residual = x
    q = proj(x, cross_q_w_ref[0], cross_q_b_ref[0])
    attn = attention(q, trip_k, trip_v, m_trip_ref, St)
    attn = jnp.dot(attn.astype(bf16), out_w_ref[1],
                   preferred_element_type=f32) + out_b_ref[1]
    x = _layer_norm(residual + attn, ln_w_ref[1], ln_b_ref[1])

    # ---- article cross-attention ----
    residual = x
    q = proj(x, cross_q_w_ref[1], cross_q_b_ref[1])
    attn = attention(q, art_k, art_v, m_art_ref, Sa)
    attn = jnp.dot(attn.astype(bf16), out_w_ref[2],
                   preferred_element_type=f32) + out_b_ref[2]
    x = _layer_norm(residual + attn, ln_w_ref[2], ln_b_ref[2])

    # ---- feed-forward: fc1 -> gelu(tanh) -> fc2 + residual + final LN ----
    residual = x
    h = _gelu(proj(x, fc1_w_ref[...], fc1_b_ref[...]))
    h = proj(h, fc2_w_ref[...], fc2_b_ref[...])
    x = _layer_norm(residual + h, ln_w_ref[3], ln_b_ref[3])

    hs_out_ref[...] = x.astype(hs_out_ref.dtype)

    # ---- packed present K/V cache (single output stream) ----
    # per-batch row layout: [self_k | self_v | trip_k | trip_v | art_k | art_v]
    for b in range(B):
        base = b * kv_rows
        for off, val, n in (
                (0, self_k, S), (S, self_v, S),
                (2 * S, trip_k, St), (2 * S + St, trip_v, St),
                (2 * S + 2 * St, art_k, Sa), (2 * S + 2 * St + Sa, art_v, Sa)):
            kv_out_ref[base + off: base + off + n, :] = (
                val[b * n:(b + 1) * n].astype(kv_out_ref.dtype))


def _prepare_kernel_params(p):
    """Fuse q|k|v (self) and k|v (cross) weights; cast matmul weights to bf16."""
    aw, ab = p['attn_w'], p['attn_b']          # (3,4,D,D), (3,4,1,D): [q,k,v,o]
    bf16, f32 = jnp.bfloat16, jnp.float32
    cat = jnp.concatenate
    return {
        'self_qkv_w': cat([aw[0, 0], aw[0, 1], aw[0, 2]], axis=1).astype(bf16),
        'self_qkv_b': cat([ab[0, 0], ab[0, 1], ab[0, 2]], axis=1).astype(f32),
        'cross_q_w': jnp.stack([aw[1, 0], aw[2, 0]]).astype(bf16),
        'cross_q_b': jnp.stack([ab[1, 0], ab[2, 0]]).astype(f32),
        'cross_kv_w': jnp.stack([cat([aw[1, 1], aw[1, 2]], axis=1),
                                 cat([aw[2, 1], aw[2, 2]], axis=1)]).astype(bf16),
        'cross_kv_b': jnp.stack([cat([ab[1, 1], ab[1, 2]], axis=1),
                                 cat([ab[2, 1], ab[2, 2]], axis=1)]).astype(f32),
        'out_w': jnp.stack([aw[0, 3], aw[1, 3], aw[2, 3]]).astype(bf16),
        'out_b': jnp.stack([ab[0, 3], ab[1, 3], ab[2, 3]]).astype(f32),
        'ln_w': p['ln_w'].astype(f32),
        'ln_b': p['ln_b'].astype(f32),
        'fc1_w': p['fc1_w'].astype(bf16),
        'fc1_b': p['fc1_b'].astype(f32),
        'fc2_w': p['fc2_w'].astype(bf16),
        'fc2_b': p['fc2_b'].astype(f32),
    }


def fact_bart_decoder_layer(hs, trip, art, m_self, m_trip, m_art, params):
    B, S, D = hs.shape
    St, Sa = trip.shape[1], art.shape[1]
    kv_rows = 2 * S + 2 * St + 2 * Sa
    kp = _prepare_kernel_params(params)

    # constant block head-mask: head_mask[h*S+q, c] = 1 iff c // HEAD_DIM == h
    head_mask = ((np.arange(N_HEADS * S)[:, None] // S) ==
                 (np.arange(D)[None, :] // HEAD_DIM)).astype(np.float32)
    head_mask = jnp.asarray(head_mask)

    in_arrays = [
        hs.reshape(B * S, D), trip.reshape(B * St, D), art.reshape(B * Sa, D),
        m_self, m_trip, m_art, head_mask,
        kp['self_qkv_w'], kp['self_qkv_b'],
        kp['cross_q_w'], kp['cross_q_b'],
        kp['cross_kv_w'], kp['cross_kv_b'],
        kp['out_w'], kp['out_b'], kp['ln_w'], kp['ln_b'],
        kp['fc1_w'], kp['fc1_b'], kp['fc2_w'], kp['fc2_b'],
    ]

    out_shapes = (
        jax.ShapeDtypeStruct((B * S, D), hs.dtype),        # new hidden states
        jax.ShapeDtypeStruct((B * kv_rows, D), hs.dtype),  # packed present K/V
    )

    def full_spec(shape):
        n = len(shape)
        return pl.BlockSpec(shape, lambda i, n=n: (0,) * n)

    grid_spec = pltpu.PrefetchScalarGridSpec(
        num_scalar_prefetch=0,
        grid=(1,),                      # whole batch in one invocation
        in_specs=[full_spec(a.shape) for a in in_arrays],
        out_specs=[full_spec(s.shape) for s in out_shapes],
    )

    fn = pl.pallas_call(
        partial(decoder_layer_kernel, B=B, S=S, St=St, Sa=Sa),
        out_shape=out_shapes,
        grid_spec=grid_spec,
        compiler_params=pltpu.CompilerParams(
            dimension_semantics=("arbitrary",)),
    )
    hs_out2d, kv2d = fn(*in_arrays)

    new_hs = hs_out2d.reshape(B, S, D)
    kv = kv2d.reshape(B, kv_rows, D)

    def to_heads(x):  # (B, Skv, D) -> (B, H, Skv, head_dim), matching self.reshape
        b_, s_, _ = x.shape
        return x.reshape(b_, s_, N_HEADS, HEAD_DIM).transpose(0, 2, 1, 3)

    segs = []
    off = 0
    for n in (S, S, St, St, Sa, Sa):
        segs.append(to_heads(kv[:, off:off + n, :]))
        off += n
    return new_hs, tuple(segs)


def reference_forward(hs, trip, art, m_self, m_trip, m_art, p):
    """Pure-JAX mirror of the PyTorch module (eval mode) for validation."""
    def mha(x, kv, w, b, mask):
        q = x @ w[0] + b[0, 0]
        k = kv @ w[1] + b[1, 0]
        v = kv @ w[2] + b[2, 0]
        bsz, s, d = q.shape
        skv = k.shape[1]
        qh = q.reshape(bsz, s, N_HEADS, HEAD_DIM).transpose(0, 2, 1, 3)
        kh = k.reshape(bsz, skv, N_HEADS, HEAD_DIM).transpose(0, 2, 1, 3)
        vh = v.reshape(bsz, skv, N_HEADS, HEAD_DIM).transpose(0, 2, 1, 3)
        s_ = jnp.einsum('bhqd,bhkd->bhqk', qh, kh) + mask[:, None]
        pr = jax.nn.softmax(s_, axis=-1)
        o = jnp.einsum('bhqk,bhkd->bhqd', pr, vh)
        o = o.transpose(0, 2, 1, 3).reshape(bsz, s, d)
        return o @ w[3] + b[3, 0], kh, vh

    def ln(x, w, b):
        mu = x.mean(-1, keepdims=True)
        var = ((x - mu) ** 2).mean(-1, keepdims=True)
        return (x - mu) / jnp.sqrt(var + LN_EPS) * w + b

    x = hs
    kvset = [hs, trip, art]
    masks = [m_self, m_trip, m_art]
    pres = []
    for a in range(3):
        res = x
        o, kh, vh = mha(x, kvset[a], p['attn_w'][a], p['attn_b'][a], masks[a])
        pres += [kh, vh]
        x = ln(res + o, p['ln_w'][a, 0], p['ln_b'][a, 0])
    res = x
    h = x @ p['fc1_w'] + p['fc1_b'][0]
    h = 0.5 * h * (1 + jnp.tanh(math.sqrt(2 / math.pi) * (h + 0.044715 * h ** 3)))
    h = h @ p['fc2_w'] + p['fc2_b'][0]
    x = ln(res + h, p['ln_w'][3, 0], p['ln_b'][3, 0])
    return x, tuple(pres)


if __name__ == "__main__":
    key = jax.random.PRNGKey(0)
    keys = jax.random.split(key, 12)

    def init(k, shape, scale=0.02):
        return (scale * jax.random.normal(k, shape)).astype(jnp.float32)

    params = {
        'attn_w': init(keys[0], (3, 4, D_MODEL, D_MODEL)),   # [attn][q,k,v,o] (in,out)
        'attn_b': init(keys[1], (3, 4, 1, D_MODEL)),
        'ln_w': (1.0 + init(keys[2], (4, 1, D_MODEL))).astype(jnp.float32),
        'ln_b': init(keys[3], (4, 1, D_MODEL)),
        'fc1_w': init(keys[4], (D_MODEL, FFN_DIM)),
        'fc1_b': init(keys[5], (1, FFN_DIM)),
        'fc2_w': init(keys[6], (FFN_DIM, D_MODEL)),
        'fc2_b': init(keys[7], (1, D_MODEL)),
    }

    hs = jax.random.normal(keys[8], (BATCH, SEQ, D_MODEL), jnp.float32)
    trip = jax.random.normal(keys[9], (BATCH, TRIP_SEQ, D_MODEL), jnp.float32)
    art = jax.random.normal(keys[10], (BATCH, ART_SEQ, D_MODEL), jnp.float32)

    # causal additive mask for self-attention; zero masks for cross-attention.
    causal = jnp.where(jnp.tril(jnp.ones((SEQ, SEQ), bool)), 0.0, -1e9)
    m_self = jnp.broadcast_to(causal.astype(jnp.float32), (BATCH, SEQ, SEQ))
    m_trip = jnp.zeros((BATCH, SEQ, TRIP_SEQ), jnp.float32)
    m_art = jnp.zeros((BATCH, SEQ, ART_SEQ), jnp.float32)

    out, present_kv = fact_bart_decoder_layer(
        hs, trip, art, m_self, m_trip, m_art, params)
    out = jax.block_until_ready(out)

    ref_out, ref_kv = reference_forward(hs, trip, art, m_self, m_trip, m_art, params)
    assert np.allclose(np.asarray(out), np.asarray(ref_out), atol=2e-3, rtol=2e-3), (
        "max abs diff:", float(np.max(np.abs(np.asarray(out) - np.asarray(ref_out)))))
    for got, want in zip(present_kv, ref_kv):
        assert np.allclose(np.asarray(got), np.asarray(want), atol=2e-3, rtol=2e-3), (
            "kv max abs diff:",
            float(np.max(np.abs(np.asarray(got) - np.asarray(want)))))

    print("KERNEL_OK")
</pallas_src>

<mosaic_0001>
module attributes {stable_mosaic.version = 11 : i64} {
  func.func @decoder_layer_kernel(%arg0: i32, %arg1: memref<16x32xf32, #tpu.memory_space<vmem>>, %arg2: memref<16x32xf32, #tpu.memory_space<vmem>>, %arg3: memref<32x32xf32, #tpu.memory_space<vmem>>, %arg4: memref<2x8x8xf32, #tpu.memory_space<vmem>>, %arg5: memref<2x8x8xf32, #tpu.memory_space<vmem>>, %arg6: memref<2x8x16xf32, #tpu.memory_space<vmem>>, %arg7: memref<32x32xf32, #tpu.memory_space<vmem>>, %arg8: memref<32x96xbf16, #tpu.memory_space<vmem>>, %arg9: memref<1x96xf32, #tpu.memory_space<vmem>>, %arg10: memref<2x32x32xbf16, #tpu.memory_space<vmem>>, %arg11: memref<2x1x32xf32, #tpu.memory_space<vmem>>, %arg12: memref<2x32x64xbf16, #tpu.memory_space<vmem>>, %arg13: memref<2x1x64xf32, #tpu.memory_space<vmem>>, %arg14: memref<3x32x32xbf16, #tpu.memory_space<vmem>>, %arg15: memref<3x1x32xf32, #tpu.memory_space<vmem>>, %arg16: memref<4x1x32xf32, #tpu.memory_space<vmem>>, %arg17: memref<4x1x32xf32, #tpu.memory_space<vmem>>, %arg18: memref<32x64xbf16, #tpu.memory_space<vmem>>, %arg19: memref<1x64xf32, #tpu.memory_space<vmem>>, %arg20: memref<64x32xbf16, #tpu.memory_space<vmem>>, %arg21: memref<1x32xf32, #tpu.memory_space<vmem>>, %arg22: memref<16x32xf32, #tpu.memory_space<vmem>>, %arg23: memref<128x32xf32, #tpu.memory_space<vmem>>) attributes {dimension_semantics = [#tpu.dimension_semantics<arbitrary>], iteration_bounds = array<i64: 1>, scalar_prefetch = 0 : i64, scratch_operands = 0 : i64, tpu.core_type = #tpu.core_type<tc>, window_params = [{pipeline_mode = #tpu.pipeline_mode<synchronous>, transform_indices = @transform_0, window_bounds = array<i64: 16, 32>}, {pipeline_mode = #tpu.pipeline_mode<synchronous>, transform_indices = @transform_1, window_bounds = array<i64: 16, 32>}, {pipeline_mode = #tpu.pipeline_mode<synchronous>, transform_indices = @transform_2, window_bounds = array<i64: 32, 32>}, {pipeline_mode = #tpu.pipeline_mode<synchronous>, transform_indices = @transform_3, window_bounds = array<i64: 2, 8, 8>}, {pipeline_mode = #tpu.pipeline_mode<synchronous>, transform_indices = @transform_4, window_bounds = array<i64: 2, 8, 8>}, {pipeline_mode = #tpu.pipeline_mode<synchronous>, transform_indices = @transform_5, window_bounds = array<i64: 2, 8, 16>}, {pipeline_mode = #tpu.pipeline_mode<synchronous>, transform_indices = @transform_6, window_bounds = array<i64: 32, 32>}, {pipeline_mode = #tpu.pipeline_mode<synchronous>, transform_indices = @transform_7, window_bounds = array<i64: 32, 96>}, {pipeline_mode = #tpu.pipeline_mode<synchronous>, transform_indices = @transform_8, window_bounds = array<i64: 1, 96>}, {pipeline_mode = #tpu.pipeline_mode<synchronous>, transform_indices = @transform_9, window_bounds = array<i64: 2, 32, 32>}, {pipeline_mode = #tpu.pipeline_mode<synchronous>, transform_indices = @transform_10, window_bounds = array<i64: 2, 1, 32>}, {pipeline_mode = #tpu.pipeline_mode<synchronous>, transform_indices = @transform_11, window_bounds = array<i64: 2, 32, 64>}, {pipeline_mode = #tpu.pipeline_mode<synchronous>, transform_indices = @transform_12, window_bounds = array<i64: 2, 1, 64>}, {pipeline_mode = #tpu.pipeline_mode<synchronous>, transform_indices = @transform_13, window_bounds = array<i64: 3, 32, 32>}, {pipeline_mode = #tpu.pipeline_mode<synchronous>, transform_indices = @transform_14, window_bounds = array<i64: 3, 1, 32>}, {pipeline_mode = #tpu.pipeline_mode<synchronous>, transform_indices = @transform_15, window_bounds = array<i64: 4, 1, 32>}, {pipeline_mode = #tpu.pipeline_mode<synchronous>, transform_indices = @transform_16, window_bounds = array<i64: 4, 1, 32>}, {pipeline_mode = #tpu.pipeline_mode<synchronous>, transform_indices = @transform_17, window_bounds = array<i64: 32, 64>}, {pipeline_mode = #tpu.pipeline_mode<synchronous>, transform_indices = @transform_18, window_bounds = array<i64: 1, 64>}, {pipeline_mode = #tpu.pipeline_mode<synchronous>, transform_indices = @transform_19, window_bounds = array<i64: 64, 32>}, {pipeline_mode = #tpu.pipeline_mode<synchronous>, transform_indices = @transform_20, window_bounds = array<i64: 1, 32>}, {pipeline_mode = #tpu.pipeline_mode<synchronous>, transform_indices = @transform_21, window_bounds = array<i64: 16, 32>}, {pipeline_mode = #tpu.pipeline_mode<synchronous>, transform_indices = @transform_22, window_bounds = array<i64: 128, 32>}]} {
    %c0 = arith.constant 0 : index
    %c0_0 = arith.constant 0 : index
    %0 = vector.load %arg7[%c0, %c0_0] : memref<32x32xf32, #tpu.memory_space<vmem>>, vector<32x32xf32>
    %c0_1 = arith.constant 0 : index
    %c0_2 = arith.constant 0 : index
    %1 = vector.load %arg1[%c0_1, %c0_2] : memref<16x32xf32, #tpu.memory_space<vmem>>, vector<16x32xf32>
    %c0_3 = arith.constant 0 : index
    %c0_4 = arith.constant 0 : index
    %2 = vector.load %arg2[%c0_3, %c0_4] : memref<16x32xf32, #tpu.memory_space<vmem>>, vector<16x32xf32>
    %c0_5 = arith.constant 0 : index
    %c0_6 = arith.constant 0 : index
    %c0_7 = arith.constant 0 : index
    %3 = vector.load %arg12[%c0_5, %c0_6, %c0_7] : memref<2x32x64xbf16, #tpu.memory_space<vmem>>, vector<1x32x64xbf16>
    %4 = vector.shape_cast %3 : vector<1x32x64xbf16> to vector<32x64xbf16>
    %c0_8 = arith.constant 0 : index
    %c0_9 = arith.constant 0 : index
    %c0_10 = arith.constant 0 : index
    %5 = vector.load %arg13[%c0_8, %c0_9, %c0_10] : memref<2x1x64xf32, #tpu.memory_space<vmem>>, vector<1x1x64xf32>
    %6 = vector.shape_cast %5 : vector<1x1x64xf32> to vector<1x64xf32>
    %7 = arith.truncf %2 : vector<16x32xf32> to vector<16x32xbf16>
    %cst = arith.constant dense<0.000000e+00> : vector<16x64xf32>
    %8 = tpu.matmul %7, %4, %cst {dimension_numbers = #tpu.dot_dimension_numbers<[1], [0], [0], [1], [0, 0, 1, 1], [], []>} : vector<16x32xbf16>, vector<32x64xbf16>, vector<16x64xf32> -> vector<16x64xf32>
    %9 = vector.broadcast %6 : vector<1x64xf32> to vector<16x64xf32>
    %10 = arith.addf %8, %9 : vector<16x64xf32>
    %c0_11 = arith.constant 0 : index
    %c0_12 = arith.constant 0 : index
    %11 = vector.load %arg3[%c0_11, %c0_12] : memref<32x32xf32, #tpu.memory_space<vmem>>, vector<32x32xf32>
    %c1 = arith.constant 1 : index
    %c0_13 = arith.constant 0 : index
    %c0_14 = arith.constant 0 : index
    %12 = vector.load %arg12[%c1, %c0_13, %c0_14] : memref<2x32x64xbf16, #tpu.memory_space<vmem>>, vector<1x32x64xbf16>
    %13 = vector.shape_cast %12 : vector<1x32x64xbf16> to vector<32x64xbf16>
    %c1_15 = arith.constant 1 : index
    %c0_16 = arith.constant 0 : index
    %c0_17 = arith.constant 0 : index
    %14 = vector.load %arg13[%c1_15, %c0_16, %c0_17] : memref<2x1x64xf32, #tpu.memory_space<vmem>>, vector<1x1x64xf32>
    %15 = vector.shape_cast %14 : vector<1x1x64xf32> to vector<1x64xf32>
    %16 = arith.truncf %11 : vector<32x32xf32> to vector<32x32xbf16>
    %cst_18 = arith.constant dense<0.000000e+00> : vector<32x64xf32>
    %17 = tpu.matmul %16, %13, %cst_18 {dimension_numbers = #tpu.dot_dimension_numbers<[1], [0], [0], [1], [0, 0, 1, 1], [], []>} : vector<32x32xbf16>, vector<32x64xbf16>, vector<32x64xf32> -> vector<32x64xf32>
    %18 = vector.broadcast %15 : vector<1x64xf32> to vector<32x64xf32>
    %19 = arith.addf %17, %18 : vector<32x64xf32>
    %20 = vector.extract_strided_slice %10 {offsets = [0, 0], sizes = [16, 32], strides = [1, 1]} : vector<16x64xf32> to vector<16x32xf32>
    %21 = vector.extract_strided_slice %10 {offsets = [0, 32], sizes = [16, 32], strides = [1, 1]} : vector<16x64xf32> to vector<16x32xf32>
    %22 = vector.extract_strided_slice %19 {offsets = [0, 0], sizes = [32, 32], strides = [1, 1]} : vector<32x64xf32> to vector<32x32xf32>
    %23 = vector.extract_strided_slice %19 {offsets = [0, 32], sizes = [32, 32], strides = [1, 1]} : vector<32x64xf32> to vector<32x32xf32>
    %c0_19 = arith.constant 0 : index
    %c0_20 = arith.constant 0 : index
    %24 = vector.load %arg8[%c0_19, %c0_20] : memref<32x96xbf16, #tpu.memory_space<vmem>>, vector<32x96xbf16>
    %c0_21 = arith.constant 0 : index
    %c0_22 = arith.constant 0 : index
    %25 = vector.load %arg9[%c0_21, %c0_22] : memref<1x96xf32, #tpu.memory_space<vmem>>, vector<1x96xf32>
    %26 = arith.truncf %1 : vector<16x32xf32> to vector<16x32xbf16>
    %cst_23 = arith.constant dense<0.000000e+00> : vector<16x96xf32>
    %27 = tpu.matmul %26, %24, %cst_23 {dimension_numbers = #tpu.dot_dimension_numbers<[1], [0], [0], [1], [0, 0, 1, 1], [], []>} : vector<16x32xbf16>, vector<32x96xbf16>, vector<16x96xf32> -> vector<16x96xf32>
    %28 = vector.broadcast %25 : vector<1x96xf32> to vector<16x96xf32>
    %29 = arith.addf %27, %28 : vector<16x96xf32>
    %30 = vector.extract_strided_slice %29 {offsets = [0, 0], sizes = [16, 32], strides = [1, 1]} : vector<16x96xf32> to vector<16x32xf32>
    %31 = vector.extract_strided_slice %29 {offsets = [0, 32], sizes = [16, 32], strides = [1, 1]} : vector<16x96xf32> to vector<16x32xf32>
    %32 = vector.extract_strided_slice %29 {offsets = [0, 64], sizes = [16, 32], strides = [1, 1]} : vector<16x96xf32> to vector<16x32xf32>
    %33 = vector.extract_strided_slice %30 {offsets = [0, 0], sizes = [8, 32], strides = [1, 1]} : vector<16x32xf32> to vector<8x32xf32>
    %34 = vector.extract_strided_slice %31 {offsets = [0, 0], sizes = [8, 32], strides = [1, 1]} : vector<16x32xf32> to vector<8x32xf32>
    %35 = arith.truncf %34 : vector<8x32xf32> to vector<8x32xbf16>
    %36 = vector.extract_strided_slice %32 {offsets = [0, 0], sizes = [8, 32], strides = [1, 1]} : vector<16x32xf32> to vector<8x32xf32>
    %37 = arith.truncf %36 : vector<8x32xf32> to vector<8x32xbf16>
    %38 = tpu.concatenate %33, %33, %33, %33 in 0 : vector<8x32xf32>, vector<8x32xf32>, vector<8x32xf32>, vector<8x32xf32> -> vector<32x32xf32>
    %39 = arith.mulf %38, %0 : vector<32x32xf32>
    %40 = arith.truncf %39 : vector<32x32xf32> to vector<32x32xbf16>
    %cst_24 = arith.constant dense<0.000000e+00> : vector<32x8xf32>
    %41 = tpu.matmul %40, %35, %cst_24 {dimension_numbers = #tpu.dot_dimension_numbers<[1], [1], [0], [0], [0, 0, 1, 0], [], []>} : vector<32x32xbf16>, vector<8x32xbf16>, vector<32x8xf32> -> vector<32x8xf32>
    %c0_25 = arith.constant 0 : index
    %c0_26 = arith.constant 0 : index
    %c0_27 = arith.constant 0 : index
    %42 = vector.load %arg4[%c0_25, %c0_26, %c0_27] : memref<2x8x8xf32, #tpu.memory_space<vmem>>, vector<1x8x8xf32>
    %43 = vector.shape_cast %42 : vector<1x8x8xf32> to vector<8x8xf32>
    %44 = tpu.concatenate %43, %43, %43, %43 in 0 : vector<8x8xf32>, vector<8x8xf32>, vector<8x8xf32>, vector<8x8xf32> -> vector<32x8xf32>
    %45 = arith.addf %41, %44 : vector<32x8xf32>
    %cst_28 = arith.constant dense<0xFF800000> : vector<32xf32>
    %46 = vector.multi_reduction <maximumf>, %45, %cst_28 [1] : vector<32x8xf32> to vector<32xf32>
    %47 = vector.shape_cast %46 : vector<32xf32> to vector<32x1xf32>
    %48 = vector.broadcast %47 : vector<32x1xf32> to vector<32x8xf32>
    %49 = arith.subf %45, %48 : vector<32x8xf32>
    %50 = math.exp %49 : vector<32x8xf32>
    %cst_29 = arith.constant dense<0.000000e+00> : vector<32xf32>
    %51 = vector.multi_reduction <add>, %50, %cst_29 [1] : vector<32x8xf32> to vector<32xf32>
    %52 = vector.shape_cast %51 : vector<32xf32> to vector<32x1xf32>
    %53 = tpu.reciprocal %52 {approx = true} : vector<32x1xf32> -> vector<32x1xf32>
    %54 = vector.broadcast %53 : vector<32x1xf32> to vector<32x8xf32>
    %55 = arith.mulf %50, %54 : vector<32x8xf32>
    %56 = arith.truncf %55 : vector<32x8xf32> to vector<32x8xbf16>
    %cst_30 = arith.constant dense<0.000000e+00> : vector<32x32xf32>
    %57 = tpu.matmul %56, %37, %cst_30 {dimension_numbers = #tpu.dot_dimension_numbers<[1], [0], [0], [1], [0, 0, 1, 1], [], []>} : vector<32x8xbf16>, vector<8x32xbf16>, vector<32x32xf32> -> vector<32x32xf32>
    %58 = arith.mulf %57, %0 : vector<32x32xf32>
    %59 = vector.extract_strided_slice %58 {offsets = [0, 0], sizes = [8, 32], strides = [1, 1]} : vector<32x32xf32> to vector<8x32xf32>
    %60 = vector.extract_strided_slice %58 {offsets = [8, 0], sizes = [8, 32], strides = [1, 1]} : vector<32x32xf32> to vector<8x32xf32>
    %61 = arith.addf %59, %60 : vector<8x32xf32>
    %62 = vector.extract_strided_slice %58 {offsets = [16, 0], sizes = [8, 32], strides = [1, 1]} : vector<32x32xf32> to vector<8x32xf32>
    %63 = arith.addf %61, %62 : vector<8x32xf32>
    %64 = vector.extract_strided_slice %58 {offsets = [24, 0], sizes = [8, 32], strides = [1, 1]} : vector<32x32xf32> to vector<8x32xf32>
    %65 = arith.addf %63, %64 : vector<8x32xf32>
    %66 = vector.extract_strided_slice %30 {offsets = [8, 0], sizes = [8, 32], strides = [1, 1]} : vector<16x32xf32> to vector<8x32xf32>
    %67 = vector.extract_strided_slice %31 {offsets = [8, 0], sizes = [8, 32], strides = [1, 1]} : vector<16x32xf32> to vector<8x32xf32>
    %68 = arith.truncf %67 : vector<8x32xf32> to vector<8x32xbf16>
    %69 = vector.extract_strided_slice %32 {offsets = [8, 0], sizes = [8, 32], strides = [1, 1]} : vector<16x32xf32> to vector<8x32xf32>
    %70 = arith.truncf %69 : vector<8x32xf32> to vector<8x32xbf16>
    %71 = tpu.concatenate %66, %66, %66, %66 in 0 : vector<8x32xf32>, vector<8x32xf32>, vector<8x32xf32>, vector<8x32xf32> -> vector<32x32xf32>
    %72 = arith.mulf %71, %0 : vector<32x32xf32>
    %73 = arith.truncf %72 : vector<32x32xf32> to vector<32x32xbf16>
    %cst_31 = arith.constant dense<0.000000e+00> : vector<32x8xf32>
    %74 = tpu.matmul %73, %68, %cst_31 {dimension_numbers = #tpu.dot_dimension_numbers<[1], [1], [0], [0], [0, 0, 1, 0], [], []>} : vector<32x32xbf16>, vector<8x32xbf16>, vector<32x8xf32> -> vector<32x8xf32>
    %c1_32 = arith.constant 1 : index
    %c0_33 = arith.constant 0 : index
    %c0_34 = arith.constant 0 : index
    %75 = vector.load %arg4[%c1_32, %c0_33, %c0_34] : memref<2x8x8xf32, #tpu.memory_space<vmem>>, vector<1x8x8xf32>
    %76 = vector.shape_cast %75 : vector<1x8x8xf32> to vector<8x8xf32>
    %77 = tpu.concatenate %76, %76, %76, %76 in 0 : vector<8x8xf32>, vector<8x8xf32>, vector<8x8xf32>, vector<8x8xf32> -> vector<32x8xf32>
    %78 = arith.addf %74, %77 : vector<32x8xf32>
    %cst_35 = arith.constant dense<0xFF800000> : vector<32xf32>
    %79 = vector.multi_reduction <maximumf>, %78, %cst_35 [1] : vector<32x8xf32> to vector<32xf32>
    %80 = vector.shape_cast %79 : vector<32xf32> to vector<32x1xf32>
    %81 = vector.broadcast %80 : vector<32x1xf32> to vector<32x8xf32>
    %82 = arith.subf %78, %81 : vector<32x8xf32>
    %83 = math.exp %82 : vector<32x8xf32>
    %cst_36 = arith.constant dense<0.000000e+00> : vector<32xf32>
    %84 = vector.multi_reduction <add>, %83, %cst_36 [1] : vector<32x8xf32> to vector<32xf32>
    %85 = vector.shape_cast %84 : vector<32xf32> to vector<32x1xf32>
    %86 = tpu.reciprocal %85 {approx = true} : vector<32x1xf32> -> vector<32x1xf32>
    %87 = vector.broadcast %86 : vector<32x1xf32> to vector<32x8xf32>
    %88 = arith.mulf %83, %87 : vector<32x8xf32>
    %89 = arith.truncf %88 : vector<32x8xf32> to vector<32x8xbf16>
    %cst_37 = arith.constant dense<0.000000e+00> : vector<32x32xf32>
    %90 = tpu.matmul %89, %70, %cst_37 {dimension_numbers = #tpu.dot_dimension_numbers<[1], [0], [0], [1], [0, 0, 1, 1], [], []>} : vector<32x8xbf16>, vector<8x32xbf16>, vector<32x32xf32> -> vector<32x32xf32>
    %91 = arith.mulf %90, %0 : vector<32x32xf32>
    %92 = vector.extract_strided_slice %91 {offsets = [0, 0], sizes = [8, 32], strides = [1, 1]} : vector<32x32xf32> to vector<8x32xf32>
    %93 = vector.extract_strided_slice %91 {offsets = [8, 0], sizes = [8, 32], strides = [1, 1]} : vector<32x32xf32> to vector<8x32xf32>
    %94 = arith.addf %92, %93 : vector<8x32xf32>
    %95 = vector.extract_strided_slice %91 {offsets = [16, 0], sizes = [8, 32], strides = [1, 1]} : vector<32x32xf32> to vector<8x32xf32>
    %96 = arith.addf %94, %95 : vector<8x32xf32>
    %97 = vector.extract_strided_slice %91 {offsets = [24, 0], sizes = [8, 32], strides = [1, 1]} : vector<32x32xf32> to vector<8x32xf32>
    %98 = arith.addf %96, %97 : vector<8x32xf32>
    %99 = tpu.concatenate %65, %98 in 0 : vector<8x32xf32>, vector<8x32xf32> -> vector<16x32xf32>
    %100 = arith.truncf %99 : vector<16x32xf32> to vector<16x32xbf16>
    %c0_38 = arith.constant 0 : index
    %c0_39 = arith.constant 0 : index
    %c0_40 = arith.constant 0 : index
    %101 = vector.load %arg14[%c0_38, %c0_39, %c0_40] : memref<3x32x32xbf16, #tpu.memory_space<vmem>>, vector<1x32x32xbf16>
    %102 = vector.shape_cast %101 : vector<1x32x32xbf16> to vector<32x32xbf16>
    %cst_41 = arith.constant dense<0.000000e+00> : vector<16x32xf32>
    %103 = tpu.matmul %100, %102, %cst_41 {dimension_numbers = #tpu.dot_dimension_numbers<[1], [0], [0], [1], [0, 0, 1, 1], [], []>} : vector<16x32xbf16>, vector<32x32xbf16>, vector<16x32xf32> -> vector<16x32xf32>
    %c0_42 = arith.constant 0 : index
    %c0_43 = arith.constant 0 : index
    %c0_44 = arith.constant 0 : index
    %104 = vector.load %arg15[%c0_42, %c0_43, %c0_44] : memref<3x1x32xf32, #tpu.memory_space<vmem>>, vector<1x1x32xf32>
    %105 = vector.shape_cast %104 : vector<1x1x32xf32> to vector<1x32xf32>
    %106 = vector.broadcast %105 : vector<1x32xf32> to vector<16x32xf32>
    %107 = arith.addf %103, %106 : vector<16x32xf32>
    %108 = arith.addf %1, %107 : vector<16x32xf32>
    %c0_45 = arith.constant 0 : index
    %c0_46 = arith.constant 0 : index
    %c0_47 = arith.constant 0 : index
    %109 = vector.load %arg16[%c0_45, %c0_46, %c0_47] : memref<4x1x32xf32, #tpu.memory_space<vmem>>, vector<1x1x32xf32>
    %110 = vector.shape_cast %109 : vector<1x1x32xf32> to vector<1x32xf32>
    %c0_48 = arith.constant 0 : index
    %c0_49 = arith.constant 0 : index
    %c0_50 = arith.constant 0 : index
    %111 = vector.load %arg17[%c0_48, %c0_49, %c0_50] : memref<4x1x32xf32, #tpu.memory_space<vmem>>, vector<1x1x32xf32>
    %112 = vector.shape_cast %111 : vector<1x1x32xf32> to vector<1x32xf32>
    %cst_51 = arith.constant dense<0.000000e+00> : vector<16xf32>
    %113 = vector.multi_reduction <add>, %108, %cst_51 [1] : vector<16x32xf32> to vector<16xf32>
    %114 = vector.shape_cast %113 : vector<16xf32> to vector<16x1xf32>
    %cst_52 = arith.constant 3.200000e+01 : f32
    %115 = vector.broadcast %cst_52 : f32 to vector<16x1xf32>
    %116 = arith.divf %114, %115 : vector<16x1xf32>
    %117 = vector.broadcast %116 : vector<16x1xf32> to vector<16x32xf32>
    %118 = arith.subf %108, %117 : vector<16x32xf32>
    %119 = arith.mulf %118, %118 : vector<16x32xf32>
    %cst_53 = arith.constant dense<0.000000e+00> : vector<16xf32>
    %120 = vector.multi_reduction <add>, %119, %cst_53 [1] : vector<16x32xf32> to vector<16xf32>
    %121 = vector.shape_cast %120 : vector<16xf32> to vector<16x1xf32>
    %cst_54 = arith.constant 3.200000e+01 : f32
    %122 = vector.broadcast %cst_54 : f32 to vector<16x1xf32>
    %123 = arith.divf %121, %122 : vector<16x1xf32>
    %cst_55 = arith.constant 9.99999974E-6 : f32
    %124 = vector.broadcast %cst_55 : f32 to vector<16x1xf32>
    %125 = arith.addf %123, %124 : vector<16x1xf32>
    %126 = math.rsqrt %125 : vector<16x1xf32>
    %127 = vector.broadcast %126 : vector<16x1xf32> to vector<16x32xf32>
    %128 = arith.mulf %118, %127 : vector<16x32xf32>
    %129 = vector.broadcast %110 : vector<1x32xf32> to vector<16x32xf32>
    %130 = arith.mulf %128, %129 : vector<16x32xf32>
    %131 = vector.broadcast %112 : vector<1x32xf32> to vector<16x32xf32>
    %132 = arith.addf %130, %131 : vector<16x32xf32>
    %c0_56 = arith.constant 0 : index
    %c0_57 = arith.constant 0 : index
    %c0_58 = arith.constant 0 : index
    %133 = vector.load %arg10[%c0_56, %c0_57, %c0_58] : memref<2x32x32xbf16, #tpu.memory_space<vmem>>, vector<1x32x32xbf16>
    %134 = vector.shape_cast %133 : vector<1x32x32xbf16> to vector<32x32xbf16>
    %c0_59 = arith.constant 0 : index
    %c0_60 = arith.constant 0 : index
    %c0_61 = arith.constant 0 : index
    %135 = vector.load %arg11[%c0_59, %c0_60, %c0_61] : memref<2x1x32xf32, #tpu.memory_space<vmem>>, vector<1x1x32xf32>
    %136 = vector.shape_cast %135 : vector<1x1x32xf32> to vector<1x32xf32>
    %137 = arith.truncf %132 : vector<16x32xf32> to vector<16x32xbf16>
    %cst_62 = arith.constant dense<0.000000e+00> : vector<16x32xf32>
    %138 = tpu.matmul %137, %134, %cst_62 {dimension_numbers = #tpu.dot_dimension_numbers<[1], [0], [0], [1], [0, 0, 1, 1], [], []>} : vector<16x32xbf16>, vector<32x32xbf16>, vector<16x32xf32> -> vector<16x32xf32>
    %139 = vector.broadcast %136 : vector<1x32xf32> to vector<16x32xf32>
    %140 = arith.addf %138, %139 : vector<16x32xf32>
    %141 = vector.extract_strided_slice %140 {offsets = [0, 0], sizes = [8, 32], strides = [1, 1]} : vector<16x32xf32> to vector<8x32xf32>
    %142 = vector.extract_strided_slice %20 {offsets = [0, 0], sizes = [8, 32], strides = [1, 1]} : vector<16x32xf32> to vector<8x32xf32>
    %143 = arith.truncf %142 : vector<8x32xf32> to vector<8x32xbf16>
    %144 = vector.extract_strided_slice %21 {offsets = [0, 0], sizes = [8, 32], strides = [1, 1]} : vector<16x32xf32> to vector<8x32xf32>
    %145 = arith.truncf %144 : vector<8x32xf32> to vector<8x32xbf16>
    %146 = tpu.concatenate %141, %141, %141, %141 in 0 : vector<8x32xf32>, vector<8x32xf32>, vector<8x32xf32>, vector<8x32xf32> -> vector<32x32xf32>
    %147 = arith.mulf %146, %0 : vector<32x32xf32>
    %148 = arith.truncf %147 : vector<32x32xf32> to vector<32x32xbf16>
    %cst_63 = arith.constant dense<0.000000e+00> : vector<32x8xf32>
    %149 = tpu.matmul %148, %143, %cst_63 {dimension_numbers = #tpu.dot_dimension_numbers<[1], [1], [0], [0], [0, 0, 1, 0], [], []>} : vector<32x32xbf16>, vector<8x32xbf16>, vector<32x8xf32> -> vector<32x8xf32>
    %c0_64 = arith.constant 0 : index
    %c0_65 = arith.constant 0 : index
    %c0_66 = arith.constant 0 : index
    %150 = vector.load %arg5[%c0_64, %c0_65, %c0_66] : memref<2x8x8xf32, #tpu.memory_space<vmem>>, vector<1x8x8xf32>
    %151 = vector.shape_cast %150 : vector<1x8x8xf32> to vector<8x8xf32>
    %152 = tpu.concatenate %151, %151, %151, %151 in 0 : vector<8x8xf32>, vector<8x8xf32>, vector<8x8xf32>, vector<8x8xf32> -> vector<32x8xf32>
    %153 = arith.addf %149, %152 : vector<32x8xf32>
    %cst_67 = arith.constant dense<0xFF800000> : vector<32xf32>
    %154 = vector.multi_reduction <maximumf>, %153, %cst_67 [1] : vector<32x8xf32> to vector<32xf32>
    %155 = vector.shape_cast %154 : vector<32xf32> to vector<32x1xf32>
    %156 = vector.broadcast %155 : vector<32x1xf32> to vector<32x8xf32>
    %157 = arith.subf %153, %156 : vector<32x8xf32>
    %158 = math.exp %157 : vector<32x8xf32>
    %cst_68 = arith.constant dense<0.000000e+00> : vector<32xf32>
    %159 = vector.multi_reduction <add>, %158, %cst_68 [1] : vector<32x8xf32> to vector<32xf32>
    %160 = vector.shape_cast %159 : vector<32xf32> to vector<32x1xf32>
    %161 = tpu.reciprocal %160 {approx = true} : vector<32x1xf32> -> vector<32x1xf32>
    %162 = vector.broadcast %161 : vector<32x1xf32> to vector<32x8xf32>
    %163 = arith.mulf %158, %162 : vector<32x8xf32>
    %164 = arith.truncf %163 : vector<32x8xf32> to vector<32x8xbf16>
    %cst_69 = arith.constant dense<0.000000e+00> : vector<32x32xf32>
    %165 = tpu.matmul %164, %145, %cst_69 {dimension_numbers = #tpu.dot_dimension_numbers<[1], [0], [0], [1], [0, 0, 1, 1], [], []>} : vector<32x8xbf16>, vector<8x32xbf16>, vector<32x32xf32> -> vector<32x32xf32>
    %166 = arith.mulf %165, %0 : vector<32x32xf32>
    %167 = vector.extract_strided_slice %166 {offsets = [0, 0], sizes = [8, 32], strides = [1, 1]} : vector<32x32xf32> to vector<8x32xf32>
    %168 = vector.extract_strided_slice %166 {offsets = [8, 0], sizes = [8, 32], strides = [1, 1]} : vector<32x32xf32> to vector<8x32xf32>
    %169 = arith.addf %167, %168 : vector<8x32xf32>
    %170 = vector.extract_strided_slice %166 {offsets = [16, 0], sizes = [8, 32], strides = [1, 1]} : vector<32x32xf32> to vector<8x32xf32>
    %171 = arith.addf %169, %170 : vector<8x32xf32>
    %172 = vector.extract_strided_slice %166 {offsets = [24, 0], sizes = [8, 32], strides = [1, 1]} : vector<32x32xf32> to vector<8x32xf32>
    %173 = arith.addf %171, %172 : vector<8x32xf32>
    %174 = vector.extract_strided_slice %140 {offsets = [8, 0], sizes = [8, 32], strides = [1, 1]} : vector<16x32xf32> to vector<8x32xf32>
    %175 = vector.extract_strided_slice %20 {offsets = [8, 0], sizes = [8, 32], strides = [1, 1]} : vector<16x32xf32> to vector<8x32xf32>
    %176 = arith.truncf %175 : vector<8x32xf32> to vector<8x32xbf16>
    %177 = vector.extract_strided_slice %21 {offsets = [8, 0], sizes = [8, 32], strides = [1, 1]} : vector<16x32xf32> to vector<8x32xf32>
    %178 = arith.truncf %177 : vector<8x32xf32> to vector<8x32xbf16>
    %179 = tpu.concatenate %174, %174, %174, %174 in 0 : vector<8x32xf32>, vector<8x32xf32>, vector<8x32xf32>, vector<8x32xf32> -> vector<32x32xf32>
    %180 = arith.mulf %179, %0 : vector<32x32xf32>
    %181 = arith.truncf %180 : vector<32x32xf32> to vector<32x32xbf16>
    %cst_70 = arith.constant dense<0.000000e+00> : vector<32x8xf32>
    %182 = tpu.matmul %181, %176, %cst_70 {dimension_numbers = #tpu.dot_dimension_numbers<[1], [1], [0], [0], [0, 0, 1, 0], [], []>} : vector<32x32xbf16>, vector<8x32xbf16>, vector<32x8xf32> -> vector<32x8xf32>
    %c1_71 = arith.constant 1 : index
    %c0_72 = arith.constant 0 : index
    %c0_73 = arith.constant 0 : index
    %183 = vector.load %arg5[%c1_71, %c0_72, %c0_73] : memref<2x8x8xf32, #tpu.memory_space<vmem>>, vector<1x8x8xf32>
    %184 = vector.shape_cast %183 : vector<1x8x8xf32> to vector<8x8xf32>
    %185 = tpu.concatenate %184, %184, %184, %184 in 0 : vector<8x8xf32>, vector<8x8xf32>, vector<8x8xf32>, vector<8x8xf32> -> vector<32x8xf32>
    %186 = arith.addf %182, %185 : vector<32x8xf32>
    %cst_74 = arith.constant dense<0xFF800000> : vector<32xf32>
    %187 = vector.multi_reduction <maximumf>, %186, %cst_74 [1] : vector<32x8xf32> to vector<32xf32>
    %188 = vector.shape_cast %187 : vector<32xf32> to vector<32x1xf32>
    %189 = vector.broadcast %188 : vector<32x1xf32> to vector<32x8xf32>
    %190 = arith.subf %186, %189 : vector<32x8xf32>
    %191 = math.exp %190 : vector<32x8xf32>
    %cst_75 = arith.constant dense<0.000000e+00> : vector<32xf32>
    %192 = vector.multi_reduction <add>, %191, %cst_75 [1] : vector<32x8xf32> to vector<32xf32>
    %193 = vector.shape_cast %192 : vector<32xf32> to vector<32x1xf32>
    %194 = tpu.reciprocal %193 {approx = true} : vector<32x1xf32> -> vector<32x1xf32>
    %195 = vector.broadcast %194 : vector<32x1xf32> to vector<32x8xf32>
    %196 = arith.mulf %191, %195 : vector<32x8xf32>
    %197 = arith.truncf %196 : vector<32x8xf32> to vector<32x8xbf16>
    %cst_76 = arith.constant dense<0.000000e+00> : vector<32x32xf32>
    %198 = tpu.matmul %197, %178, %cst_76 {dimension_numbers = #tpu.dot_dimension_numbers<[1], [0], [0], [1], [0, 0, 1, 1], [], []>} : vector<32x8xbf16>, vector<8x32xbf16>, vector<32x32xf32> -> vector<32x32xf32>
    %199 = arith.mulf %198, %0 : vector<32x32xf32>
    %200 = vector.extract_strided_slice %199 {offsets = [0, 0], sizes = [8, 32], strides = [1, 1]} : vector<32x32xf32> to vector<8x32xf32>
    %201 = vector.extract_strided_slice %199 {offsets = [8, 0], sizes = [8, 32], strides = [1, 1]} : vector<32x32xf32> to vector<8x32xf32>
    %202 = arith.addf %200, %201 : vector<8x32xf32>
    %203 = vector.extract_strided_slice %199 {offsets = [16, 0], sizes = [8, 32], strides = [1, 1]} : vector<32x32xf32> to vector<8x32xf32>
    %204 = arith.addf %202, %203 : vector<8x32xf32>
    %205 = vector.extract_strided_slice %199 {offsets = [24, 0], sizes = [8, 32], strides = [1, 1]} : vector<32x32xf32> to vector<8x32xf32>
    %206 = arith.addf %204, %205 : vector<8x32xf32>
    %207 = tpu.concatenate %173, %206 in 0 : vector<8x32xf32>, vector<8x32xf32> -> vector<16x32xf32>
    %208 = arith.truncf %207 : vector<16x32xf32> to vector<16x32xbf16>
    %c1_77 = arith.constant 1 : index
    %c0_78 = arith.constant 0 : index
    %c0_79 = arith.constant 0 : index
    %209 = vector.load %arg14[%c1_77, %c0_78, %c0_79] : memref<3x32x32xbf16, #tpu.memory_space<vmem>>, vector<1x32x32xbf16>
    %210 = vector.shape_cast %209 : vector<1x32x32xbf16> to vector<32x32xbf16>
    %cst_80 = arith.constant dense<0.000000e+00> : vector<16x32xf32>
    %211 = tpu.matmul %208, %210, %cst_80 {dimension_numbers = #tpu.dot_dimension_numbers<[1], [0], [0], [1], [0, 0, 1, 1], [], []>} : vector<16x32xbf16>, vector<32x32xbf16>, vector<16x32xf32> -> vector<16x32xf32>
    %c1_81 = arith.constant 1 : index
    %c0_82 = arith.constant 0 : index
    %c0_83 = arith.constant 0 : index
    %212 = vector.load %arg15[%c1_81, %c0_82, %c0_83] : memref<3x1x32xf32, #tpu.memory_space<vmem>>, vector<1x1x32xf32>
    %213 = vector.shape_cast %212 : vector<1x1x32xf32> to vector<1x32xf32>
    %214 = vector.broadcast %213 : vector<1x32xf32> to vector<16x32xf32>
    %215 = arith.addf %211, %214 : vector<16x32xf32>
    %216 = arith.addf %132, %215 : vector<16x32xf32>
    %c1_84 = arith.constant 1 : index
    %c0_85 = arith.constant 0 : index
    %c0_86 = arith.constant 0 : index
    %217 = vector.load %arg16[%c1_84, %c0_85, %c0_86] : memref<4x1x32xf32, #tpu.memory_space<vmem>>, vector<1x1x32xf32>
    %218 = vector.shape_cast %217 : vector<1x1x32xf32> to vector<1x32xf32>
    %c1_87 = arith.constant 1 : index
    %c0_88 = arith.constant 0 : index
    %c0_89 = arith.constant 0 : index
    %219 = vector.load %arg17[%c1_87, %c0_88, %c0_89] : memref<4x1x32xf32, #tpu.memory_space<vmem>>, vector<1x1x32xf32>
    %220 = vector.shape_cast %219 : vector<1x1x32xf32> to vector<1x32xf32>
    %cst_90 = arith.constant dense<0.000000e+00> : vector<16xf32>
    %221 = vector.multi_reduction <add>, %216, %cst_90 [1] : vector<16x32xf32> to vector<16xf32>
    %222 = vector.shape_cast %221 : vector<16xf32> to vector<16x1xf32>
    %cst_91 = arith.constant 3.200000e+01 : f32
    %223 = vector.broadcast %cst_91 : f32 to vector<16x1xf32>
    %224 = arith.divf %222, %223 : vector<16x1xf32>
    %225 = vector.broadcast %224 : vector<16x1xf32> to vector<16x32xf32>
    %226 = arith.subf %216, %225 : vector<16x32xf32>
    %227 = arith.mulf %226, %226 : vector<16x32xf32>
    %cst_92 = arith.constant dense<0.000000e+00> : vector<16xf32>
    %228 = vector.multi_reduction <add>, %227, %cst_92 [1] : vector<16x32xf32> to vector<16xf32>
    %229 = vector.shape_cast %228 : vector<16xf32> to vector<16x1xf32>
    %cst_93 = arith.constant 3.200000e+01 : f32
    %230 = vector.broadcast %cst_93 : f32 to vector<16x1xf32>
    %231 = arith.divf %229, %230 : vector<16x1xf32>
    %cst_94 = arith.constant 9.99999974E-6 : f32
    %232 = vector.broadcast %cst_94 : f32 to vector<16x1xf32>
    %233 = arith.addf %231, %232 : vector<16x1xf32>
    %234 = math.rsqrt %233 : vector<16x1xf32>
    %235 = vector.broadcast %234 : vector<16x1xf32> to vector<16x32xf32>
    %236 = arith.mulf %226, %235 : vector<16x32xf32>
    %237 = vector.broadcast %218 : vector<1x32xf32> to vector<16x32xf32>
    %238 = arith.mulf %236, %237 : vector<16x32xf32>
    %239 = vector.broadcast %220 : vector<1x32xf32> to vector<16x32xf32>
    %240 = arith.addf %238, %239 : vector<16x32xf32>
    %c1_95 = arith.constant 1 : index
    %c0_96 = arith.constant 0 : index
    %c0_97 = arith.constant 0 : index
    %241 = vector.load %arg10[%c1_95, %c0_96, %c0_97] : memref<2x32x32xbf16, #tpu.memory_space<vmem>>, vector<1x32x32xbf16>
    %242 = vector.shape_cast %241 : vector<1x32x32xbf16> to vector<32x32xbf16>
    %c1_98 = arith.constant 1 : index
    %c0_99 = arith.constant 0 : index
    %c0_100 = arith.constant 0 : index
    %243 = vector.load %arg11[%c1_98, %c0_99, %c0_100] : memref<2x1x32xf32, #tpu.memory_space<vmem>>, vector<1x1x32xf32>
    %244 = vector.shape_cast %243 : vector<1x1x32xf32> to vector<1x32xf32>
    %245 = arith.truncf %240 : vector<16x32xf32> to vector<16x32xbf16>
    %cst_101 = arith.constant dense<0.000000e+00> : vector<16x32xf32>
    %246 = tpu.matmul %245, %242, %cst_101 {dimension_numbers = #tpu.dot_dimension_numbers<[1], [0], [0], [1], [0, 0, 1, 1], [], []>} : vector<16x32xbf16>, vector<32x32xbf16>, vector<16x32xf32> -> vector<16x32xf32>
    %247 = vector.broadcast %244 : vector<1x32xf32> to vector<16x32xf32>
    %248 = arith.addf %246, %247 : vector<16x32xf32>
    %249 = vector.extract_strided_slice %248 {offsets = [0, 0], sizes = [8, 32], strides = [1, 1]} : vector<16x32xf32> to vector<8x32xf32>
    %250 = vector.extract_strided_slice %22 {offsets = [0, 0], sizes = [16, 32], strides = [1, 1]} : vector<32x32xf32> to vector<16x32xf32>
    %251 = arith.truncf %250 : vector<16x32xf32> to vector<16x32xbf16>
    %252 = vector.extract_strided_slice %23 {offsets = [0, 0], sizes = [16, 32], strides = [1, 1]} : vector<32x32xf32> to vector<16x32xf32>
    %253 = arith.truncf %252 : vector<16x32xf32> to vector<16x32xbf16>
    %254 = tpu.concatenate %249, %249, %249, %249 in 0 : vector<8x32xf32>, vector<8x32xf32>, vector<8x32xf32>, vector<8x32xf32> -> vector<32x32xf32>
    %255 = arith.mulf %254, %0 : vector<32x32xf32>
    %256 = arith.truncf %255 : vector<32x32xf32> to vector<32x32xbf16>
    %cst_102 = arith.constant dense<0.000000e+00> : vector<32x16xf32>
    %257 = tpu.matmul %256, %251, %cst_102 {dimension_numbers = #tpu.dot_dimension_numbers<[1], [1], [0], [0], [0, 0, 1, 0], [], []>} : vector<32x32xbf16>, vector<16x32xbf16>, vector<32x16xf32> -> vector<32x16xf32>
    %c0_103 = arith.constant 0 : index
    %c0_104 = arith.constant 0 : index
    %c0_105 = arith.constant 0 : index
    %258 = vector.load %arg6[%c0_103, %c0_104, %c0_105] : memref<2x8x16xf32, #tpu.memory_space<vmem>>, vector<1x8x16xf32>
    %259 = vector.shape_cast %258 : vector<1x8x16xf32> to vector<8x16xf32>
    %260 = tpu.concatenate %259, %259, %259, %259 in 0 : vector<8x16xf32>, vector<8x16xf32>, vector<8x16xf32>, vector<8x16xf32> -> vector<32x16xf32>
    %261 = arith.addf %257, %260 : vector<32x16xf32>
    %cst_106 = arith.constant dense<0xFF800000> : vector<32xf32>
    %262 = vector.multi_reduction <maximumf>, %261, %cst_106 [1] : vector<32x16xf32> to vector<32xf32>
    %263 = vector.shape_cast %262 : vector<32xf32> to vector<32x1xf32>
    %264 = vector.broadcast %263 : vector<32x1xf32> to vector<32x16xf32>
    %265 = arith.subf %261, %264 : vector<32x16xf32>
    %266 = math.exp %265 : vector<32x16xf32>
    %cst_107 = arith.constant dense<0.000000e+00> : vector<32xf32>
    %267 = vector.multi_reduction <add>, %266, %cst_107 [1] : vector<32x16xf32> to vector<32xf32>
    %268 = vector.shape_cast %267 : vector<32xf32> to vector<32x1xf32>
    %269 = tpu.reciprocal %268 {approx = true} : vector<32x1xf32> -> vector<32x1xf32>
    %270 = vector.broadcast %269 : vector<32x1xf32> to vector<32x16xf32>
    %271 = arith.mulf %266, %270 : vector<32x16xf32>
    %272 = arith.truncf %271 : vector<32x16xf32> to vector<32x16xbf16>
    %cst_108 = arith.constant dense<0.000000e+00> : vector<32x32xf32>
    %273 = tpu.matmul %272, %253, %cst_108 {dimension_numbers = #tpu.dot_dimension_numbers<[1], [0], [0], [1], [0, 0, 1, 1], [], []>} : vector<32x16xbf16>, vector<16x32xbf16>, vector<32x32xf32> -> vector<32x32xf32>
    %274 = arith.mulf %273, %0 : vector<32x32xf32>
    %275 = vector.extract_strided_slice %274 {offsets = [0, 0], sizes = [8, 32], strides = [1, 1]} : vector<32x32xf32> to vector<8x32xf32>
    %276 = vector.extract_strided_slice %274 {offsets = [8, 0], sizes = [8, 32], strides = [1, 1]} : vector<32x32xf32> to vector<8x32xf32>
    %277 = arith.addf %275, %276 : vector<8x32xf32>
    %278 = vector.extract_strided_slice %274 {offsets = [16, 0], sizes = [8, 32], strides = [1, 1]} : vector<32x32xf32> to vector<8x32xf32>
    %279 = arith.addf %277, %278 : vector<8x32xf32>
    %280 = vector.extract_strided_slice %274 {offsets = [24, 0], sizes = [8, 32], strides = [1, 1]} : vector<32x32xf32> to vector<8x32xf32>
    %281 = arith.addf %279, %280 : vector<8x32xf32>
    %282 = vector.extract_strided_slice %248 {offsets = [8, 0], sizes = [8, 32], strides = [1, 1]} : vector<16x32xf32> to vector<8x32xf32>
    %283 = vector.extract_strided_slice %22 {offsets = [16, 0], sizes = [16, 32], strides = [1, 1]} : vector<32x32xf32> to vector<16x32xf32>
    %284 = arith.truncf %283 : vector<16x32xf32> to vector<16x32xbf16>
    %285 = vector.extract_strided_slice %23 {offsets = [16, 0], sizes = [16, 32], strides = [1, 1]} : vector<32x32xf32> to vector<16x32xf32>
    %286 = arith.truncf %285 : vector<16x32xf32> to vector<16x32xbf16>
    %287 = tpu.concatenate %282, %282, %282, %282 in 0 : vector<8x32xf32>, vector<8x32xf32>, vector<8x32xf32>, vector<8x32xf32> -> vector<32x32xf32>
    %288 = arith.mulf %287, %0 : vector<32x32xf32>
    %289 = arith.truncf %288 : vector<32x32xf32> to vector<32x32xbf16>
    %cst_109 = arith.constant dense<0.000000e+00> : vector<32x16xf32>
    %290 = tpu.matmul %289, %284, %cst_109 {dimension_numbers = #tpu.dot_dimension_numbers<[1], [1], [0], [0], [0, 0, 1, 0], [], []>} : vector<32x32xbf16>, vector<16x32xbf16>, vector<32x16xf32> -> vector<32x16xf32>
    %c1_110 = arith.constant 1 : index
    %c0_111 = arith.constant 0 : index
    %c0_112 = arith.constant 0 : index
    %291 = vector.load %arg6[%c1_110, %c0_111, %c0_112] : memref<2x8x16xf32, #tpu.memory_space<vmem>>, vector<1x8x16xf32>
    %292 = vector.shape_cast %291 : vector<1x8x16xf32> to vector<8x16xf32>
    %293 = tpu.concatenate %292, %292, %292, %292 in 0 : vector<8x16xf32>, vector<8x16xf32>, vector<8x16xf32>, vector<8x16xf32> -> vector<32x16xf32>
    %294 = arith.addf %290, %293 : vector<32x16xf32>
    %cst_113 = arith.constant dense<0xFF800000> : vector<32xf32>
    %295 = vector.multi_reduction <maximumf>, %294, %cst_113 [1] : vector<32x16xf32> to vector<32xf32>
    %296 = vector.shape_cast %295 : vector<32xf32> to vector<32x1xf32>
    %297 = vector.broadcast %296 : vector<32x1xf32> to vector<32x16xf32>
    %298 = arith.subf %294, %297 : vector<32x16xf32>
    %299 = math.exp %298 : vector<32x16xf32>
    %cst_114 = arith.constant dense<0.000000e+00> : vector<32xf32>
    %300 = vector.multi_reduction <add>, %299, %cst_114 [1] : vector<32x16xf32> to vector<32xf32>
    %301 = vector.shape_cast %300 : vector<32xf32> to vector<32x1xf32>
    %302 = tpu.reciprocal %301 {approx = true} : vector<32x1xf32> -> vector<32x1xf32>
    %303 = vector.broadcast %302 : vector<32x1xf32> to vector<32x16xf32>
    %304 = arith.mulf %299, %303 : vector<32x16xf32>
    %305 = arith.truncf %304 : vector<32x16xf32> to vector<32x16xbf16>
    %cst_115 = arith.constant dense<0.000000e+00> : vector<32x32xf32>
    %306 = tpu.matmul %305, %286, %cst_115 {dimension_numbers = #tpu.dot_dimension_numbers<[1], [0], [0], [1], [0, 0, 1, 1], [], []>} : vector<32x16xbf16>, vector<16x32xbf16>, vector<32x32xf32> -> vector<32x32xf32>
    %307 = arith.mulf %306, %0 : vector<32x32xf32>
    %308 = vector.extract_strided_slice %307 {offsets = [0, 0], sizes = [8, 32], strides = [1, 1]} : vector<32x32xf32> to vector<8x32xf32>
    %309 = vector.extract_strided_slice %307 {offsets = [8, 0], sizes = [8, 32], strides = [1, 1]} : vector<32x32xf32> to vector<8x32xf32>
    %310 = arith.addf %308, %309 : vector<8x32xf32>
    %311 = vector.extract_strided_slice %307 {offsets = [16, 0], sizes = [8, 32], strides = [1, 1]} : vector<32x32xf32> to vector<8x32xf32>
    %312 = arith.addf %310, %311 : vector<8x32xf32>
    %313 = vector.extract_strided_slice %307 {offsets = [24, 0], sizes = [8, 32], strides = [1, 1]} : vector<32x32xf32> to vector<8x32xf32>
    %314 = arith.addf %312, %313 : vector<8x32xf32>
    %315 = tpu.concatenate %281, %314 in 0 : vector<8x32xf32>, vector<8x32xf32> -> vector<16x32xf32>
    %316 = arith.truncf %315 : vector<16x32xf32> to vector<16x32xbf16>
    %c2 = arith.constant 2 : index
    %c0_116 = arith.constant 0 : index
    %c0_117 = arith.constant 0 : index
    %317 = vector.load %arg14[%c2, %c0_116, %c0_117] : memref<3x32x32xbf16, #tpu.memory_space<vmem>>, vector<1x32x32xbf16>
    %318 = vector.shape_cast %317 : vector<1x32x32xbf16> to vector<32x32xbf16>
    %cst_118 = arith.constant dense<0.000000e+00> : vector<16x32xf32>
    %319 = tpu.matmul %316, %318, %cst_118 {dimension_numbers = #tpu.dot_dimension_numbers<[1], [0], [0], [1], [0, 0, 1, 1], [], []>} : vector<16x32xbf16>, vector<32x32xbf16>, vector<16x32xf32> -> vector<16x32xf32>
    %c2_119 = arith.constant 2 : index
    %c0_120 = arith.constant 0 : index
    %c0_121 = arith.constant 0 : index
    %320 = vector.load %arg15[%c2_119, %c0_120, %c0_121] : memref<3x1x32xf32, #tpu.memory_space<vmem>>, vector<1x1x32xf32>
    %321 = vector.shape_cast %320 : vector<1x1x32xf32> to vector<1x32xf32>
    %322 = vector.broadcast %321 : vector<1x32xf32> to vector<16x32xf32>
    %323 = arith.addf %319, %322 : vector<16x32xf32>
    %324 = arith.addf %240, %323 : vector<16x32xf32>
    %c2_122 = arith.constant 2 : index
    %c0_123 = arith.constant 0 : index
    %c0_124 = arith.constant 0 : index
    %325 = vector.load %arg16[%c2_122, %c0_123, %c0_124] : memref<4x1x32xf32, #tpu.memory_space<vmem>>, vector<1x1x32xf32>
    %326 = vector.shape_cast %325 : vector<1x1x32xf32> to vector<1x32xf32>
    %c2_125 = arith.constant 2 : index
    %c0_126 = arith.constant 0 : index
    %c0_127 = arith.constant 0 : index
    %327 = vector.load %arg17[%c2_125, %c0_126, %c0_127] : memref<4x1x32xf32, #tpu.memory_space<vmem>>, vector<1x1x32xf32>
    %328 = vector.shape_cast %327 : vector<1x1x32xf32> to vector<1x32xf32>
    %cst_128 = arith.constant dense<0.000000e+00> : vector<16xf32>
    %329 = vector.multi_reduction <add>, %324, %cst_128 [1] : vector<16x32xf32> to vector<16xf32>
    %330 = vector.shape_cast %329 : vector<16xf32> to vector<16x1xf32>
    %cst_129 = arith.constant 3.200000e+01 : f32
    %331 = vector.broadcast %cst_129 : f32 to vector<16x1xf32>
    %332 = arith.divf %330, %331 : vector<16x1xf32>
    %333 = vector.broadcast %332 : vector<16x1xf32> to vector<16x32xf32>
    %334 = arith.subf %324, %333 : vector<16x32xf32>
    %335 = arith.mulf %334, %334 : vector<16x32xf32>
    %cst_130 = arith.constant dense<0.000000e+00> : vector<16xf32>
    %336 = vector.multi_reduction <add>, %335, %cst_130 [1] : vector<16x32xf32> to vector<16xf32>
    %337 = vector.shape_cast %336 : vector<16xf32> to vector<16x1xf32>
    %cst_131 = arith.constant 3.200000e+01 : f32
    %338 = vector.broadcast %cst_131 : f32 to vector<16x1xf32>
    %339 = arith.divf %337, %338 : vector<16x1xf32>
    %cst_132 = arith.constant 9.99999974E-6 : f32
    %340 = vector.broadcast %cst_132 : f32 to vector<16x1xf32>
    %341 = arith.addf %339, %340 : vector<16x1xf32>
    %342 = math.rsqrt %341 : vector<16x1xf32>
    %343 = vector.broadcast %342 : vector<16x1xf32> to vector<16x32xf32>
    %344 = arith.mulf %334, %343 : vector<16x32xf32>
    %345 = vector.broadcast %326 : vector<1x32xf32> to vector<16x32xf32>
    %346 = arith.mulf %344, %345 : vector<16x32xf32>
    %347 = vector.broadcast %328 : vector<1x32xf32> to vector<16x32xf32>
    %348 = arith.addf %346, %347 : vector<16x32xf32>
    %c0_133 = arith.constant 0 : index
    %c0_134 = arith.constant 0 : index
    %349 = vector.load %arg18[%c0_133, %c0_134] : memref<32x64xbf16, #tpu.memory_space<vmem>>, vector<32x64xbf16>
    %c0_135 = arith.constant 0 : index
    %c0_136 = arith.constant 0 : index
    %350 = vector.load %arg19[%c0_135, %c0_136] : memref<1x64xf32, #tpu.memory_space<vmem>>, vector<1x64xf32>
    %351 = arith.truncf %348 : vector<16x32xf32> to vector<16x32xbf16>
    %cst_137 = arith.constant dense<0.000000e+00> : vector<16x64xf32>
    %352 = tpu.matmul %351, %349, %cst_137 {dimension_numbers = #tpu.dot_dimension_numbers<[1], [0], [0], [1], [0, 0, 1, 1], [], []>} : vector<16x32xbf16>, vector<32x64xbf16>, vector<16x64xf32> -> vector<16x64xf32>
    %353 = vector.broadcast %350 : vector<1x64xf32> to vector<16x64xf32>
    %354 = arith.addf %352, %353 : vector<16x64xf32>
    %cst_138 = arith.constant 5.000000e-01 : f32
    %355 = vector.broadcast %cst_138 : f32 to vector<16x64xf32>
    %356 = arith.mulf %355, %354 : vector<16x64xf32>
    %cst_139 = arith.constant 4.471500e-02 : f32
    %357 = vector.broadcast %cst_139 : f32 to vector<16x64xf32>
    %358 = arith.mulf %357, %354 : vector<16x64xf32>
    %359 = arith.mulf %358, %354 : vector<16x64xf32>
    %360 = arith.mulf %359, %354 : vector<16x64xf32>
    %361 = arith.addf %354, %360 : vector<16x64xf32>
    %cst_140 = arith.constant 0.797884583 : f32
    %362 = vector.broadcast %cst_140 : f32 to vector<16x64xf32>
    %363 = arith.mulf %362, %361 : vector<16x64xf32>
    %364 = math.tanh %363 : vector<16x64xf32>
    %cst_141 = arith.constant 1.000000e+00 : f32
    %365 = vector.broadcast %cst_141 : f32 to vector<16x64xf32>
    %366 = arith.addf %365, %364 : vector<16x64xf32>
    %367 = arith.mulf %356, %366 : vector<16x64xf32>
    %c0_142 = arith.constant 0 : index
    %c0_143 = arith.constant 0 : index
    %368 = vector.load %arg20[%c0_142, %c0_143] : memref<64x32xbf16, #tpu.memory_space<vmem>>, vector<64x32xbf16>
    %c0_144 = arith.constant 0 : index
    %c0_145 = arith.constant 0 : index
    %369 = vector.load %arg21[%c0_144, %c0_145] : memref<1x32xf32, #tpu.memory_space<vmem>>, vector<1x32xf32>
    %370 = arith.truncf %367 : vector<16x64xf32> to vector<16x64xbf16>
    %cst_146 = arith.constant dense<0.000000e+00> : vector<16x32xf32>
    %371 = tpu.matmul %370, %368, %cst_146 {dimension_numbers = #tpu.dot_dimension_numbers<[1], [0], [0], [1], [0, 0, 1, 1], [], []>} : vector<16x64xbf16>, vector<64x32xbf16>, vector<16x32xf32> -> vector<16x32xf32>
    %372 = vector.broadcast %369 : vector<1x32xf32> to vector<16x32xf32>
    %373 = arith.addf %371, %372 : vector<16x32xf32>
    %374 = arith.addf %348, %373 : vector<16x32xf32>
    %c3 = arith.constant 3 : index
    %c0_147 = arith.constant 0 : index
    %c0_148 = arith.constant 0 : index
    %375 = vector.load %arg16[%c3, %c0_147, %c0_148] : memref<4x1x32xf32, #tpu.memory_space<vmem>>, vector<1x1x32xf32>
    %376 = vector.shape_cast %375 : vector<1x1x32xf32> to vector<1x32xf32>
    %c3_149 = arith.constant 3 : index
    %c0_150 = arith.constant 0 : index
    %c0_151 = arith.constant 0 : index
    %377 = vector.load %arg17[%c3_149, %c0_150, %c0_151] : memref<4x1x32xf32, #tpu.memory_space<vmem>>, vector<1x1x32xf32>
    %378 = vector.shape_cast %377 : vector<1x1x32xf32> to vector<1x32xf32>
    %cst_152 = arith.constant dense<0.000000e+00> : vector<16xf32>
    %379 = vector.multi_reduction <add>, %374, %cst_152 [1] : vector<16x32xf32> to vector<16xf32>
    %380 = vector.shape_cast %379 : vector<16xf32> to vector<16x1xf32>
    %cst_153 = arith.constant 3.200000e+01 : f32
    %381 = vector.broadcast %cst_153 : f32 to vector<16x1xf32>
    %382 = arith.divf %380, %381 : vector<16x1xf32>
    %383 = vector.broadcast %382 : vector<16x1xf32> to vector<16x32xf32>
    %384 = arith.subf %374, %383 : vector<16x32xf32>
    %385 = arith.mulf %384, %384 : vector<16x32xf32>
    %cst_154 = arith.constant dense<0.000000e+00> : vector<16xf32>
    %386 = vector.multi_reduction <add>, %385, %cst_154 [1] : vector<16x32xf32> to vector<16xf32>
    %387 = vector.shape_cast %386 : vector<16xf32> to vector<16x1xf32>
    %cst_155 = arith.constant 3.200000e+01 : f32
    %388 = vector.broadcast %cst_155 : f32 to vector<16x1xf32>
    %389 = arith.divf %387, %388 : vector<16x1xf32>
    %cst_156 = arith.constant 9.99999974E-6 : f32
    %390 = vector.broadcast %cst_156 : f32 to vector<16x1xf32>
    %391 = arith.addf %389, %390 : vector<16x1xf32>
    %392 = math.rsqrt %391 : vector<16x1xf32>
    %393 = vector.broadcast %392 : vector<16x1xf32> to vector<16x32xf32>
    %394 = arith.mulf %384, %393 : vector<16x32xf32>
    %395 = vector.broadcast %376 : vector<1x32xf32> to vector<16x32xf32>
    %396 = arith.mulf %394, %395 : vector<16x32xf32>
    %397 = vector.broadcast %378 : vector<1x32xf32> to vector<16x32xf32>
    %398 = arith.addf %396, %397 : vector<16x32xf32>
    %c0_157 = arith.constant 0 : index
    %c0_158 = arith.constant 0 : index
    %399 = vector.load %arg22[%c0_157, %c0_158] : memref<16x32xf32, #tpu.memory_space<vmem>>, vector<16x32xf32>
    tpu.vector_store %arg22[%c0_157, %c0_158], %398 {strides = array<i32>} : memref<16x32xf32, #tpu.memory_space<vmem>>, vector<16x32xf32>,
    %400 = vector.extract_strided_slice %31 {offsets = [0, 0], sizes = [8, 32], strides = [1, 1]} : vector<16x32xf32> to vector<8x32xf32>
    %c0_159 = arith.constant 0 : index
    %c0_160 = arith.constant 0 : index
    %401 = vector.load %arg23[%c0_159, %c0_160] : memref<128x32xf32, #tpu.memory_space<vmem>>, vector<8x32xf32>
    tpu.vector_store %arg23[%c0_159, %c0_160], %400 {strides = array<i32>} : memref<128x32xf32, #tpu.memory_space<vmem>>, vector<8x32xf32>,
    %402 = vector.extract_strided_slice %32 {offsets = [0, 0], sizes = [8, 32], strides = [1, 1]} : vector<16x32xf32> to vector<8x32xf32>
    %c8 = arith.constant 8 : index
    %c0_161 = arith.constant 0 : index
    %403 = vector.load %arg23[%c8, %c0_161] : memref<128x32xf32, #tpu.memory_space<vmem>>, vector<8x32xf32>
    tpu.vector_store %arg23[%c8, %c0_161], %402 {strides = array<i32>} : memref<128x32xf32, #tpu.memory_space<vmem>>, vector<8x32xf32>,
    %404 = vector.extract_strided_slice %20 {offsets = [0, 0], sizes = [8, 32], strides = [1, 1]} : vector<16x32xf32> to vector<8x32xf32>
    %c16 = arith.constant 16 : index
    %c0_162 = arith.constant 0 : index
    %405 = vector.load %arg23[%c16, %c0_162] : memref<128x32xf32, #tpu.memory_space<vmem>>, vector<8x32xf32>
    tpu.vector_store %arg23[%c16, %c0_162], %404 {strides = array<i32>} : memref<128x32xf32, #tpu.memory_space<vmem>>, vector<8x32xf32>,
    %406 = vector.extract_strided_slice %21 {offsets = [0, 0], sizes = [8, 32], strides = [1, 1]} : vector<16x32xf32> to vector<8x32xf32>
    %c24 = arith.constant 24 : index
    %c0_163 = arith.constant 0 : index
    %407 = vector.load %arg23[%c24, %c0_163] : memref<128x32xf32, #tpu.memory_space<vmem>>, vector<8x32xf32>
    tpu.vector_store %arg23[%c24, %c0_163], %406 {strides = array<i32>} : memref<128x32xf32, #tpu.memory_space<vmem>>, vector<8x32xf32>,
    %408 = vector.extract_strided_slice %22 {offsets = [0, 0], sizes = [16, 32], strides = [1, 1]} : vector<32x32xf32> to vector<16x32xf32>
    %c32 = arith.constant 32 : index
    %c0_164 = arith.constant 0 : index
    %409 = vector.load %arg23[%c32, %c0_164] : memref<128x32xf32, #tpu.memory_space<vmem>>, vector<16x32xf32>
    tpu.vector_store %arg23[%c32, %c0_164], %408 {strides = array<i32>} : memref<128x32xf32, #tpu.memory_space<vmem>>, vector<16x32xf32>,
    %410 = vector.extract_strided_slice %23 {offsets = [0, 0], sizes = [16, 32], strides = [1, 1]} : vector<32x32xf32> to vector<16x32xf32>
    %c48 = arith.constant 48 : index
    %c0_165 = arith.constant 0 : index
    %411 = vector.load %arg23[%c48, %c0_165] : memref<128x32xf32, #tpu.memory_space<vmem>>, vector<16x32xf32>
    tpu.vector_store %arg23[%c48, %c0_165], %410 {strides = array<i32>} : memref<128x32xf32, #tpu.memory_space<vmem>>, vector<16x32xf32>,
    %412 = vector.extract_strided_slice %31 {offsets = [8, 0], sizes = [8, 32], strides = [1, 1]} : vector<16x32xf32> to vector<8x32xf32>
    %c64 = arith.constant 64 : index
    %c0_166 = arith.constant 0 : index
    %413 = vector.load %arg23[%c64, %c0_166] : memref<128x32xf32, #tpu.memory_space<vmem>>, vector<8x32xf32>
    tpu.vector_store %arg23[%c64, %c0_166], %412 {strides = array<i32>} : memref<128x32xf32, #tpu.memory_space<vmem>>, vector<8x32xf32>,
    %414 = vector.extract_strided_slice %32 {offsets = [8, 0], sizes = [8, 32], strides = [1, 1]} : vector<16x32xf32> to vector<8x32xf32>
    %c72 = arith.constant 72 : index
    %c0_167 = arith.constant 0 : index
    %415 = vector.load %arg23[%c72, %c0_167] : memref<128x32xf32, #tpu.memory_space<vmem>>, vector<8x32xf32>
    tpu.vector_store %arg23[%c72, %c0_167], %414 {strides = array<i32>} : memref<128x32xf32, #tpu.memory_space<vmem>>, vector<8x32xf32>,
    %416 = vector.extract_strided_slice %20 {offsets = [8, 0], sizes = [8, 32], strides = [1, 1]} : vector<16x32xf32> to vector<8x32xf32>
    %c80 = arith.constant 80 : index
    %c0_168 = arith.constant 0 : index
    %417 = vector.load %arg23[%c80, %c0_168] : memref<128x32xf32, #tpu.memory_space<vmem>>, vector<8x32xf32>
    tpu.vector_store %arg23[%c80, %c0_168], %416 {strides = array<i32>} : memref<128x32xf32, #tpu.memory_space<vmem>>, vector<8x32xf32>,
    %418 = vector.extract_strided_slice %21 {offsets = [8, 0], sizes = [8, 32], strides = [1, 1]} : vector<16x32xf32> to vector<8x32xf32>
    %c88 = arith.constant 88 : index
    %c0_169 = arith.constant 0 : index
    %419 = vector.load %arg23[%c88, %c0_169] : memref<128x32xf32, #tpu.memory_space<vmem>>, vector<8x32xf32>
    tpu.vector_store %arg23[%c88, %c0_169], %418 {strides = array<i32>} : memref<128x32xf32, #tpu.memory_space<vmem>>, vector<8x32xf32>,
    %420 = vector.extract_strided_slice %22 {offsets = [16, 0], sizes = [16, 32], strides = [1, 1]} : vector<32x32xf32> to vector<16x32xf32>
    %c96 = arith.constant 96 : index
    %c0_170 = arith.constant 0 : index
    %421 = vector.load %arg23[%c96, %c0_170] : memref<128x32xf32, #tpu.memory_space<vmem>>, vector<16x32xf32>
    tpu.vector_store %arg23[%c96, %c0_170], %420 {strides = array<i32>} : memref<128x32xf32, #tpu.memory_space<vmem>>, vector<16x32xf32>,
    %422 = vector.extract_strided_slice %23 {offsets = [16, 0], sizes = [16, 32], strides = [1, 1]} : vector<32x32xf32> to vector<16x32xf32>
    %c112 = arith.constant 112 : index
    %c0_171 = arith.constant 0 : index
    %423 = vector.load %arg23[%c112, %c0_171] : memref<128x32xf32, #tpu.memory_space<vmem>>, vector<16x32xf32>
    tpu.vector_store %arg23[%c112, %c0_171], %422 {strides = array<i32>} : memref<128x32xf32, #tpu.memory_space<vmem>>, vector<16x32xf32>,
    return
  }
  func.func @transform_0(%arg0: i32) -> (i32, i32) {
    %c0_i32 = arith.constant 0 : i32
    %c0_i32_0 = arith.constant 0 : i32
    %c0_i32_1 = arith.constant 0 : i32
    return %c0_i32, %c0_i32_0 : i32, i32
  }
  func.func @transform_1(%arg0: i32) -> (i32, i32) {
    %c0_i32 = arith.constant 0 : i32
    %c0_i32_0 = arith.constant 0 : i32
    %c0_i32_1 = arith.constant 0 : i32
    return %c0_i32, %c0_i32_0 : i32, i32
  }
  func.func @transform_2(%arg0: i32) -> (i32, i32) {
    %c0_i32 = arith.constant 0 : i32
    %c0_i32_0 = arith.constant 0 : i32
    %c0_i32_1 = arith.constant 0 : i32
    return %c0_i32, %c0_i32_0 : i32, i32
  }
  func.func @transform_3(%arg0: i32) -> (i32, i32, i32) {
    %c0_i32 = arith.constant 0 : i32
    %c0_i32_0 = arith.constant 0 : i32
    %c0_i32_1 = arith.constant 0 : i32
    %c0_i32_2 = arith.constant 0 : i32
    return %c0_i32, %c0_i32_0, %c0_i32_1 : i32, i32, i32
  }
  func.func @transform_4(%arg0: i32) -> (i32, i32, i32) {
    %c0_i32 = arith.constant 0 : i32
    %c0_i32_0 = arith.constant 0 : i32
    %c0_i32_1 = arith.constant 0 : i32
    %c0_i32_2 = arith.constant 0 : i32
    return %c0_i32, %c0_i32_0, %c0_i32_1 : i32, i32, i32
  }
  func.func @transform_5(%arg0: i32) -> (i32, i32, i32) {
    %c0_i32 = arith.constant 0 : i32
    %c0_i32_0 = arith.constant 0 : i32
    %c0_i32_1 = arith.constant 0 : i32
    %c0_i32_2 = arith.constant 0 : i32
    return %c0_i32, %c0_i32_0, %c0_i32_1 : i32, i32, i32
  }
  func.func @transform_6(%arg0: i32) -> (i32, i32) {
    %c0_i32 = arith.constant 0 : i32
    %c0_i32_0 = arith.constant 0 : i32
    %c0_i32_1 = arith.constant 0 : i32
    return %c0_i32, %c0_i32_0 : i32, i32
  }
  func.func @transform_7(%arg0: i32) -> (i32, i32) {
    %c0_i32 = arith.constant 0 : i32
    %c0_i32_0 = arith.constant 0 : i32
    %c0_i32_1 = arith.constant 0 : i32
    return %c0_i32, %c0_i32_0 : i32, i32
  }
  func.func @transform_8(%arg0: i32) -> (i32, i32) {
    %c0_i32 = arith.constant 0 : i32
    %c0_i32_0 = arith.constant 0 : i32
    %c0_i32_1 = arith.constant 0 : i32
    return %c0_i32, %c0_i32_0 : i32, i32
  }
  func.func @transform_9(%arg0: i32) -> (i32, i32, i32) {
    %c0_i32 = arith.constant 0 : i32
    %c0_i32_0 = arith.constant 0 : i32
    %c0_i32_1 = arith.constant 0 : i32
    %c0_i32_2 = arith.constant 0 : i32
    return %c0_i32, %c0_i32_0, %c0_i32_1 : i32, i32, i32
  }
  func.func @transform_10(%arg0: i32) -> (i32, i32, i32) {
    %c0_i32 = arith.constant 0 : i32
    %c0_i32_0 = arith.constant 0 : i32
    %c0_i32_1 = arith.constant 0 : i32
    %c0_i32_2 = arith.constant 0 : i32
    return %c0_i32, %c0_i32_0, %c0_i32_1 : i32, i32, i32
  }
  func.func @transform_11(%arg0: i32) -> (i32, i32, i32) {
    %c0_i32 = arith.constant 0 : i32
    %c0_i32_0 = arith.constant 0 : i32
    %c0_i32_1 = arith.constant 0 : i32
    %c0_i32_2 = arith.constant 0 : i32
    return %c0_i32, %c0_i32_0, %c0_i32_1 : i32, i32, i32
  }
  func.func @transform_12(%arg0: i32) -> (i32, i32, i32) {
    %c0_i32 = arith.constant 0 : i32
    %c0_i32_0 = arith.constant 0 : i32
    %c0_i32_1 = arith.constant 0 : i32
    %c0_i32_2 = arith.constant 0 : i32
    return %c0_i32, %c0_i32_0, %c0_i32_1 : i32, i32, i32
  }
  func.func @transform_13(%arg0: i32) -> (i32, i32, i32) {
    %c0_i32 = arith.constant 0 : i32
    %c0_i32_0 = arith.constant 0 : i32
    %c0_i32_1 = arith.constant 0 : i32
    %c0_i32_2 = arith.constant 0 : i32
    return %c0_i32, %c0_i32_0, %c0_i32_1 : i32, i32, i32
  }
  func.func @transform_14(%arg0: i32) -> (i32, i32, i32) {
    %c0_i32 = arith.constant 0 : i32
    %c0_i32_0 = arith.constant 0 : i32
    %c0_i32_1 = arith.constant 0 : i32
    %c0_i32_2 = arith.constant 0 : i32
    return %c0_i32, %c0_i32_0, %c0_i32_1 : i32, i32, i32
  }
  func.func @transform_15(%arg0: i32) -> (i32, i32, i32) {
    %c0_i32 = arith.constant 0 : i32
    %c0_i32_0 = arith.constant 0 : i32
    %c0_i32_1 = arith.constant 0 : i32
    %c0_i32_2 = arith.constant 0 : i32
    return %c0_i32, %c0_i32_0, %c0_i32_1 : i32, i32, i32
  }
  func.func @transform_16(%arg0: i32) -> (i32, i32, i32) {
    %c0_i32 = arith.constant 0 : i32
    %c0_i32_0 = arith.constant 0 : i32
    %c0_i32_1 = arith.constant 0 : i32
    %c0_i32_2 = arith.constant 0 : i32
    return %c0_i32, %c0_i32_0, %c0_i32_1 : i32, i32, i32
  }
  func.func @transform_17(%arg0: i32) -> (i32, i32) {
    %c0_i32 = arith.constant 0 : i32
    %c0_i32_0 = arith.constant 0 : i32
    %c0_i32_1 = arith.constant 0 : i32
    return %c0_i32, %c0_i32_0 : i32, i32
  }
  func.func @transform_18(%arg0: i32) -> (i32, i32) {
    %c0_i32 = arith.constant 0 : i32
    %c0_i32_0 = arith.constant 0 : i32
    %c0_i32_1 = arith.constant 0 : i32
    return %c0_i32, %c0_i32_0 : i32, i32
  }
  func.func @transform_19(%arg0: i32) -> (i32, i32) {
    %c0_i32 = arith.constant 0 : i32
    %c0_i32_0 = arith.constant 0 : i32
    %c0_i32_1 = arith.constant 0 : i32
    return %c0_i32, %c0_i32_0 : i32, i32
  }
  func.func @transform_20(%arg0: i32) -> (i32, i32) {
    %c0_i32 = arith.constant 0 : i32
    %c0_i32_0 = arith.constant 0 : i32
    %c0_i32_1 = arith.constant 0 : i32
    return %c0_i32, %c0_i32_0 : i32, i32
  }
  func.func @transform_21(%arg0: i32) -> (i32, i32) {
    %c0_i32 = arith.constant 0 : i32
    %c0_i32_0 = arith.constant 0 : i32
    %c0_i32_1 = arith.constant 0 : i32
    return %c0_i32, %c0_i32_0 : i32, i32
  }
  func.func @transform_22(%arg0: i32) -> (i32, i32) {
    %c0_i32 = arith.constant 0 : i32
    %c0_i32_0 = arith.constant 0 : i32
    %c0_i32_1 = arith.constant 0 : i32
    return %c0_i32, %c0_i32_0 : i32, i32
  }
}

</mosaic_0001>

<bundles_post_ra>
// kernel: tpu_custom_call.1
= control target key start
LH: loop header
LB: loop body
LE: loop exit
PB: predicated region body
PF: predicated region fallthrough
CT: control target
= control target key end

     0   :  { %s3966_s0 = inlined_call_operand.vmem [shape: f32[16,32], index: 0, kind: input, shape index: {}]   ;;  %s3967_s1 = inlined_call_operand.hbm [shape: f32[16,32], index: 1, kind: input, shape index: {}]   ;;  %s3968_s2 = inlined_call_operand.hbm [shape: f32[32,32], index: 2, kind: input, shape index: {}]   ;;  %s3969_s3 = inlined_call_operand.hbm [shape: f32[2,8,8], index: 3, kind: input, shape index: {}]   ;;  %s3970_s4 = inlined_call_operand.hbm [shape: f32[2,8,8], index: 4, kind: input, shape index: {}]   ;;  %s3971_s5 = inlined_call_operand.hbm [shape: f32[2,8,16], index: 5, kind: input, shape index: {}]   ;;  %s3972_s6 = inlined_call_operand.hbm [shape: f32[32,32], index: 6, kind: input, shape index: {}]   ;;  %s3973_s7 = inlined_call_operand.hbm [shape: bf16[32,96], index: 7, kind: input, shape index: {}]   ;;  %s3974_s8 = inlined_call_operand.hbm [shape: f32[1,96], index: 8, kind: input, shape index: {}]   ;;  %s3975_s9 = inlined_call_operand.hbm [shape: bf16[2,32,32], index: 9, kind: input, shape index: {}]   ;;  %s3976_s10 = inlined_call_operand.hbm [shape: f32[2,1,32], index: 10, kind: input, shape index: {}]   ;;  %s3977_s11 = inlined_call_operand.hbm [shape: bf16[2,32,64], index: 11, kind: input, shape index: {}]   ;;  %s3978_s12 = inlined_call_operand.hbm [shape: f32[2,1,64], index: 12, kind: input, shape index: {}]   ;;  %s3979_s13 = inlined_call_operand.vmem [shape: bf16[3,32,32], index: 13, kind: input, shape index: {}]   ;;  %s3980_s14 = inlined_call_operand.hbm [shape: f32[3,1,32], index: 14, kind: input, shape index: {}]   ;;  %s3981_s15 = inlined_call_operand.hbm [shape: f32[4,1,32], index: 15, kind: input, shape index: {}]   ;;  %s3982_s16 = inlined_call_operand.hbm [shape: f32[4,1,32], index: 16, kind: input, shape index: {}]   ;;  %s3983_s17 = inlined_call_operand.hbm [shape: bf16[32,64], index: 17, kind: input, shape index: {}]   ;;  %s3984_s18 = inlined_call_operand.hbm [shape: f32[1,64], index: 18, kind: input, shape index: {}]   ;;  %s3985_s19 = inlined_call_operand.vmem [shape: bf16[64,32], index: 19, kind: input, shape index: {}]   ;;  %s3986_s20 = inlined_call_operand.vmem [shape: f32[1,32], index: 20, kind: input, shape index: {}]   ;;  %s3987_s21 = inlined_call_operand.hbm [shape: f32[16,32], index: 21, kind: output, shape index: {0}]   ;;  %s3988_s22 = inlined_call_operand.vmem [shape: f32[128,32], index: 22, kind: output, shape index: {1}]  }
   0x1   :  { %3990 = sst [smem:[#allocation40_spill]] %s3966_s0 }
   0x2   :  { %3991 = sst [smem:[#allocation41_spill]] %s3967_s1 }
   0x3   :  { %3992 = sst [smem:[#allocation42_spill]] %s3968_s2 }
   0x4   :  { %3993 = sst [smem:[#allocation43_spill]] %s3969_s3 }
   0x5   :  { %3994 = sst [smem:[#allocation44_spill]] %s3970_s4 }
   0x6   :  { %3995 = sst [smem:[#allocation45_spill]] %s3971_s5 }
   0x7   :  { %3996 = sst [smem:[#allocation46_spill]] %s3972_s6 }
   0x8   :  { %28 = vsyncpa [#allocation3], 0 }
   0x9   :  { %29 = vsyncpa [#allocation6], 0 }
   0xa   :  { %30 = vsyncpa [#allocation9], 0 }
   0xb   :  { %31 = vsyncpa [#allocation12], 0 }
   0xc   :  { %32 = vsyncpa [#allocation15], 0 }
   0xd   :  { %33 = vsyncpa [#allocation18], 0 }
   0xe   :  { %34 = vsyncpa [#allocation21], 0 }
   0xf   :  { %35 = vsyncpa [#allocation24], 0 }
  0x10   :  { %36 = vsyncpa [#allocation27], 0 }
  0x11   :  { %37 = vsyncpa [#allocation4], 0  ;;  %s3275_s3 = smov [#allocation5]   ;;  %s3276_s29 = smov [#allocation8]  }
  0x12   :  { %s57_s28 = sshll.u32 %s3275_s3, 4  ;;  %s81_s30 = sshll.u32 %s3276_s29, 4  ;;  %s58_s28 = int_to_ptr.vmem [resolvable:$true] %s57_s28  ;;  %s82_s30 = int_to_ptr.vmem [resolvable:$true] %s81_s30 }
  0x13   :  { %s2903_s4 = scalar_lea.vmem %s58_s28, 512  ;;  %p2908_p1 = scmp.lt.s32.totalorder %s58_s28, %s58_s28 }
  0x14   :  { %p2904_p0 = scmp.ne.s32.totalorder %s58_s28, %s2903_s4  ;;  %p2909_p2 = scmp.lt.s32.totalorder %s2903_s4, %s2903_s4 }
  0x16   :  { %p2910_p3 = por %p2909_p2, %p2908_p1 }
  0x18   :  { %p2911_p4 = pnand %p2910_p3, %p2904_p0 }
  0x1a   :  { %2914 = shalt.err (!%p2911_p4)
}
  0x1b   :  { %s3277_s0 = smov 128   ;;  %s3278_s23 = smov 8  }
  0x1c   :  { %s3997_s24 = sld [smem:[#allocation42_spill]]  ;;  %s2923_s6 = scalar_lea.vmem %s82_s30, 256 }
  0x1d   :  { %p2924_p5 = scmp.ne.s32.totalorder %s82_s30, %s2923_s6  ;;  %p2928_p6 = scmp.lt.s32.totalorder %s82_s30, %s82_s30 }
  0x1e   :  { %p2929_p7 = scmp.lt.s32.totalorder %s2923_s6, %s2923_s6 }
  0x20   :  { %p2930_p8 = por %p2929_p7, %p2928_p6 }
  0x22   :  { %63 = dma.hbm_to_vmem [thread:$0]  %s3997_s24, 512, %s58_s28, [#allocation6], %s3277_s0, %s3277_s0, %s3278_s23  }
  0x23   :  { %p2931_p9 = pnand %p2930_p8, %p2924_p5 }
  0x25   :  { %2934 = shalt.err (!%p2931_p9)
}
  0x26   :  { %s3998_s2 = sld [smem:[#allocation44_spill]]  ;;  %s3279_s27 = smov [#allocation11]  }
  0x27   :  { %s105_s3 = sshll.u32 %s3279_s27, 4  ;;  %s3280_s29 = smov [#allocation14]   ;;  %s106_s3 = int_to_ptr.vmem [resolvable:$true] %s105_s3 }
  0x28   :  { %s130_s4 = sshll.u32 %s3280_s29, 4  ;;  %s2943_s28 = scalar_lea.vmem %s106_s3, 512  ;;  %s131_s4 = int_to_ptr.vmem [resolvable:$true] %s130_s4 }
  0x29   :  { %p2944_p10 = scmp.ne.s32.totalorder %s106_s3, %s2943_s28  ;;  %p2948_p11 = scmp.lt.s32.totalorder %s106_s3, %s106_s3 }
  0x2a   :  { %p2949_p12 = scmp.lt.s32.totalorder %s2943_s28, %s2943_s28 }
  0x2c   :  { %87 = dma.hbm_to_vmem [thread:$0]  %s3998_s2, 256, %s82_s30, [#allocation9], %s3277_s0, %s3277_s0, %s3278_s23  }
  0x2d   :  { %p2950_p13 = por %p2949_p12, %p2948_p11 }
  0x2f   :  { %p2951_p0 = pnand %p2950_p13, %p2944_p10 }
  0x31   :  { %2954 = shalt.err (!%p2951_p0)
}
  0x32   :  { %s3999_s24 = sld [smem:[#allocation46_spill]]  ;;  %s2963_s30 = scalar_lea.vmem %s131_s4, 16 }
  0x33   :  { %p2964_p1 = scmp.ne.s32.totalorder %s131_s4, %s2963_s30  ;;  %s2967_s6 = scalar_lea.vmem %s131_s4, 32 }
  0x34   :  { %p2968_p2 = scmp.lt.s32.totalorder %s131_s4, %s131_s4  ;;  %p2969_p3 = scmp.lt.s32.totalorder %s2967_s6, %s2963_s30 }
  0x36   :  { %p2970_p4 = por %p2969_p3, %p2968_p2 }
  0x38   :  { %111 = dma.hbm_to_vmem [thread:$0]  %s3999_s24, 512, %s106_s3, [#allocation12], %s3277_s0, %s3277_s0, %s3278_s23  }
  0x39   :  { %p2971_p5 = pnand %p2970_p4, %p2964_p1 }
  0x3b   :  { %2974 = shalt.err (!%p2971_p5)
}
  0x3c   :  { %133 = dma.hbm_to_vmem [thread:$0]  %s3974_s8, 16, %s131_s4, [#allocation15]  }
  0x3d   :  { %s3281_s2 = smov [#allocation17]  }
  0x3e   :  { %s151_s27 = sshll.u32 %s3281_s2, 4  ;;  %s152_s27 = int_to_ptr.vmem [resolvable:$true] %s151_s27 }
  0x3f   :  { %s2983_s29 = scalar_lea.vmem %s152_s27, 32  ;;  %p2988_p7 = scmp.lt.s32.totalorder %s152_s27, %s152_s27 }
  0x40   :  { %p2984_p6 = scmp.ne.s32.totalorder %s152_s27, %s2983_s29  ;;  %p2989_p8 = scmp.lt.s32.totalorder %s2983_s29, %s2983_s29 }
  0x42   :  { %p2990_p9 = por %p2989_p8, %p2988_p7 }
  0x44   :  { %p2991_p10 = pnand %p2990_p9, %p2984_p6 }
  0x46   :  { %2994 = shalt.err (!%p2991_p10)
}
  0x47   :  { %s3282_s3 = smov 16   ;;  %s3283_s28 = smov 1  }
  0x48   :  { %157 = dma.hbm_to_vmem [thread:$0]  %s3976_s10, 32, %s152_s27, [#allocation18], %s3282_s3, %s3282_s3, %s3283_s28  }
  0x49   :  { %s3284_s8 = smov [#allocation20]   ;;  %s3285_s24 = smov [#allocation23]  }
  0x4a   :  { %s175_s4 = sshll.u32 %s3284_s8, 4  ;;  %s201_s30 = sshll.u32 %s3285_s24, 4  ;;  %s176_s4 = int_to_ptr.vmem [resolvable:$true] %s175_s4  ;;  %s202_s30 = int_to_ptr.vmem [resolvable:$true] %s201_s30 }
  0x4b   :  { %s3003_s6 = scalar_lea.vmem %s176_s4, 32  ;;  %p3008_p12 = scmp.lt.s32.totalorder %s176_s4, %s176_s4 }
  0x4c   :  { %p3004_p11 = scmp.ne.s32.totalorder %s176_s4, %s3003_s6  ;;  %p3009_p13 = scmp.lt.s32.totalorder %s3003_s6, %s3003_s6 }
  0x4e   :  { %p3010_p0 = por %p3009_p13, %p3008_p12 }
  0x50   :  { %p3011_p1 = pnand %p3010_p0, %p3004_p11 }
  0x52   :  { %3014 = shalt.err (!%p3011_p1)
}
  0x53   :  { %181 = dma.hbm_to_vmem [thread:$0]  %s3978_s12, 32, %s176_s4, [#allocation21], %s3282_s3, %s3282_s3, %s3283_s28  }
  0x54   :  { %s3023_s10 = scalar_lea.vmem %s202_s30, 64  ;;  %p3028_p3 = scmp.lt.s32.totalorder %s202_s30, %s202_s30 }
  0x55   :  { %p3024_p2 = scmp.ne.s32.totalorder %s202_s30, %s3023_s10  ;;  %p3029_p4 = scmp.lt.s32.totalorder %s3023_s10, %s3023_s10 }
  0x57   :  { %p3030_p5 = por %p3029_p4, %p3028_p3 }
  0x59   :  { %p3031_p6 = pnand %p3030_p5, %p3024_p2 }
  0x5b   :  { %3034 = shalt.err (!%p3031_p6)
}
  0x5c   :  { %207 = dma.hbm_to_vmem [thread:$0]  %s3981_s15, 64, %s202_s30, [#allocation24], %s3282_s3, %s3282_s3, %s3283_s28  }
  0x5d   :  { %s3286_s29 = smov [#allocation26]   ;;  %s3287_s5 = smov [#allocation2]  }
  0x5e   :  { %s225_s1 = sshll.u32 %s3286_s29, 4  ;;  %s45_s12 = sshll.u32 %s3287_s5, 4  ;;  %s226_s1 = int_to_ptr.vmem [resolvable:$true] %s225_s1  ;;  %s46_s12 = int_to_ptr.vmem [resolvable:$true] %s45_s12 }
  0x5f   :  { %s3043_s8 = scalar_lea.vmem %s226_s1, 256  ;;  %p3048_p8 = scmp.lt.s32.totalorder %s226_s1, %s226_s1 }
  0x60   :  { %p3044_p7 = scmp.ne.s32.totalorder %s226_s1, %s3043_s8  ;;  %p3049_p9 = scmp.lt.s32.totalorder %s3043_s8, %s3043_s8 }
  0x62   :  { %p3050_p10 = por %p3049_p9, %p3048_p8 }
  0x64   :  { %p3051_p11 = pnand %p3050_p10, %p3044_p7 }
  0x66   :  { %3054 = shalt.err (!%p3051_p11)
}
  0x67   :  { %s3288_s4 = smov 64   ;;  %s3289_s24 = smov 4  }
  0x68   :  { %231 = dma.hbm_to_vmem [thread:$0]  %s3983_s17, 256, %s226_s1, [#allocation27], %s3288_s4, %s3288_s4, %s3289_s24  }
  0x69   :  { %s3063_s15 = scalar_lea.vmem %s46_s12, 256  ;;  %p3068_p13 = scmp.lt.s32.totalorder %s46_s12, %s46_s12 }
  0x6a   :  { %p3064_p12 = scmp.ne.s32.totalorder %s46_s12, %s3063_s15  ;;  %p3069_p0 = scmp.lt.s32.totalorder %s3063_s15, %s3063_s15 }
  0x6c   :  { %p3070_p1 = por %p3069_p0, %p3068_p13 }
  0x6e   :  { %p3071_p2 = pnand %p3070_p1, %p3064_p12 }
  0x70   :  { %3074 = shalt.err (!%p3071_p2)
}
  0x71   :  { %s4000_s10 = sld [smem:[#allocation41_spill]]  ;;  %s3290_s2 = smov [#allocation7]  }
  0x72   :  { %s69_s27 = sshll.u32 %s3290_s2, 4  ;;  %s3291_s29 = smov [#allocation10]   ;;  %s70_s27 = int_to_ptr.vmem [resolvable:$true] %s69_s27 }
  0x73   :  { %s93_s17 = sshll.u32 %s3291_s29, 4  ;;  %s3083_s1 = scalar_lea.vmem %s70_s27, 256  ;;  %s94_s17 = int_to_ptr.vmem [resolvable:$true] %s93_s17 }
  0x74   :  { %p3084_p3 = scmp.ne.s32.totalorder %s70_s27, %s3083_s1  ;;  %p3088_p4 = scmp.lt.s32.totalorder %s70_s27, %s70_s27 }
  0x75   :  { %p3089_p5 = scmp.lt.s32.totalorder %s3083_s1, %s3083_s1 }
  0x77   :  { %51 = dma.hbm_to_vmem [thread:$0]  %s4000_s10, 256, %s46_s12, [#allocation3], %s3277_s0, %s3277_s0, %s3278_s23  }
  0x78   :  { %p3090_p6 = por %p3089_p5, %p3088_p4 }
  0x7a   :  { %p3091_p7 = pnand %p3090_p6, %p3084_p3 }
  0x7c   :  { %3094 = shalt.err (!%p3091_p7)
}
  0x7d   :  { %s4001_s6 = sld [smem:[#allocation43_spill]]  ;;  %s3103_s12 = scalar_lea.vmem %s94_s17, 256 }
  0x7e   :  { %p3104_p8 = scmp.ne.s32.totalorder %s94_s17, %s3103_s12  ;;  %p3108_p9 = scmp.lt.s32.totalorder %s94_s17, %s94_s17 }
  0x7f   :  { %p3109_p10 = scmp.lt.s32.totalorder %s3103_s12, %s3103_s12 }
  0x81   :  { %p3110_p11 = por %p3109_p10, %p3108_p9 }
  0x83   :  { %75 = dma.hbm_to_vmem [thread:$0]  %s4001_s6, 256, %s70_s27, [#allocation6], %s3277_s0, %s3277_s0, %s3278_s23  }
  0x84   :  { %p3111_p12 = pnand %p3110_p11, %p3104_p8 }
  0x86   :  { %3114 = shalt.err (!%p3111_p12)
}
  0x87   :  { %s4002_s30 = sld [smem:[#allocation45_spill]]  ;;  %s3292_s26 = smov [#allocation13]  }
  0x88   :  { %s117_s10 = sshll.u32 %s3292_s26, 4  ;;  %s3293_s2 = smov [#allocation16]   ;;  %s118_s10 = int_to_ptr.vmem [resolvable:$true] %s117_s10 }
  0x89   :  { %s139_s27 = sshll.u32 %s3293_s2, 4  ;;  %s3123_s29 = scalar_lea.vmem %s118_s10, 256  ;;  %s140_s27 = int_to_ptr.vmem [resolvable:$true] %s139_s27 }
  0x8a   :  { %p3124_p13 = scmp.ne.s32.totalorder %s118_s10, %s3123_s29  ;;  %p3128_p0 = scmp.lt.s32.totalorder %s118_s10, %s118_s10 }
  0x8b   :  { %p3129_p1 = scmp.lt.s32.totalorder %s3123_s29, %s3123_s29 }
  0x8d   :  { %99 = dma.hbm_to_vmem [thread:$0]  %s4002_s30, 256, %s94_s17, [#allocation9], %s3277_s0, %s3277_s0, %s3278_s23  }
  0x8e   :  { %p3130_p2 = por %p3129_p1, %p3128_p0 }
  0x90   :  { %p3131_p3 = pnand %p3130_p2, %p3124_p13 }
  0x92   :  { %3134 = shalt.err (!%p3131_p3)
}
  0x93   :  { %123 = dma.hbm_to_vmem [thread:$0]  %s3973_s7, 256, %s118_s10, [#allocation12], %s3288_s4, %s3288_s4, %s3289_s24  }
  0x94   :  { %s3143_s17 = scalar_lea.vmem %s140_s27, 512  ;;  %p3148_p5 = scmp.lt.s32.totalorder %s140_s27, %s140_s27 }
  0x95   :  { %p3144_p4 = scmp.ne.s32.totalorder %s140_s27, %s3143_s17  ;;  %p3149_p6 = scmp.lt.s32.totalorder %s3143_s17, %s3143_s17 }
  0x97   :  { %p3150_p7 = por %p3149_p6, %p3148_p5 }
  0x99   :  { %p3151_p8 = pnand %p3150_p7, %p3144_p4 }
  0x9b   :  { %3154 = shalt.err (!%p3151_p8)
}
  0x9c   :  { %145 = dma.hbm_to_vmem [thread:$0]  %s3975_s9, 512, %s140_s27, [#allocation15], %s3288_s4, %s3288_s4, %s3289_s24  }
  0x9d   :  { %s3294_s12 = smov [#allocation19]   ;;  %s3295_s15 = smov [#allocation22]  }
  0x9e   :  { %s163_s25 = sshll.u32 %s3294_s12, 4  ;;  %s189_s7 = sshll.u32 %s3295_s15, 4  ;;  %s164_s25 = int_to_ptr.vmem [resolvable:$true] %s163_s25  ;;  %s190_s7 = int_to_ptr.vmem [resolvable:$true] %s189_s7 }
  0x9f   :  { %s3163_s30 = scalar_lea.vmem %s164_s25, 512  ;;  %p3168_p10 = scmp.lt.s32.totalorder %s164_s25, %s164_s25 }
  0xa0   :  { %p3164_p9 = scmp.ne.s32.totalorder %s164_s25, %s3163_s30  ;;  %p3169_p11 = scmp.lt.s32.totalorder %s3163_s30, %s3163_s30 }
  0xa2   :  { %p3170_p12 = por %p3169_p11, %p3168_p10 }
  0xa4   :  { %p3171_p13 = pnand %p3170_p12, %p3164_p9 }
  0xa6   :  { %3174 = shalt.err (!%p3171_p13)
}
  0xa7   :  { %169 = dma.hbm_to_vmem [thread:$0]  %s3977_s11, 512, %s164_s25, [#allocation18], %s3288_s4, %s3288_s4, %s3289_s24  }
  0xa8   :  { %s3183_s9 = scalar_lea.vmem %s190_s7, 48  ;;  %s3187_s2 = scalar_lea.vmem %s190_s7, 64 }
  0xa9   :  { %p3184_p0 = scmp.ne.s32.totalorder %s190_s7, %s3183_s9  ;;  %p3188_p1 = scmp.lt.s32.totalorder %s190_s7, %s190_s7 }
  0xaa   :  { %p3189_p2 = scmp.lt.s32.totalorder %s3187_s2, %s3183_s9 }
  0xac   :  { %p3190_p3 = por %p3189_p2, %p3188_p1 }
  0xae   :  { %p3191_p4 = pnand %p3190_p3, %p3184_p0 }
  0xb0   :  { %3194 = shalt.err (!%p3191_p4)
}
  0xb1   :  { %195 = dma.hbm_to_vmem [thread:$0]  %s3980_s14, 48, %s190_s7, [#allocation21], %s3282_s3, %s3282_s3, %s3283_s28  }
  0xb2   :  { %s3296_s1 = smov [#allocation25]   ;;  %s3297_s11 = smov [#allocation28]  }
  0xb3   :  { %s213_s5 = sshll.u32 %s3296_s1, 4  ;;  %s238_s24 = sshll.u32 %s3297_s11, 4  ;;  %s214_s5 = int_to_ptr.vmem [resolvable:$true] %s213_s5  ;;  %s239_s24 = int_to_ptr.vmem [resolvable:$true] %s238_s24 }
  0xb4   :  { %s3203_s17 = scalar_lea.vmem %s214_s5, 64  ;;  %p3208_p6 = scmp.lt.s32.totalorder %s214_s5, %s214_s5 }
  0xb5   :  { %p3204_p5 = scmp.ne.s32.totalorder %s214_s5, %s3203_s17  ;;  %p3209_p7 = scmp.lt.s32.totalorder %s3203_s17, %s3203_s17 }
  0xb7   :  { %p3210_p8 = por %p3209_p7, %p3208_p6 }
  0xb9   :  { %p3211_p9 = pnand %p3210_p8, %p3204_p5 }
  0xbb   :  { %3214 = shalt.err (!%p3211_p9)
}
  0xbc   :  { %219 = dma.hbm_to_vmem [thread:$0]  %s3982_s16, 64, %s214_s5, [#allocation24], %s3282_s3, %s3282_s3, %s3283_s28  }
  0xbd   :  { %s3223_s14 = scalar_lea.vmem %s239_s24, 16  ;;  %s3227_s12 = scalar_lea.vmem %s239_s24, 32 }
  0xbe   :  { %p3224_p10 = scmp.ne.s32.totalorder %s239_s24, %s3223_s14  ;;  %p3228_p11 = scmp.lt.s32.totalorder %s239_s24, %s239_s24 }
  0xbf   :  { %p3229_p12 = scmp.lt.s32.totalorder %s3227_s12, %s3223_s14 }
  0xc1   :  { %p3230_p13 = por %p3229_p12, %p3228_p11 }
  0xc3   :  { %p3231_p0 = pnand %p3230_p13, %p3224_p10 }
  0xc5   :  { %3234 = shalt.err (!%p3231_p0)
}
  0xc6   :  { %241 = dma.hbm_to_vmem [thread:$0]  %s3984_s18, 16, %s239_s24, [#allocation27]  }
  0xc7   :  { %3255 = dma.done.wait [#allocation3], 256  }
  0xc8   :  { %3256 = vsyncadd [#allocation3], 4294967040 }
  0xc9   :  { %3257 = dma.done.wait [#allocation6], 768  }
  0xca   :  { %3258 = vsyncadd [#allocation6], 4294966528 }
  0xcb   :  { %3259 = dma.done.wait [#allocation9], 512  }
  0xcc   :  { %3260 = vsyncadd [#allocation9], 4294966784 }
  0xcd   :  { %3261 = dma.done.wait [#allocation12], 768  }
  0xce   :  { %3262 = vsyncadd [#allocation12], 4294966528 }
  0xcf   :  { %3263 = dma.done.wait [#allocation15], 528  }
  0xd0   :  { %3264 = vsyncadd [#allocation15], 4294966768 }
  0xd1   :  { %3265 = dma.done.wait [#allocation18], 544  }
  0xd2   :  { %3266 = vsyncadd [#allocation18], 4294966752 }
  0xd3   :  { %3267 = dma.done.wait [#allocation21], 80  }
  0xd4   :  { %3268 = vsyncadd [#allocation21], 4294967216 }
  0xd5   :  { %3269 = dma.done.wait [#allocation24], 128  }
  0xd6   :  { %3270 = vsyncadd [#allocation24], 4294967168 }
  0xd7   :  { %3271 = dma.done.wait [#allocation27], 272  }
  0xd8   :  { %3272 = vsyncadd [#allocation27], 4294967024  ;;  %v3298_v0 = vmov 0.0   ;;  %vm3299_vm0 = vmmov 0   ;;  %v2753_v1 = vld [vmem:[#allocation19 + $0x8] sm:$0xff]   ;;  %v2754_v2 = vld [vmem:[#allocation19] sm:$0xff]  }
  0xd9   :  { %2560 = vmatprep.subr.bf16.mxu0 %v3298_v0  ;;  %2564 = vmatprep.mubr.msk.bf16.mxu0 %vm3299_vm0, %v3298_v0  ;;  %v304_v3 = vld [vmem:[#allocation2] sm:$0xff]  ;;  %v305_v4 = vld [vmem:[#allocation2 + $0x8] sm:$0xff]  ;;  %vm330_vm1 = vcmask 261120   ;;  %s4003_s3 = sld [smem:[#allocation40_spill]]  ;;  %v375_v13 = vld [vmem:[#allocation5] sm:$0xff]  ;;  %s3300_s2 = smov 96  }
  0xda   :  { %2561 = vmatpush3.bf16.msra.mxu0 %v2753_v1  ;;  %v311_v5 = vpack.c.bf16 %v305_v4, %v304_v3  ;;  %v2755_v6 = vld [vmem:[#allocation13 + $0x8] sm:$0xff]   ;;  %v2756_v7 = vld [vmem:[#allocation13] sm:$0xff]   ;;  %v376_v14 = vld [vmem:[#allocation5 + $0x8] sm:$0xff]  ;;  %vm598_vm2 = vcmask 64512   ;;  %vm653_vm3 = vcmask 1043456   ;;  %vm1694_vm4 = vcmask 130048  }
  0xdb   :  { %2562 = vmatprep.subr.bf16.mxu0 %v3298_v0  ;;  %v2757_v11 = vld [vmem:[#allocation19 + $0x18] sm:$0xff]   ;;  %v2758_v12 = vld [vmem:[#allocation19 + $0x10] sm:$0xff]   ;;  %v386_v15 = vpack.c.bf16 %v376_v14, %v375_v13  ;;  %v2408_v19 = vld [vmem:[#allocation20] ss:$0 sm:$0xff]  ;;  %vm2230_vm5 = vcmask 523264   ;;  %s3301_s27 = smov [#allocation29]  }
  0xdc   :  { %2568 = vmatprep.subr.bf16.mxu1 %v2757_v11  ;;  %v377_v16 = vld [vmem:[#allocation5 + $0x10] sm:$0xff]  ;;  %v378_v17 = vld [vmem:[#allocation5 + $0x18] sm:$0xff]  ;;  %v2417_v26 = vld [vmem:[#allocation14] ss:$0 sm:$0xff]  ;;  %s2384_s29 = sshll.u32 %s3301_s27, 4  ;;  %s2385_s29 = int_to_ptr.vmem [resolvable:$true] %s2384_s29 }
  0xdd   :  { %2569 = vmatpush3.bf16.msra.mxu1 %v2757_v11  ;;  %v387_v18 = vpack.c.bf16 %v378_v17, %v377_v16  ;;  %2572 = vmatprep.mubr.msk.bf16.mxu1 %vm330_vm1, %v386_v15  ;;  %v3551_v28 = vld [vmem:[#allocation11] sm:$0xff]  ;;  %v3553_v29 = vld [vmem:[#allocation11 + $0x8] sm:$0xff]  ;;  %v2412_v40 = vld [vmem:[#allocation20 + $0x1] ss:$0 sm:$0xff]  ;;  %s3235_s1 = scalar_lea.vmem %s2385_s29, 256  ;;  %p3240_p2 = scmp.lt.s32.totalorder %s2385_s29, %s2385_s29 }
  0xde   :  { %2563 = vmatpush3.bf16.msra.mxu0 %v2754_v2  ;;  %2570 = vmatprep.subr.bf16.mxu1 %v2758_v12  ;;  %v3604_v50 = vld [vmem:[#allocation11 + $0x10] sm:$0xff]  ;;  %v3606_v51 = vld [vmem:[#allocation11 + $0x18] sm:$0xff]  ;;  %v2759_v63 = vld [vmem:[%s3979_s13 + $0x8] sm:$0xff]   ;;  %p3236_p1 = scmp.ne.s32.totalorder %s2385_s29, %s3235_s1  ;;  %p3241_p3 = scmp.lt.s32.totalorder %s3235_s1, %s3235_s1 }
  0xdf   :  { %2576 = vmatprep.subr.bf16.mxu0 %v3298_v0  ;;  %v3521_v8 = vld [vmem:[%s4003_s3] sm:$0xff]  ;;  %v3526_v9 = vld [vmem:[%s4003_s3 + $0x8] sm:$0xff]  ;;  %v536_v4 = vld [vmem:[#allocation7] sm:$0xff] }
  0xe0   :  { %v466_v10 = vpack.c.bf16 %v3526_v9, %v3521_v8  ;;  %v2760_v2 = vld [vmem:[%s3979_s13] sm:$0xff]   ;;  %p3242_p4 = por %p3241_p3, %p3240_p2 }
  0xe1   :  { %2565 = vmatmul.mubr.msk.bf16.vlgmr.msra.gmra.mxu0 %vm330_vm1, %v311_v5  ;;  %2571 = vmatpush3.bf16.msra.mxu1 %v2758_v12 }
  0xe2   :  { %2577 = vmatpush3.bf16.msra.mxu0 %v2755_v6  ;;  %2580 = vmatprep.mubr.msk.bf16.mxu0 %vm3299_vm0, %v3298_v0  ;;  %p3243_p5 = pnand %p3242_p4, %p3236_p1 }
  0xe3   :  { %2578 = vmatprep.subr.bf16.mxu0 %v3298_v0 }
  0xe4   :  { %2573 = vmatmul.mubr.msk.bf16.vlgmr.msra.gmra.mxu1 %vm330_vm1, %v387_v18 }
  0xe6   :  { %2579 = vmatpush3.bf16.msra.mxu0 %v2756_v7 }
  0xe9   :  { %2581 = vmatmul.mubr.msk.bf16.vlgmr.msra.gmra.mxu0 %vm330_vm1, %v466_v10 }
 0x1a1   :  { %v368_v20 = vpop.f32.mrf.mxu0 }
 0x1a2   :  { %v3537_v21 = vadd.f32 %v2408_v19, %v368_v20 }
 0x1a3   :  { %v2566_v22 = vpop.f32.mrf.mxu0 }
 0x1a4   :  { %2334 = vst.msk [vmem:[%s3988_s22 + $0x10] sm:$0xff] %vm330_vm1, %v3537_v21  ;;  %v2574_v41 = vpop.f32.mrf.mxu1  ;;  %v3639_v3 = vpack.c.bf16 %v3537_v21, %v3537_v21 }
 0x1a5   :  { %v371_v23 = vpop.f32.mrf.mxu0  ;;  %v3576_v42 = vadd.f32 %v2574_v41, %v2412_v40 }
 0x1a6   :  { %v3544_v24 = vadd.f32 %v2408_v19, %v371_v23  ;;  %v446_v43 = vpop.f32.mrf.mxu1  ;;  %v721_v19 = vld [vmem:[#allocation7 + $0x8] sm:$0xff] }
 0x1a7   :  { %v2567_v25 = vpop.f32.mrf.mxu0  ;;  %2367 = vst.msk [vmem:[%s3988_s22 + $0x60] sm:$0xff] %vm330_vm1, %v3576_v42  ;;  %v3583_v44 = vadd.f32 %v2412_v40, %v446_v43 }
 0x1a8   :  { %2361 = vst.msk [vmem:[%s3988_s22 + $0x50] sm:$0xff] %vm330_vm1, %v3544_v24  ;;  %v2575_v45 = vpop.f32.mrf.mxu1 }
 0x1a9   :  { %v522_v27 = vpop.f32.mrf.mxu0  ;;  %2340 = vst.msk [vmem:[%s3988_s22 + $0x20] sm:$0xff] %vm330_vm1, %v3583_v44  ;;  %v3590_v46 = vadd.f32 %v2575_v45, %v2412_v40 }
 0x1aa   :  { %v3555_v30 = vadd.f32 %v2417_v26, %v522_v27  ;;  %v449_v47 = vpop.f32.mrf.mxu1 }
 0x1ab   :  { %v2582_v31 = vpop.f32.mrf.mxu0  ;;  %2368 = vst.msk [vmem:[%s3988_s22 + $0x68] sm:$0xff] %vm330_vm1, %v3590_v46  ;;  %v3597_v48 = vadd.f32 %v2412_v40, %v449_v47 }
 0x1ac   :  { %v3559_v32 = vpack.c.bf16 %v3555_v30, %v3555_v30  ;;  %v530_v33 = vmul.f32 %v3555_v30, %v3551_v28  ;;  %v531_v34 = vmul.f32 %v3555_v30, %v3553_v29  ;;  %v532_v53 = vmul.f32 %v3555_v30, %v3604_v50 }
 0x1ad   :  { %v525_v35 = vpop.f32.mrf.mxu0  ;;  %2341 = vst.msk [vmem:[%s3988_s22 + $0x28] sm:$0xff] %vm330_vm1, %v3597_v48  ;;  %v533_v54 = vmul.f32 %v3555_v30, %v3606_v51 }
 0x1ae   :  { %v3565_v36 = vadd.f32 %v2417_v26, %v525_v35  ;;  %538 = vrot.lane.b32.xlu0 %v3559_v32, %s3300_s2  ;;  %v534_v37 = vpack.c.bf16 %v531_v34, %v530_v33 }
 0x1af   :  { %v2583_v38 = vpop.f32.mrf.mxu0  ;;  %v535_v58 = vpack.c.bf16 %v533_v54, %v532_v53 }
 0x1b0   :  { %2586 = vmatprep.mubr.msk.bf16.mxu1 %vm330_vm1, %v534_v37  ;;  %v3572_v39 = vpack.c.bf16 %v3565_v36, %v3565_v36  ;;  %v714_v56 = vmul.f32 %v3565_v36, %v3551_v28  ;;  %v715_v57 = vmul.f32 %v3565_v36, %v3553_v29  ;;  %v716_v61 = vmul.f32 %v3565_v36, %v3604_v50 }
 0x1b1   :  { %v717_v62 = vmul.f32 %v3565_v36, %v3606_v51 }
 0x1b2   :  { %723 = vrot.lane.b32.xlu0 %v3572_v39, %s3300_s2  ;;  %v718_v59 = vpack.c.bf16 %v715_v57, %v714_v56 }
 0x1b3   :  { %v719_v1 = vpack.c.bf16 %v717_v62, %v716_v61 }
 0x220   :  { %v539_v49 = vpop.permute.xlu0 %538 }
 0x221   :  { %v547_v52 = vsel %vm330_vm1, %v539_v49, 0  ;;  %2716 = vmatprep.subr.msk.bf16.mxu1 %vm330_vm1, %v539_v49 }
 0x222   :  { %2585 = vmatpush3.bf16.xpose.msra.mxu1 %v547_v52 }
 0x224   :  { %v724_v55 = vpop.permute.xlu0 %723 }
 0x225   :  { %2718 = vmatprep.subr.msk.bf16.mxu1 %vm330_vm1, %v724_v55  ;;  %v732_v60 = vsel %vm330_vm1, %v724_v55, 0 }
 0x229   :  { %2587 = vmatmul.mubr.msk.bf16.vlgmr.msra.gmra.mxu1 %vm330_vm1, %v535_v58 }
 0x22a   :  { %2597 = vmatpush3.bf16.xpose.msra.mxu1 %v732_v60  ;;  %2598 = vmatprep.mubr.msk.bf16.mxu1 %vm330_vm1, %v718_v59 }
 0x22b   :  { %2608 = vmatprep.subr.bf16.mxu1 %v3298_v0 }
 0x231   :  { %2599 = vmatmul.mubr.msk.bf16.vlgmr.msra.gmra.mxu1 %vm330_vm1, %v719_v1 }
 0x232   :  { %2609 = vmatpush3.bf16.msra.mxu1 %v2759_v63  ;;  %2612 = vmatprep.mubr.msk.bf16.mxu1 %vm3299_vm0, %v3298_v0 }
 0x233   :  { %2610 = vmatprep.subr.bf16.mxu1 %v3298_v0 }
 0x236   :  { %2611 = vmatpush3.bf16.msra.mxu1 %v2760_v2 }
 0x237   :  { %2720 = vmatprep.subr.msk.bf16.mxu1 %vm330_vm1, %v3639_v3 }
 0x2e9   :  { %v2588_v5 = vpop.f32.mrf.mxu1 }
 0x2ea   :  { %v592_v6 = vadd.f32 %v2588_v5, %v536_v4 }
 0x2eb   :  { %v583_v7 = vpop.f32.mrf.mxu1 }
 0x2ec   :  { %v584_v10 = vadd.f32 %v583_v7, %v536_v4  ;;  %v605_v11 = vsel %vm598_vm2, %v592_v6, -inf }
 0x2ed   :  { %606 = vmax.xlane.f32.xlu0 %v605_v11  ;;  %v2589_v12 = vpop.f32.mrf.mxu1 }
 0x2ee   :  { %v595_v13 = vadd.f32 %v2589_v12, %v536_v4  ;;  %v599_v14 = vsel %vm598_vm2, %v584_v10, -inf }
 0x2ef   :  { %v586_v15 = vpop.f32.mrf.mxu1  ;;  %600 = vmax.xlane.f32.xlu1 %v599_v14 }
 0x2f0   :  { %v587_v17 = vadd.f32 %v586_v15, %v536_v4  ;;  %v608_v18 = vsel %vm598_vm2, %v595_v13, -inf }
 0x2f1   :  { %v2600_v16 = vpop.f32.mrf.mxu1 }
 0x2f2   :  { %v777_v22 = vadd.f32 %v2600_v16, %v721_v19  ;;  %v602_v23 = vsel %vm598_vm2, %v587_v17, -inf }
 0x2f3   :  { %v768_v20 = vpop.f32.mrf.mxu1  ;;  %609 = vmax.xlane.f32.xlu1 %v608_v18 }
 0x2f4   :  { %v769_v26 = vadd.f32 %v768_v20, %v721_v19  ;;  %v789_v27 = vsel %vm598_vm2, %v777_v22, -inf }
 0x2f5   :  { %v2601_v25 = vpop.f32.mrf.mxu1 }
 0x2f6   :  { %v783_v34 = vsel %vm598_vm2, %v769_v26, -inf  ;;  %v780_v35 = vadd.f32 %v2601_v25, %v721_v19 }
 0x2f7   :  { %603 = vmax.xlane.f32.xlu1 %v602_v23  ;;  %v771_v31 = vpop.f32.mrf.mxu1 }
 0x2f8   :  { %v772_v33 = vadd.f32 %v771_v31, %v721_v19  ;;  %v792_v38 = vsel %vm598_vm2, %v780_v35, -inf }
 0x2fa   :  { %v786_v37 = vsel %vm598_vm2, %v772_v33, -inf }
 0x2fb   :  { %790 = vmax.xlane.f32.xlu1 %v789_v27 }
 0x2ff   :  { %784 = vmax.xlane.f32.xlu1 %v783_v34 }
 0x303   :  { %787 = vmax.xlane.f32.xlu1 %v786_v37 }
 0x307   :  { %793 = vmax.xlane.f32.xlu1 %v792_v38 }
 0x376   :  { %v607_v40 = vpop.xlane.xlu0 %606 }
 0x377   :  { %v613_v41 = vsub.f32 %v592_v6, %v607_v40 }
 0x378   :  { %v601_v43 = vpop.xlane.xlu1 %600 }
 0x379   :  { %v619_v45 = vmul.f32 1.442695, %v613_v41  ;;  %v611_v47 = vsub.f32 %v584_v10, %v601_v43 }
 0x37b   :  { %2775 = vpow2.f32 %v619_v45  ;;  %v615_v49 = vmul.f32 1.442695, %v611_v47 }
 0x37c   :  { %v610_v52 = vpop.xlane.xlu1 %609 }
 0x37d   :  { %2777 = vpow2.f32 %v615_v49  ;;  %v614_v53 = vsub.f32 %v595_v13, %v610_v52 }
 0x37f   :  { %v621_v54 = vmul.f32 1.442695, %v614_v53 }
 0x380   :  { %v604_v55 = vpop.xlane.xlu1 %603 }
 0x381   :  { %2779 = vpow2.f32 %v621_v54  ;;  %v612_v56 = vsub.f32 %v587_v17, %v604_v55 }
 0x383   :  { %v617_v57 = vmul.f32 1.442695, %v612_v56 }
 0x384   :  { %v791_v58 = vpop.xlane.xlu1 %790 }
 0x385   :  { %2781 = vpow2.f32 %v617_v57  ;;  %v797_v59 = vsub.f32 %v777_v22, %v791_v58 }
 0x387   :  { %v803_v60 = vmul.f32 1.442695, %v797_v59 }
 0x388   :  { %v2776_v61 = vpop.eup %2775  ;;  %v785_v62 = vpop.xlane.xlu1 %784 }
 0x389   :  { %2783 = vpow2.f32 %v803_v60  ;;  %v795_v63 = vsub.f32 %v769_v26, %v785_v62  ;;  %v629_v1 = vsel %vm598_vm2, %v2776_v61, 0.0 }
 0x38a   :  { %v2778_v2 = vpop.eup %2777  ;;  %630 = vadd.xlane.f32.xlu1 %v629_v1 }
 0x38b   :  { %v799_v4 = vmul.f32 1.442695, %v795_v63  ;;  %v623_v6 = vsel %vm598_vm2, %v2778_v2, 0.0 }
 0x38c   :  { %v788_v5 = vpop.xlane.xlu1 %787 }
 0x38d   :  { %2785 = vpow2.f32 %v799_v4  ;;  %v796_v10 = vsub.f32 %v772_v33, %v788_v5 }
 0x38e   :  { %v2780_v7 = vpop.eup %2779  ;;  %624 = vadd.xlane.f32.xlu1 %v623_v6 }
 0x38f   :  { %v632_v11 = vsel %vm598_vm2, %v2780_v7, 0.0  ;;  %v801_v15 = vmul.f32 1.442695, %v796_v10 }
 0x390   :  { %633 = vadd.xlane.f32.xlu0 %v632_v11  ;;  %v794_v12 = vpop.xlane.xlu1 %793 }
 0x391   :  { %v798_v13 = vsub.f32 %v780_v35, %v794_v12 }
 0x392   :  { %v2782_v14 = vpop.eup %2781 }
 0x393   :  { %v805_v16 = vmul.f32 1.442695, %v798_v13  ;;  %v626_v17 = vsel %vm598_vm2, %v2782_v14, 0.0 }
 0x394   :  { %627 = vadd.xlane.f32.xlu1 %v626_v17 }
 0x395   :  { %2787 = vpow2.f32 %v805_v16 }
 0x396   :  { %v2784_v18 = vpop.eup %2783  ;;  %2789 = vpow2.f32 %v801_v15 }
 0x397   :  { %v813_v19 = vsel %vm598_vm2, %v2784_v18, 0.0 }
 0x398   :  { %814 = vadd.xlane.f32.xlu1 %v813_v19 }
 0x39a   :  { %v2786_v20 = vpop.eup %2785 }
 0x39b   :  { %v807_v22 = vsel %vm598_vm2, %v2786_v20, 0.0 }
 0x39c   :  { %808 = vadd.xlane.f32.xlu1 %v807_v22 }
 0x3a2   :  { %v2788_v23 = vpop.eup %2787 }
 0x3a3   :  { %v816_v25 = vsel %vm598_vm2, %v2788_v23, 0.0  ;;  %v2790_v26 = vpop.eup %2789 }
 0x3a4   :  { %817 = vadd.xlane.f32.xlu0 %v816_v25  ;;  %v810_v27 = vsel %vm598_vm2, %v2790_v26, 0.0 }
 0x3a8   :  { %811 = vadd.xlane.f32.xlu0 %v810_v27 }
 0x3ad   :  { %645 = vrot.lane.b32.xlu1 %v3559_v32, %s3288_s4 }
 0x3be   :  { %829 = vrot.lane.b32.xlu0 %v3572_v39, %s3288_s4 }
 0x413   :  { %v631_v31 = vpop.xlane.xlu1 %630 }
 0x417   :  { %v625_v33 = vpop.xlane.xlu1 %624 }
 0x419   :  { %v634_v34 = vpop.xlane.xlu0 %633 }
 0x41a   :  { %2791 = vrcp.f32 %v634_v34 }
 0x41b   :  { %2793 = vrcp.f32 %v625_v33 }
 0x41c   :  { %2795 = vrcp.f32 %v631_v31 }
 0x41d   :  { %v628_v35 = vpop.xlane.xlu1 %627 }
 0x41e   :  { %2797 = vrcp.f32 %v628_v35 }
 0x421   :  { %v815_v37 = vpop.xlane.xlu1 %814 }
 0x425   :  { %v809_v38 = vpop.xlane.xlu1 %808 }
 0x427   :  { %v2792_v40 = vpop.eup %2791 }
 0x428   :  { %v2794_v41 = vpop.eup %2793  ;;  %v642_v47 = vmul.f32 %v2792_v40, %v2780_v7 }
 0x429   :  { %v646_v43 = vpop.permute.xlu1 %645  ;;  %v2796_v45 = vpop.eup %2795  ;;  %v639_v49 = vmul.f32 %v2794_v41, %v2778_v2  ;;  %v3684_v41 = vpack.c.bf16 %v3544_v24, %v3544_v24 }
 0x42a   :  { %v655_v32 = vsel %vm653_vm3, %v646_v43, 0  ;;  %2717 = vmatprep.subr.msk.bf16.mxu0 %vm653_vm3, %v646_v43  ;;  %v641_v54 = vmul.f32 %v2796_v45, %v2776_v61  ;;  %v1094_v43 = vsel %vm330_vm1, %v3639_v3, 0  ;;  %v2429_v45 = vld [vmem:[#allocation22] ss:$0 sm:$0xff] }
 0x42b   :  { %v2798_v39 = vpop.eup %2797  ;;  %2591 = vmatpush3.bf16.msra.mxu0 %v655_v32 }
 0x42c   :  { %v640_v52 = vmul.f32 %v2798_v39, %v2782_v14  ;;  %v644_v56 = vpack.c.bf16 %v642_v47, %v641_v54 }
 0x42d   :  { %v818_v53 = vpop.xlane.xlu0 %817 }
 0x42e   :  { %v643_v55 = vpack.c.bf16 %v640_v52, %v639_v49  ;;  %2799 = vrcp.f32 %v818_v53 }
 0x42f   :  { %2801 = vrcp.f32 %v809_v38 }
 0x430   :  { %2592 = vmatprep.mubr.msk.bf16.mxu0 %vm598_vm2, %v643_v55  ;;  %2803 = vrcp.f32 %v815_v37 }
 0x431   :  { %v812_v57 = vpop.xlane.xlu0 %811  ;;  %2593 = vmatmul.mubr.msk.bf16.vlgmr.msra.gmra.mxu0 %vm598_vm2, %v644_v56 }
 0x432   :  { %2805 = vrcp.f32 %v812_v57 }
 0x435   :  { %v830_v58 = vpop.permute.xlu0 %829 }
 0x436   :  { %v838_v59 = vsel %vm653_vm3, %v830_v58, 0  ;;  %2719 = vmatprep.subr.msk.bf16.mxu0 %vm653_vm3, %v830_v58 }
 0x437   :  { %2603 = vmatpush3.bf16.msra.mxu0 %v838_v59 }
 0x438   :  { %2616 = vmatprep.subr.bf16.mxu0 %v3298_v0 }
 0x43b   :  { %v2800_v60 = vpop.eup %2799 }
 0x43c   :  { %v2802_v61 = vpop.eup %2801  ;;  %v826_v1 = vmul.f32 %v2800_v60, %v2788_v23 }
 0x43d   :  { %v2804_v62 = vpop.eup %2803  ;;  %v823_v2 = vmul.f32 %v2802_v61, %v2786_v20 }
 0x43e   :  { %v825_v5 = vmul.f32 %v2804_v62, %v2784_v18 }
 0x43f   :  { %v2806_v63 = vpop.eup %2805 }
 0x440   :  { %v824_v4 = vmul.f32 %v2806_v63, %v2790_v26  ;;  %v828_v7 = vpack.c.bf16 %v826_v1, %v825_v5  ;;  %v2761_v5 = vld [vmem:[#allocation16 + $0x8] sm:$0xff]  }
 0x442   :  { %v827_v6 = vpack.c.bf16 %v824_v4, %v823_v2 }
 0x444   :  { %2604 = vmatprep.mubr.msk.bf16.mxu0 %vm598_vm2, %v827_v6 }
 0x445   :  { %2605 = vmatmul.mubr.msk.bf16.vlgmr.msra.gmra.mxu0 %vm598_vm2, %v828_v7 }
 0x446   :  { %2620 = vmatprep.mubr.msk.bf16.mxu0 %vm3299_vm0, %v3298_v0  ;;  %2617 = vmatpush3.bf16.msra.mxu0 %v2761_v5 }
 0x447   :  { %2618 = vmatprep.subr.bf16.mxu0 %v3298_v0 }
 0x4f1   :  { %v2594_v10 = vpop.f32.mrf.mxu0 }
 0x4f2   :  { %v708_v22 = vmul.f32 %v2594_v10, %v3604_v50 }
 0x4f3   :  { %v691_v11 = vpop.f32.mrf.mxu0 }
 0x4f4   :  { %v706_v17 = vmul.f32 %v691_v11, %v3551_v28 }
 0x4f5   :  { %v2595_v12 = vpop.f32.mrf.mxu0 }
 0x4f6   :  { %v709_v33 = vmul.f32 %v2595_v12, %v3606_v51 }
 0x4f7   :  { %v694_v13 = vpop.f32.mrf.mxu0 }
 0x4f8   :  { %v707_v15 = vmul.f32 %v694_v13, %v3553_v29 }
 0x4fa   :  { %v710_v19 = vadd.f32 %v707_v15, %v706_v17 }
 0x4fc   :  { %v711_v26 = vadd.f32 %v710_v19, %v708_v22 }
 0x4fe   :  { %v712_v37 = vadd.f32 %v711_v26, %v709_v33 }
 0x505   :  { %v2606_v14 = vpop.f32.mrf.mxu0 }
 0x506   :  { %v891_v27 = vmul.f32 %v2606_v14, %v3604_v50 }
 0x507   :  { %v874_v16 = vpop.f32.mrf.mxu0 }
 0x508   :  { %v889_v23 = vmul.f32 %v874_v16, %v3551_v28  ;;  %v2433_v16 = vld [vmem:[#allocation23] ss:$0 sm:$0xff] }
 0x509   :  { %v2607_v18 = vpop.f32.mrf.mxu0 }
 0x50a   :  { %v892_v34 = vmul.f32 %v2607_v18, %v3606_v51 }
 0x50b   :  { %v877_v20 = vpop.f32.mrf.mxu0 }
 0x50c   :  { %v890_v25 = vmul.f32 %v877_v20, %v3553_v29  ;;  %v2434_v20 = vld [vmem:[#allocation25] ss:$0 sm:$0xff] }
 0x50e   :  { %v893_v31 = vadd.f32 %v890_v25, %v889_v23 }
 0x510   :  { %v894_v35 = vadd.f32 %v893_v31, %v891_v27  ;;  %v2435_v27 = vld [vmem:[#allocation17] ss:$0 sm:$0xff] }
 0x512   :  { %v895_v38 = vadd.f32 %v894_v35, %v892_v34 }
 0x514   :  { %v896_v40 = vpack.c.bf16 %v895_v38, %v712_v37 }
 0x516   :  { %2613 = vmatmul.mubr.msk.bf16.vlgmr.msra.gmra.mxu1 %vm330_vm1, %v896_v40 }
 0x517   :  { %2625 = vmatpush3.bf16.xpose.msra.mxu1 %v1094_v43 }
 0x518   :  { %2722 = vmatprep.subr.msk.bf16.mxu1 %vm330_vm1, %v3684_v41 }
 0x5d6   :  { %v957_v32 = vpop.f32.mrf.mxu1 }
 0x5d7   :  { %v958_v39 = vadd.f32 %v2429_v45, %v957_v32 }
 0x5d8   :  { %v2614_v47 = vpop.f32.mrf.mxu1 }
 0x5d9   :  { %v964_v49 = vadd.f32 %v958_v39, %v3521_v8 }
 0x5da   :  { %v960_v52 = vpop.f32.mrf.mxu1 }
 0x5db   :  { %v961_v53 = vadd.f32 %v2429_v45, %v960_v52  ;;  %v968_v54 = vsel %vm330_vm1, %v964_v49, 0.0 }
 0x5dc   :  { %969 = vadd.xlane.f32.xlu1 %v968_v54  ;;  %v2615_v55 = vpop.f32.mrf.mxu1 }
 0x5dd   :  { %v965_v56 = vadd.f32 %v961_v53, %v3526_v9  ;;  %v2762_v9 = vld [vmem:[#allocation16] sm:$0xff]   ;;  %v1275_v53 = vsel %vm330_vm1, %v3684_v41, 0 }
 0x5de   :  { %2619 = vmatpush3.bf16.msra.mxu0 %v2762_v9 }
 0x5df   :  { %v971_v57 = vsel %vm330_vm1, %v965_v56, 0.0 }
 0x5e0   :  { %972 = vadd.xlane.f32.xlu0 %v971_v57  ;;  %v2763_v57 = vld [vmem:[%s3979_s13 + $0x18] sm:$0xff]  }
 0x665   :  { %v970_v58 = vpop.xlane.xlu1 %969 }
 0x666   :  { %v975_v59 = vmul.f32 0.03125, %v970_v58 }
 0x668   :  { %v977_v60 = vsub.f32 %v964_v49, %v975_v59  ;;  %v2764_v59 = vld [vmem:[%s3979_s13 + $0x10] sm:$0xff]  }
 0x669   :  { %v973_v61 = vpop.xlane.xlu0 %972 }
 0x66a   :  { %v976_v62 = vmul.f32 0.03125, %v973_v61  ;;  %v979_v63 = vmul.f32 %v977_v60, %v977_v60 }
 0x66c   :  { %v978_v1 = vsub.f32 %v965_v56, %v976_v62  ;;  %v981_v8 = vsel %vm330_vm1, %v979_v63, 0.0  ;;  %v1086_v62 = vld [vmem:[#allocation8] sm:$0xff] }
 0x66d   :  { %982 = vadd.xlane.f32.xlu1 %v981_v8 }
 0x66e   :  { %v980_v2 = vmul.f32 %v978_v1, %v978_v1 }
 0x670   :  { %v984_v4 = vsel %vm330_vm1, %v980_v2, 0.0 }
 0x671   :  { %985 = vadd.xlane.f32.xlu0 %v984_v4 }
 0x6f6   :  { %v983_v6 = vpop.xlane.xlu1 %982 }
 0x6f7   :  { %v987_v7 = vmul.f32 0.03125, %v983_v6 }
 0x6f9   :  { %v989_v10 = vadd.f32 1e-05, %v987_v7 }
 0x6fa   :  { %v986_v11 = vpop.xlane.xlu0 %985 }
 0x6fb   :  { %2807 = vrsqrt.f32 %v989_v10  ;;  %v988_v12 = vmul.f32 0.03125, %v986_v11 }
 0x6fd   :  { %v990_v13 = vadd.f32 1e-05, %v988_v12  ;;  %v1267_v12 = vld [vmem:[#allocation8 + $0x8] sm:$0xff] }
 0x6ff   :  { %2809 = vrsqrt.f32 %v990_v13 }
 0x708   :  { %v2808_v14 = vpop.eup %2807 }
 0x709   :  { %v993_v15 = vmul.f32 %v2808_v14, %v977_v60  ;;  %v3731_v60 = vpack.c.bf16 %v3597_v48, %v3583_v44 }
 0x70b   :  { %v1001_v19 = vmul.f32 %v2433_v16, %v993_v15 }
 0x70c   :  { %v2810_v17 = vpop.eup %2809 }
 0x70d   :  { %v994_v18 = vmul.f32 %v2810_v17, %v978_v1  ;;  %v3698_v23 = vadd.f32 %v2434_v20, %v1001_v19 }
 0x70f   :  { %v1002_v22 = vmul.f32 %v2433_v16, %v994_v18 }
 0x711   :  { %v3700_v25 = vadd.f32 %v2434_v20, %v1002_v22 }
 0x713   :  { %v1016_v26 = vpack.c.bf16 %v3700_v25, %v3698_v23 }
 0x715   :  { %2621 = vmatmul.mubr.msk.bf16.vlgmr.msra.gmra.mxu0 %vm330_vm1, %v1016_v26 }
 0x7d5   :  { %v1072_v31 = vpop.f32.mrf.mxu0 }
 0x7d6   :  { %v1073_v33 = vadd.f32 %v2435_v27, %v1072_v31 }
 0x7d7   :  { %v2622_v34 = vpop.f32.mrf.mxu0 }
 0x7d8   :  { %v1080_v35 = vmul.f32 %v1073_v33, %v3551_v28  ;;  %v1081_v37 = vmul.f32 %v1073_v33, %v3553_v29  ;;  %v1082_v38 = vmul.f32 %v1073_v33, %v3604_v50  ;;  %v1083_v40 = vmul.f32 %v1073_v33, %v3606_v51 }
 0x7d9   :  { %v1075_v43 = vpop.f32.mrf.mxu0 }
 0x7da   :  { %v1085_v45 = vpack.c.bf16 %v1083_v40, %v1082_v38  ;;  %v1076_v32 = vadd.f32 %v2435_v27, %v1075_v43  ;;  %v1084_v39 = vpack.c.bf16 %v1081_v37, %v1080_v35 }
 0x7db   :  { %v2623_v47 = vpop.f32.mrf.mxu0 }
 0x7dc   :  { %v1260_v49 = vmul.f32 %v1076_v32, %v3551_v28  ;;  %v1261_v52 = vmul.f32 %v1076_v32, %v3553_v29  ;;  %2626 = vmatprep.mubr.msk.bf16.mxu1 %vm330_vm1, %v1084_v39  ;;  %v1262_v55 = vmul.f32 %v1076_v32, %v3604_v50  ;;  %v1263_v56 = vmul.f32 %v1076_v32, %v3606_v51 }
 0x7dd   :  { %2627 = vmatmul.mubr.msk.bf16.vlgmr.msra.gmra.mxu1 %vm330_vm1, %v1085_v45 }
 0x7de   :  { %2637 = vmatpush3.bf16.xpose.msra.mxu1 %v1275_v53  ;;  %v1264_v54 = vpack.c.bf16 %v1261_v52, %v1260_v49  ;;  %v1265_v58 = vpack.c.bf16 %v1263_v56, %v1262_v55 }
 0x7df   :  { %2648 = vmatprep.subr.bf16.mxu1 %v3298_v0 }
 0x7e0   :  { %2638 = vmatprep.mubr.msk.bf16.mxu1 %vm330_vm1, %v1264_v54 }
 0x7e5   :  { %2639 = vmatmul.mubr.msk.bf16.vlgmr.msra.gmra.mxu1 %vm330_vm1, %v1265_v58 }
 0x7e6   :  { %2649 = vmatpush3.bf16.msra.mxu1 %v2763_v57  ;;  %2652 = vmatprep.mubr.msk.bf16.mxu1 %vm3299_vm0, %v3298_v0 }
 0x7e7   :  { %2650 = vmatprep.subr.bf16.mxu1 %v3298_v0 }
 0x7ea   :  { %2651 = vmatpush3.bf16.msra.mxu1 %v2764_v59 }
 0x7eb   :  { %2724 = vmatprep.subr.msk.bf16.mxu1 %vm330_vm1, %v3731_v60 }
 0x89d   :  { %v2628_v61 = vpop.f32.mrf.mxu1 }
 0x89e   :  { %v1139_v2 = vadd.f32 %v2628_v61, %v1086_v62 }
 0x89f   :  { %v1130_v63 = vpop.f32.mrf.mxu1 }
 0x8a0   :  { %v1131_v1 = vadd.f32 %v1130_v63, %v1086_v62  ;;  %v1151_v11 = vsel %vm598_vm2, %v1139_v2, -inf }
 0x8a1   :  { %v2629_v8 = vpop.f32.mrf.mxu1 }
 0x8a2   :  { %v1145_v4 = vsel %vm598_vm2, %v1131_v1, -inf  ;;  %v1142_v7 = vadd.f32 %v2629_v8, %v1086_v62 }
 0x8a3   :  { %v1133_v5 = vpop.f32.mrf.mxu1  ;;  %1146 = vmax.xlane.f32.xlu1 %v1145_v4 }
 0x8a4   :  { %v1134_v9 = vadd.f32 %v1133_v5, %v1086_v62  ;;  %v1154_v17 = vsel %vm598_vm2, %v1142_v7, -inf }
 0x8a5   :  { %v2640_v6 = vpop.f32.mrf.mxu1 }
 0x8a6   :  { %v1148_v10 = vsel %vm598_vm2, %v1134_v9, -inf  ;;  %v1320_v16 = vadd.f32 %v2640_v6, %v1267_v12 }
 0x8a7   :  { %v1311_v13 = vpop.f32.mrf.mxu1  ;;  %1149 = vmax.xlane.f32.xlu0 %v1148_v10  ;;  %1152 = vmax.xlane.f32.xlu1 %v1151_v11 }
 0x8a8   :  { %v1312_v14 = vadd.f32 %v1311_v13, %v1267_v12  ;;  %v1332_v27 = vsel %vm598_vm2, %v1320_v16, -inf }
 0x8a9   :  { %v2641_v15 = vpop.f32.mrf.mxu1 }
 0x8aa   :  { %v1326_v18 = vsel %vm598_vm2, %v1312_v14, -inf  ;;  %v1323_v22 = vadd.f32 %v2641_v15, %v1267_v12 }
 0x8ab   :  { %v1314_v19 = vpop.f32.mrf.mxu1  ;;  %1155 = vmax.xlane.f32.xlu0 %v1154_v17  ;;  %1327 = vmax.xlane.f32.xlu1 %v1326_v18 }
 0x8ac   :  { %v1315_v20 = vadd.f32 %v1314_v19, %v1267_v12  ;;  %v1335_v31 = vsel %vm598_vm2, %v1323_v22, -inf }
 0x8ae   :  { %v1329_v26 = vsel %vm598_vm2, %v1315_v20, -inf }
 0x8af   :  { %1330 = vmax.xlane.f32.xlu0 %v1329_v26  ;;  %1333 = vmax.xlane.f32.xlu1 %v1332_v27 }
 0x8b3   :  { %1336 = vmax.xlane.f32.xlu0 %v1335_v31 }
 0x92c   :  { %v1147_v33 = vpop.xlane.xlu1 %1146 }
 0x92d   :  { %v1157_v34 = vsub.f32 %v1131_v1, %v1147_v33 }
 0x92f   :  { %v1161_v45 = vmul.f32 1.442695, %v1157_v34 }
 0x930   :  { %v1150_v35 = vpop.xlane.xlu0 %1149  ;;  %v1153_v37 = vpop.xlane.xlu1 %1152 }
 0x931   :  { %v1159_v38 = vsub.f32 %v1139_v2, %v1153_v37  ;;  %v1158_v40 = vsub.f32 %v1134_v9, %v1150_v35 }
 0x933   :  { %v1165_v43 = vmul.f32 1.442695, %v1159_v38  ;;  %v1163_v49 = vmul.f32 1.442695, %v1158_v40 }
 0x934   :  { %v1156_v32 = vpop.xlane.xlu0 %1155  ;;  %v1328_v39 = vpop.xlane.xlu1 %1327 }
 0x935   :  { %v1160_v47 = vsub.f32 %v1142_v7, %v1156_v32  ;;  %2811 = vpow2.f32 %v1165_v43  ;;  %v1338_v53 = vsub.f32 %v1312_v14, %v1328_v39 }
 0x936   :  { %2813 = vpow2.f32 %v1161_v45 }
 0x937   :  { %v1167_v52 = vmul.f32 1.442695, %v1160_v47  ;;  %v1342_v59 = vmul.f32 1.442695, %v1338_v53 }
 0x938   :  { %v1331_v54 = vpop.xlane.xlu0 %1330  ;;  %v1334_v55 = vpop.xlane.xlu1 %1333 }
 0x939   :  { %2815 = vpow2.f32 %v1167_v52  ;;  %v1340_v56 = vsub.f32 %v1320_v16, %v1334_v55  ;;  %v1339_v57 = vsub.f32 %v1315_v20, %v1331_v54 }
 0x93a   :  { %2817 = vpow2.f32 %v1163_v49 }
 0x93b   :  { %v1346_v58 = vmul.f32 1.442695, %v1340_v56  ;;  %v1344_v63 = vmul.f32 1.442695, %v1339_v57 }
 0x93c   :  { %v1337_v61 = vpop.xlane.xlu0 %1336 }
 0x93d   :  { %v1341_v62 = vsub.f32 %v1323_v22, %v1337_v61  ;;  %2819 = vpow2.f32 %v1346_v58 }
 0x93e   :  { %2821 = vpow2.f32 %v1342_v59 }
 0x93f   :  { %v1348_v1 = vmul.f32 1.442695, %v1341_v62 }
 0x941   :  { %2823 = vpow2.f32 %v1348_v1 }
 0x942   :  { %v2812_v8 = vpop.eup %2811  ;;  %2825 = vpow2.f32 %v1344_v63 }
 0x943   :  { %v1175_v2 = vsel %vm598_vm2, %v2812_v8, 0.0  ;;  %v2814_v4 = vpop.eup %2813 }
 0x944   :  { %1176 = vadd.xlane.f32.xlu1 %v1175_v2  ;;  %v1169_v7 = vsel %vm598_vm2, %v2814_v4, 0.0 }
 0x946   :  { %v2816_v5 = vpop.eup %2815 }
 0x947   :  { %v1178_v9 = vsel %vm598_vm2, %v2816_v5, 0.0  ;;  %v2818_v6 = vpop.eup %2817 }
 0x948   :  { %1179 = vadd.xlane.f32.xlu0 %v1178_v9  ;;  %1170 = vadd.xlane.f32.xlu1 %v1169_v7  ;;  %v1172_v11 = vsel %vm598_vm2, %v2818_v6, 0.0 }
 0x94a   :  { %v2820_v10 = vpop.eup %2819 }
 0x94b   :  { %v1356_v12 = vsel %vm598_vm2, %v2820_v10, 0.0  ;;  %v2822_v13 = vpop.eup %2821 }
 0x94c   :  { %1173 = vadd.xlane.f32.xlu0 %v1172_v11  ;;  %1357 = vadd.xlane.f32.xlu1 %v1356_v12  ;;  %v1350_v17 = vsel %vm598_vm2, %v2822_v13, 0.0 }
 0x94e   :  { %v2824_v14 = vpop.eup %2823 }
 0x94f   :  { %v1359_v15 = vsel %vm598_vm2, %v2824_v14, 0.0  ;;  %v2826_v16 = vpop.eup %2825 }
 0x950   :  { %1360 = vadd.xlane.f32.xlu0 %v1359_v15  ;;  %1351 = vadd.xlane.f32.xlu1 %v1350_v17  ;;  %v1353_v18 = vsel %vm598_vm2, %v2826_v16, 0.0 }
 0x954   :  { %1354 = vadd.xlane.f32.xlu0 %v1353_v18 }
 0x961   :  { %1192 = vrot.lane.b32.xlu1 %v3639_v3, %s3300_s2 }
 0x96a   :  { %1373 = vrot.lane.b32.xlu0 %v3684_v41, %s3300_s2 }
 0x9cd   :  { %v1177_v19 = vpop.xlane.xlu1 %1176 }
 0x9d1   :  { %v1180_v20 = vpop.xlane.xlu0 %1179  ;;  %v1171_v22 = vpop.xlane.xlu1 %1170 }
 0x9d2   :  { %2827 = vrcp.f32 %v1180_v20 }
 0x9d3   :  { %2829 = vrcp.f32 %v1171_v22 }
 0x9d4   :  { %2831 = vrcp.f32 %v1177_v19 }
 0x9d5   :  { %v1174_v26 = vpop.xlane.xlu0 %1173  ;;  %v1358_v27 = vpop.xlane.xlu1 %1357 }
 0x9d6   :  { %2833 = vrcp.f32 %v1174_v26 }
 0x9d9   :  { %v1361_v31 = vpop.xlane.xlu0 %1360  ;;  %v1352_v33 = vpop.xlane.xlu1 %1351 }
 0x9da   :  { %2835 = vrcp.f32 %v1361_v31 }
 0x9db   :  { %2837 = vrcp.f32 %v1352_v33 }
 0x9dc   :  { %2839 = vrcp.f32 %v1358_v27 }
 0x9dd   :  { %v1355_v34 = vpop.xlane.xlu0 %1354  ;;  %v1193_v3 = vpop.permute.xlu1 %1192 }
 0x9de   :  { %2841 = vrcp.f32 %v1355_v34  ;;  %v1201_v35 = vsel %vm653_vm3, %v1193_v3, 0  ;;  %2721 = vmatprep.subr.msk.bf16.mxu0 %vm653_vm3, %v1193_v3  ;;  %v3776_v34 = vpack.c.bf16 %v3590_v46, %v3576_v42 }
 0x9df   :  { %v2828_v41 = vpop.eup %2827  ;;  %2631 = vmatpush3.bf16.msra.mxu0 %v1201_v35 }
 0x9e0   :  { %v2830_v37 = vpop.eup %2829  ;;  %v1188_v45 = vmul.f32 %v2828_v41, %v2816_v5 }
 0x9e1   :  { %v1374_v38 = vpop.permute.xlu0 %1373  ;;  %v2832_v40 = vpop.eup %2831  ;;  %v1185_v32 = vmul.f32 %v2830_v37, %v2814_v4 }
 0x9e2   :  { %2723 = vmatprep.subr.msk.bf16.mxu0 %vm653_vm3, %v1374_v38  ;;  %v1187_v47 = vmul.f32 %v2832_v40, %v2812_v8  ;;  %v1382_v55 = vsel %vm653_vm3, %v1374_v38, 0 }
 0x9e3   :  { %v2834_v43 = vpop.eup %2833 }
 0x9e4   :  { %v1186_v39 = vmul.f32 %v2834_v43, %v2818_v6  ;;  %v1190_v52 = vpack.c.bf16 %v1188_v45, %v1187_v47 }
 0x9e6   :  { %v1189_v49 = vpack.c.bf16 %v1186_v39, %v1185_v32 }
 0x9e7   :  { %v2836_v53 = vpop.eup %2835 }
 0x9e8   :  { %2632 = vmatprep.mubr.msk.bf16.mxu0 %vm598_vm2, %v1189_v49  ;;  %v2838_v54 = vpop.eup %2837  ;;  %v1369_v58 = vmul.f32 %v2836_v53, %v2824_v14 }
 0x9e9   :  { %2633 = vmatmul.mubr.msk.bf16.vlgmr.msra.gmra.mxu0 %vm598_vm2, %v1190_v52  ;;  %v2840_v56 = vpop.eup %2839  ;;  %v1366_v59 = vmul.f32 %v2838_v54, %v2822_v13 }
 0x9ea   :  { %2643 = vmatpush3.bf16.msra.mxu0 %v1382_v55  ;;  %v1368_v62 = vmul.f32 %v2840_v56, %v2820_v10 }
 0x9eb   :  { %v2842_v57 = vpop.eup %2841  ;;  %2656 = vmatprep.subr.bf16.mxu0 %v3298_v0 }
 0x9ec   :  { %v1367_v61 = vmul.f32 %v2842_v57, %v2826_v16  ;;  %v1371_v1 = vpack.c.bf16 %v1369_v58, %v1368_v62  ;;  %v2765_v57 = vld [vmem:[#allocation16 + $0x18] sm:$0xff]  }
 0x9ee   :  { %v1370_v63 = vpack.c.bf16 %v1367_v61, %v1366_v59 }
 0x9f0   :  { %2644 = vmatprep.mubr.msk.bf16.mxu0 %vm598_vm2, %v1370_v63 }
 0x9f1   :  { %2645 = vmatmul.mubr.msk.bf16.vlgmr.msra.gmra.mxu0 %vm598_vm2, %v1371_v1 }
 0x9f2   :  { %2660 = vmatprep.mubr.msk.bf16.mxu0 %vm3299_vm0, %v3298_v0  ;;  %2657 = vmatpush3.bf16.msra.mxu0 %v2765_v57 }
 0x9f3   :  { %2658 = vmatprep.subr.bf16.mxu0 %v3298_v0 }
 0xaa9   :  { %v2634_v8 = vpop.f32.mrf.mxu0 }
 0xaaa   :  { %v1254_v14 = vmul.f32 %v2634_v8, %v3604_v50 }
 0xaab   :  { %v1237_v2 = vpop.f32.mrf.mxu0 }
 0xaac   :  { %v1252_v11 = vmul.f32 %v1237_v2, %v3551_v28 }
 0xaad   :  { %v2635_v4 = vpop.f32.mrf.mxu0 }
 0xaae   :  { %v1255_v20 = vmul.f32 %v2635_v4, %v3606_v51  ;;  %v2455_v4 = vld [vmem:[#allocation23 + $0x1] ss:$0 sm:$0xff] }
 0xaaf   :  { %v1240_v5 = vpop.f32.mrf.mxu0 }
 0xab0   :  { %v1253_v6 = vmul.f32 %v1240_v5, %v3553_v29 }
 0xab1   :  { %v2646_v9 = vpop.f32.mrf.mxu0 }
 0xab2   :  { %v1256_v12 = vadd.f32 %v1253_v6, %v1252_v11  ;;  %v1435_v18 = vmul.f32 %v2646_v9, %v3604_v50 }
 0xab3   :  { %v1418_v7 = vpop.f32.mrf.mxu0 }
 0xab4   :  { %v1433_v15 = vmul.f32 %v1418_v7, %v3551_v28  ;;  %v1257_v17 = vadd.f32 %v1256_v12, %v1254_v14  ;;  %v1643_v28 = vsel %vm330_vm1, %v3731_v60, 0  ;;  %v2456_v7 = vld [vmem:[#allocation25 + $0x1] ss:$0 sm:$0xff]  ;;  %v2457_v14 = vld [vmem:[#allocation17 + $0x1] ss:$0 sm:$0xff] }
 0xab5   :  { %v2647_v10 = vpop.f32.mrf.mxu0 }
 0xab6   :  { %v1436_v22 = vmul.f32 %v2647_v10, %v3606_v51  ;;  %v1258_v27 = vadd.f32 %v1257_v17, %v1255_v20  ;;  %v3800_v20 = vld [vmem:[#allocation11 + $0x8] sm:$0xff] }
 0xab7   :  { %v1421_v13 = vpop.f32.mrf.mxu0 }
 0xab8   :  { %v1434_v16 = vmul.f32 %v1421_v13, %v3553_v29  ;;  %v2451_v29 = vld [vmem:[#allocation22 + $0x1] ss:$0 sm:$0xff] }
 0xaba   :  { %v1437_v19 = vadd.f32 %v1434_v16, %v1433_v15 }
 0xabc   :  { %v1438_v26 = vadd.f32 %v1437_v19, %v1435_v18  ;;  %v3797_v18 = vld [vmem:[#allocation11] sm:$0xff] }
 0xabe   :  { %v1439_v31 = vadd.f32 %v1438_v26, %v1436_v22  ;;  %v3803_v26 = vld [vmem:[#allocation11 + $0x10] sm:$0xff] }
 0xac0   :  { %v1440_v33 = vpack.c.bf16 %v1439_v31, %v1258_v27  ;;  %v3806_v31 = vld [vmem:[#allocation11 + $0x18] sm:$0xff] }
 0xac2   :  { %2653 = vmatmul.mubr.msk.bf16.vlgmr.msra.gmra.mxu1 %vm330_vm1, %v1440_v33 }
 0xac3   :  { %2665 = vmatpush3.bf16.xpose.msra.mxu1 %v1643_v28 }
 0xac4   :  { %2725 = vmatprep.subr.msk.bf16.mxu1 %vm330_vm1, %v3776_v34 }
 0xb82   :  { %v1503_v50 = vpop.f32.mrf.mxu1 }
 0xb83   :  { %v1504_v51 = vadd.f32 %v2451_v29, %v1503_v50 }
 0xb84   :  { %v2654_v3 = vpop.f32.mrf.mxu1 }
 0xb85   :  { %v1510_v35 = vadd.f32 %v1504_v51, %v3698_v23 }
 0xb86   :  { %v1506_v41 = vpop.f32.mrf.mxu1 }
 0xb87   :  { %v1507_v37 = vadd.f32 %v2451_v29, %v1506_v41  ;;  %v1516_v38 = vsel %vm330_vm1, %v1510_v35, 0.0 }
 0xb88   :  { %1517 = vadd.xlane.f32.xlu1 %v1516_v38  ;;  %v2655_v40 = vpop.f32.mrf.mxu1 }
 0xb89   :  { %v1511_v43 = vadd.f32 %v1507_v37, %v3700_v25  ;;  %v2766_v25 = vld [vmem:[#allocation16 + $0x10] sm:$0xff]   ;;  %v1823_v37 = vsel %vm330_vm1, %v3776_v34, 0 }
 0xb8a   :  { %2659 = vmatpush3.bf16.msra.mxu0 %v2766_v25 }
 0xb8b   :  { %v1519_v45 = vsel %vm330_vm1, %v1511_v43, 0.0 }
 0xb8c   :  { %1520 = vadd.xlane.f32.xlu0 %v1519_v45 }
 0xc11   :  { %v1518_v32 = vpop.xlane.xlu1 %1517 }
 0xc12   :  { %v1522_v39 = vmul.f32 0.03125, %v1518_v32 }
 0xc14   :  { %v1524_v47 = vsub.f32 %v1510_v35, %v1522_v39  ;;  %v1635_v39 = vld [vmem:[#allocation10] sm:$0xff] }
 0xc15   :  { %v1521_v49 = vpop.xlane.xlu0 %1520 }
 0xc16   :  { %v1523_v52 = vmul.f32 0.03125, %v1521_v49  ;;  %v1526_v53 = vmul.f32 %v1524_v47, %v1524_v47 }
 0xc18   :  { %v1525_v54 = vsub.f32 %v1511_v43, %v1523_v52  ;;  %v1528_v23 = vsel %vm330_vm1, %v1526_v53, 0.0 }
 0xc19   :  { %1529 = vadd.xlane.f32.xlu1 %v1528_v23 }
 0xc1a   :  { %v1527_v55 = vmul.f32 %v1525_v54, %v1525_v54 }
 0xc1c   :  { %v1531_v56 = vsel %vm330_vm1, %v1527_v55, 0.0 }
 0xc1d   :  { %1532 = vadd.xlane.f32.xlu0 %v1531_v56 }
 0xca2   :  { %v1530_v58 = vpop.xlane.xlu1 %1529 }
 0xca3   :  { %v1534_v59 = vmul.f32 0.03125, %v1530_v58 }
 0xca5   :  { %v1536_v61 = vadd.f32 1e-05, %v1534_v59  ;;  %v1815_v59 = vld [vmem:[#allocation10 + $0x8] sm:$0xff] }
 0xca6   :  { %v1533_v62 = vpop.xlane.xlu0 %1532 }
 0xca7   :  { %2843 = vrsqrt.f32 %v1536_v61  ;;  %v1535_v63 = vmul.f32 0.03125, %v1533_v62 }
 0xca9   :  { %v1537_v1 = vadd.f32 1e-05, %v1535_v63 }
 0xcab   :  { %2845 = vrsqrt.f32 %v1537_v1 }
 0xcb4   :  { %v2844_v8 = vpop.eup %2843 }
 0xcb5   :  { %v1540_v2 = vmul.f32 %v2844_v8, %v1524_v47 }
 0xcb7   :  { %v1548_v6 = vmul.f32 %v2455_v4, %v1540_v2 }
 0xcb8   :  { %v2846_v5 = vpop.eup %2845 }
 0xcb9   :  { %v1541_v9 = vmul.f32 %v2846_v5, %v1525_v54  ;;  %v3790_v10 = vadd.f32 %v2456_v7, %v1548_v6 }
 0xcbb   :  { %v1549_v11 = vmul.f32 %v2455_v4, %v1541_v9 }
 0xcbd   :  { %v3792_v12 = vadd.f32 %v2456_v7, %v1549_v11 }
 0xcbf   :  { %v1565_v13 = vpack.c.bf16 %v3792_v12, %v3790_v10 }
 0xcc1   :  { %2661 = vmatmul.mubr.msk.bf16.vlgmr.msra.gmra.mxu0 %vm330_vm1, %v1565_v13 }
 0xd81   :  { %v1621_v15 = vpop.f32.mrf.mxu0 }
 0xd82   :  { %v1622_v16 = vadd.f32 %v2457_v14, %v1621_v15 }
 0xd83   :  { %v2662_v17 = vpop.f32.mrf.mxu0 }
 0xd84   :  { %v1629_v19 = vmul.f32 %v3797_v18, %v1622_v16  ;;  %v1630_v22 = vmul.f32 %v3800_v20, %v1622_v16  ;;  %v1631_v27 = vmul.f32 %v3803_v26, %v1622_v16  ;;  %v1632_v33 = vmul.f32 %v3806_v31, %v1622_v16 }
 0xd85   :  { %v1624_v28 = vpop.f32.mrf.mxu0 }
 0xd86   :  { %v1634_v29 = vpack.c.bf16 %v1632_v33, %v1631_v27  ;;  %v1625_v50 = vadd.f32 %v2457_v14, %v1624_v28  ;;  %v1633_v51 = vpack.c.bf16 %v1630_v22, %v1629_v19 }
 0xd87   :  { %v2663_v3 = vpop.f32.mrf.mxu0 }
 0xd88   :  { %v1808_v35 = vmul.f32 %v3797_v18, %v1625_v50  ;;  %v1809_v41 = vmul.f32 %v3800_v20, %v1625_v50  ;;  %2666 = vmatprep.mubr.msk.bf16.mxu1 %vm330_vm1, %v1633_v51  ;;  %v1810_v40 = vmul.f32 %v3803_v26, %v1625_v50  ;;  %v1811_v43 = vmul.f32 %v3806_v31, %v1625_v50 }
 0xd89   :  { %2667 = vmatmul.mubr.msk.bf16.vlgmr.msra.gmra.mxu1 %vm330_vm1, %v1634_v29 }
 0xd8a   :  { %2677 = vmatpush3.bf16.xpose.msra.mxu1 %v1823_v37  ;;  %v1812_v38 = vpack.c.bf16 %v1809_v41, %v1808_v35  ;;  %v1813_v45 = vpack.c.bf16 %v1811_v43, %v1810_v40 }
 0xd8b   :  { %2688 = vmatprep.subr.bf16.mxu1 %v3298_v0 }
 0xd8c   :  { %2678 = vmatprep.mubr.msk.bf16.mxu1 %vm330_vm1, %v1812_v38 }
 0xd91   :  { %2679 = vmatmul.mubr.msk.bf16.vlgmr.msra.gmra.mxu1 %vm330_vm1, %v1813_v45 }
 0xd92   :  { %2692 = vmatprep.mubr.msk.bf16.mxu1 %vm3299_vm0, %v3298_v0 }
 0xe49   :  { %v2668_v32 = vpop.f32.mrf.mxu1 }
 0xe4a   :  { %v1688_v53 = vadd.f32 %v2668_v32, %v1635_v39 }
 0xe4b   :  { %v1679_v47 = vpop.f32.mrf.mxu1 }
 0xe4c   :  { %v1680_v49 = vadd.f32 %v1679_v47, %v1635_v39  ;;  %v1701_v58 = vsel %vm1694_vm4, %v1688_v53, -inf }
 0xe4d   :  { %v2669_v52 = vpop.f32.mrf.mxu1 }
 0xe4e   :  { %v1695_v54 = vsel %vm1694_vm4, %v1680_v49, -inf  ;;  %v1691_v57 = vadd.f32 %v2669_v52, %v1635_v39 }
 0xe4f   :  { %v1682_v23 = vpop.f32.mrf.mxu1  ;;  %1696 = vmax.xlane.f32.xlu1 %v1695_v54 }
 0xe50   :  { %v1683_v55 = vadd.f32 %v1682_v23, %v1635_v39  ;;  %v1704_v8 = vsel %vm1694_vm4, %v1691_v57, -inf }
 0xe51   :  { %v2680_v56 = vpop.f32.mrf.mxu1 }
 0xe52   :  { %v1698_v25 = vsel %vm1694_vm4, %v1683_v55, -inf  ;;  %v1868_v1 = vadd.f32 %v2680_v56, %v1815_v59 }
 0xe53   :  { %v1859_v61 = vpop.f32.mrf.mxu1  ;;  %1699 = vmax.xlane.f32.xlu0 %v1698_v25  ;;  %1702 = vmax.xlane.f32.xlu1 %v1701_v58 }
 0xe54   :  { %v1860_v62 = vadd.f32 %v1859_v61, %v1815_v59  ;;  %v1880_v7 = vsel %vm1694_vm4, %v1868_v1, -inf }
 0xe55   :  { %v2681_v63 = vpop.f32.mrf.mxu1 }
 0xe56   :  { %v1874_v2 = vsel %vm1694_vm4, %v1860_v62, -inf  ;;  %v1871_v9 = vadd.f32 %v2681_v63, %v1815_v59 }
 0xe57   :  { %v1862_v4 = vpop.f32.mrf.mxu1  ;;  %1705 = vmax.xlane.f32.xlu0 %v1704_v8  ;;  %1875 = vmax.xlane.f32.xlu1 %v1874_v2 }
 0xe58   :  { %v1863_v5 = vadd.f32 %v1862_v4, %v1815_v59  ;;  %v1883_v11 = vsel %vm1694_vm4, %v1871_v9, -inf }
 0xe5a   :  { %v1877_v6 = vsel %vm1694_vm4, %v1863_v5, -inf }
 0xe5b   :  { %1878 = vmax.xlane.f32.xlu0 %v1877_v6  ;;  %1881 = vmax.xlane.f32.xlu1 %v1880_v7 }
 0xe5f   :  { %1884 = vmax.xlane.f32.xlu0 %v1883_v11 }
 0xed8   :  { %v1697_v13 = vpop.xlane.xlu1 %1696 }
 0xed9   :  { %v1707_v14 = vsub.f32 %v1680_v49, %v1697_v13 }
 0xedb   :  { %v1711_v27 = vmul.f32 1.442695, %v1707_v14 }
 0xedc   :  { %v1700_v15 = vpop.xlane.xlu0 %1699  ;;  %v1703_v16 = vpop.xlane.xlu1 %1702 }
 0xedd   :  { %v1709_v17 = vsub.f32 %v1688_v53, %v1703_v16  ;;  %v1708_v19 = vsub.f32 %v1683_v55, %v1700_v15 }
 0xedf   :  { %v1715_v22 = vmul.f32 1.442695, %v1709_v17  ;;  %v1713_v50 = vmul.f32 1.442695, %v1708_v19 }
 0xee0   :  { %v1706_v33 = vpop.xlane.xlu0 %1705  ;;  %v1876_v28 = vpop.xlane.xlu1 %1875 }
 0xee1   :  { %v1710_v29 = vsub.f32 %v1691_v57, %v1706_v33  ;;  %2847 = vpow2.f32 %v1715_v22  ;;  %v1886_v3 = vsub.f32 %v1860_v62, %v1876_v28 }
 0xee2   :  { %2849 = vpow2.f32 %v1711_v27 }
 0xee3   :  { %v1717_v51 = vmul.f32 1.442695, %v1710_v29  ;;  %v1890_v43 = vmul.f32 1.442695, %v1886_v3 }
 0xee4   :  { %v1879_v35 = vpop.xlane.xlu0 %1878  ;;  %v1882_v41 = vpop.xlane.xlu1 %1881 }
 0xee5   :  { %2851 = vpow2.f32 %v1717_v51  ;;  %v1888_v37 = vsub.f32 %v1868_v1, %v1882_v41  ;;  %v1887_v38 = vsub.f32 %v1863_v5, %v1879_v35 }
 0xee6   :  { %2853 = vpow2.f32 %v1713_v50 }
 0xee7   :  { %v1894_v40 = vmul.f32 1.442695, %v1888_v37  ;;  %v1892_v39 = vmul.f32 1.442695, %v1887_v38 }
 0xee8   :  { %v1885_v45 = vpop.xlane.xlu0 %1884 }
 0xee9   :  { %v1889_v32 = vsub.f32 %v1871_v9, %v1885_v45  ;;  %2855 = vpow2.f32 %v1894_v40 }
 0xeea   :  { %2857 = vpow2.f32 %v1890_v43 }
 0xeeb   :  { %v1896_v47 = vmul.f32 1.442695, %v1889_v32  ;;  %v2767_v32 = vld [vmem:[%s3979_s13 + $0x28] sm:$0xff]  }
 0xeec   :  { %2689 = vmatpush3.bf16.msra.mxu1 %v2767_v32 }
 0xeed   :  { %2859 = vpow2.f32 %v1896_v47  ;;  %2690 = vmatprep.subr.bf16.mxu1 %v3298_v0 }
 0xeee   :  { %v2848_v49 = vpop.eup %2847  ;;  %2861 = vpow2.f32 %v1892_v39  ;;  %v2768_v39 = vld [vmem:[%s3979_s13 + $0x20] sm:$0xff]  }
 0xeef   :  { %v1725_v52 = vsel %vm1694_vm4, %v2848_v49, 0.0  ;;  %v2850_v53 = vpop.eup %2849 }
 0xef0   :  { %1726 = vadd.xlane.f32.xlu1 %v1725_v52  ;;  %v1719_v56 = vsel %vm1694_vm4, %v2850_v53, 0.0  ;;  %2691 = vmatpush3.bf16.msra.mxu1 %v2768_v39  ;;  %v2477_v39 = vld [vmem:[#allocation23 + $0x2] ss:$0 sm:$0xff] }
 0xef1   :  { %2704 = vmatprep.subr.bf16.mxu1 %v3298_v0 }
 0xef2   :  { %v2852_v54 = vpop.eup %2851 }
 0xef3   :  { %v1728_v23 = vsel %vm1694_vm4, %v2852_v54, 0.0  ;;  %v2854_v55 = vpop.eup %2853 }
 0xef4   :  { %1729 = vadd.xlane.f32.xlu0 %v1728_v23  ;;  %1720 = vadd.xlane.f32.xlu1 %v1719_v56  ;;  %v1722_v25 = vsel %vm1694_vm4, %v2854_v55, 0.0 }
 0xef6   :  { %v2856_v57 = vpop.eup %2855 }
 0xef7   :  { %v1904_v58 = vsel %vm1694_vm4, %v2856_v57, 0.0  ;;  %v2858_v59 = vpop.eup %2857 }
 0xef8   :  { %1723 = vadd.xlane.f32.xlu0 %v1722_v25  ;;  %1905 = vadd.xlane.f32.xlu1 %v1904_v58  ;;  %v1898_v1 = vsel %vm1694_vm4, %v2858_v59, 0.0 }
 0xefa   :  { %v2860_v61 = vpop.eup %2859 }
 0xefb   :  { %v1907_v62 = vsel %vm1694_vm4, %v2860_v61, 0.0  ;;  %v2862_v63 = vpop.eup %2861 }
 0xefc   :  { %1908 = vadd.xlane.f32.xlu0 %v1907_v62  ;;  %1899 = vadd.xlane.f32.xlu1 %v1898_v1  ;;  %v1901_v8 = vsel %vm1694_vm4, %v2862_v63, 0.0 }
 0xf00   :  { %1902 = vadd.xlane.f32.xlu0 %v1901_v8 }
 0xf0d   :  { %1742 = vrot.lane.b32.xlu1 %v3731_v60, %s3300_s2 }
 0xf16   :  { %1921 = vrot.lane.b32.xlu0 %v3776_v34, %s3300_s2 }
 0xf79   :  { %v1727_v2 = vpop.xlane.xlu1 %1726 }
 0xf7d   :  { %v1730_v4 = vpop.xlane.xlu0 %1729  ;;  %v1721_v5 = vpop.xlane.xlu1 %1720 }
 0xf7e   :  { %2863 = vrcp.f32 %v1730_v4 }
 0xf7f   :  { %2865 = vrcp.f32 %v1721_v5 }
 0xf80   :  { %2867 = vrcp.f32 %v1727_v2 }
 0xf81   :  { %v1724_v9 = vpop.xlane.xlu0 %1723  ;;  %v1906_v6 = vpop.xlane.xlu1 %1905 }
 0xf82   :  { %2869 = vrcp.f32 %v1724_v9 }
 0xf85   :  { %v1909_v7 = vpop.xlane.xlu0 %1908  ;;  %v1900_v11 = vpop.xlane.xlu1 %1899 }
 0xf86   :  { %2871 = vrcp.f32 %v1909_v7 }
 0xf87   :  { %2873 = vrcp.f32 %v1900_v11 }
 0xf88   :  { %2875 = vrcp.f32 %v1906_v6 }
 0xf89   :  { %v1903_v13 = vpop.xlane.xlu0 %1902  ;;  %v1743_v60 = vpop.permute.xlu1 %1742 }
 0xf8a   :  { %2877 = vrcp.f32 %v1903_v13  ;;  %2670 = vmatprep.subr.bf16.mxu0 %v1743_v60 }
 0xf8b   :  { %v2864_v14 = vpop.eup %2863  ;;  %2671 = vmatpush3.bf16.msra.mxu0 %v1743_v60 }
 0xf8c   :  { %v2866_v34 = vpop.eup %2865  ;;  %v1738_v19 = vmul.f32 %v2864_v14, %v2852_v54 }
 0xf8d   :  { %v1922_v15 = vpop.permute.xlu0 %1921  ;;  %v2868_v16 = vpop.eup %2867  ;;  %v1735_v22 = vmul.f32 %v2866_v34, %v2850_v53 }
 0xf8e   :  { %2682 = vmatprep.subr.bf16.mxu0 %v1922_v15  ;;  %v1737_v33 = vmul.f32 %v2868_v16, %v2848_v49 }
 0xf8f   :  { %v2870_v17 = vpop.eup %2869 }
 0xf90   :  { %v1736_v27 = vmul.f32 %v2870_v17, %v2854_v55  ;;  %v1740_v29 = vpack.c.bf16 %v1738_v19, %v1737_v33 }
 0xf92   :  { %v1739_v28 = vpack.c.bf16 %v1736_v27, %v1735_v22 }
 0xf93   :  { %v2872_v50 = vpop.eup %2871 }
 0xf94   :  { %2672 = vmatprep.mubr.msk.bf16.mxu0 %vm1694_vm4, %v1739_v28  ;;  %v2874_v51 = vpop.eup %2873  ;;  %v1917_v41 = vmul.f32 %v2872_v50, %v2860_v61 }
 0xf95   :  { %2673 = vmatmul.mubr.msk.bf16.vlgmr.msra.gmra.mxu0 %vm1694_vm4, %v1740_v29  ;;  %v2876_v3 = vpop.eup %2875  ;;  %v1914_v37 = vmul.f32 %v2874_v51, %v2858_v59 }
 0xf96   :  { %2683 = vmatpush3.bf16.msra.mxu0 %v1922_v15  ;;  %v1916_v40 = vmul.f32 %v2876_v3, %v2856_v57  ;;  %v2769_v3 = vld [vmem:[#allocation26 + $0x8] sm:$0xff]  }
 0xf97   :  { %v2878_v35 = vpop.eup %2877  ;;  %2696 = vmatprep.subr.bf16.mxu0 %v3298_v0 }
 0xf98   :  { %v1915_v38 = vmul.f32 %v2878_v35, %v2862_v63  ;;  %v1919_v45 = vpack.c.bf16 %v1917_v41, %v1916_v40 }
 0xf9a   :  { %v1918_v43 = vpack.c.bf16 %v1915_v38, %v1914_v37 }
 0xf9c   :  { %2684 = vmatprep.mubr.msk.bf16.mxu0 %vm1694_vm4, %v1918_v43 }
 0xf9d   :  { %2685 = vmatmul.mubr.msk.bf16.vlgmr.msra.gmra.mxu0 %vm1694_vm4, %v1919_v45 }
 0xf9e   :  { %2700 = vmatprep.mubr.msk.bf16.mxu0 %vm3299_vm0, %v3298_v0  ;;  %2697 = vmatpush3.bf16.msra.mxu0 %v2769_v3 }
 0xf9f   :  { %2698 = vmatprep.subr.bf16.mxu0 %v3298_v0 }
0x1055   :  { %v2674_v47 = vpop.f32.mrf.mxu0 }
0x1056   :  { %v1802_v59 = vmul.f32 %v3803_v26, %v2674_v47 }
0x1057   :  { %v1785_v49 = vpop.f32.mrf.mxu0 }
0x1058   :  { %v1800_v56 = vmul.f32 %v3797_v18, %v1785_v49 }
0x1059   :  { %v2675_v52 = vpop.f32.mrf.mxu0 }
0x105a   :  { %v1803_v2 = vmul.f32 %v3806_v31, %v2675_v52 }
0x105b   :  { %v1788_v53 = vpop.f32.mrf.mxu0 }
0x105c   :  { %v1801_v23 = vmul.f32 %v3800_v20, %v1788_v53  ;;  %v2478_v53 = vld [vmem:[#allocation25 + $0x2] ss:$0 sm:$0xff] }
0x105d   :  { %v2686_v54 = vpop.f32.mrf.mxu0 }
0x105e   :  { %v1804_v25 = vadd.f32 %v1801_v23, %v1800_v56  ;;  %v1981_v1 = vmul.f32 %v3803_v26, %v2686_v54 }
0x105f   :  { %v1964_v55 = vpop.f32.mrf.mxu0 }
0x1060   :  { %v1979_v61 = vmul.f32 %v3797_v18, %v1964_v55  ;;  %v1805_v63 = vadd.f32 %v1804_v25, %v1802_v59  ;;  %v2473_v18 = vld [vmem:[#allocation22 + $0x2] ss:$0 sm:$0xff]  ;;  %v2772_v25 = vld [vmem:[%s3985_s19 + $0x10] sm:$0xff]   ;;  %v2774_v59 = vld [vmem:[%s3985_s19] sm:$0xff]  }
0x1061   :  { %v2687_v57 = vpop.f32.mrf.mxu0 }
0x1062   :  { %v1982_v4 = vmul.f32 %v3806_v31, %v2687_v57  ;;  %v1806_v9 = vadd.f32 %v1805_v63, %v1803_v2  ;;  %v2771_v57 = vld [vmem:[%s3985_s19 + $0x18] sm:$0xff]  }
0x1063   :  { %v1967_v58 = vpop.f32.mrf.mxu0 }
0x1064   :  { %v1980_v62 = vmul.f32 %v3800_v20, %v1967_v58  ;;  %v2773_v58 = vld [vmem:[%s3985_s19 + $0x8] sm:$0xff]  }
0x1066   :  { %v1983_v8 = vadd.f32 %v1980_v62, %v1979_v61  ;;  %v2479_v61 = vld [vmem:[#allocation28] ss:$0 sm:$0xff] }
0x1068   :  { %v1984_v5 = vadd.f32 %v1983_v8, %v1981_v1 }
0x106a   :  { %v1985_v6 = vadd.f32 %v1984_v5, %v1982_v4 }
0x106c   :  { %v1986_v7 = vpack.c.bf16 %v1985_v6, %v1806_v9 }
0x106e   :  { %2693 = vmatmul.mubr.msk.bf16.vlgmr.msra.gmra.mxu1 %vm330_vm1, %v1986_v7 }
0x106f   :  { %2712 = vmatprep.mubr.msk.bf16.mxu1 %vm3299_vm0, %v3298_v0  ;;  %2705 = vmatpush3.bf16.msra.mxu1 %v2771_v57 }
0x1070   :  { %2706 = vmatprep.subr.bf16.mxu1 %v3298_v0 }
0x1073   :  { %2707 = vmatpush3.bf16.msra.mxu1 %v2772_v25 }
0x1074   :  { %2708 = vmatprep.subr.bf16.mxu1 %v3298_v0 }
0x1077   :  { %2709 = vmatpush3.bf16.msra.mxu1 %v2773_v58 }
0x1078   :  { %2710 = vmatprep.subr.bf16.mxu1 %v3298_v0 }
0x107b   :  { %2711 = vmatpush3.bf16.msra.mxu1 %v2774_v59 }
0x112e   :  { %v2049_v11 = vpop.f32.mrf.mxu1 }
0x112f   :  { %v2050_v20 = vadd.f32 %v2473_v18, %v2049_v11 }
0x1130   :  { %v2694_v13 = vpop.f32.mrf.mxu1 }
0x1131   :  { %v2056_v26 = vadd.f32 %v2050_v20, %v3790_v10 }
0x1132   :  { %v2052_v60 = vpop.f32.mrf.mxu1 }
0x1133   :  { %v2053_v14 = vadd.f32 %v2473_v18, %v2052_v60  ;;  %v2062_v34 = vsel %vm330_vm1, %v2056_v26, 0.0 }
0x1134   :  { %2063 = vadd.xlane.f32.xlu1 %v2062_v34  ;;  %v2695_v31 = vpop.f32.mrf.mxu1 }
0x1135   :  { %v2057_v15 = vadd.f32 %v2053_v14, %v3792_v12  ;;  %v2770_v12 = vld [vmem:[#allocation26] sm:$0xff]  }
0x1136   :  { %2699 = vmatpush3.bf16.msra.mxu0 %v2770_v12 }
0x1137   :  { %v2065_v16 = vsel %vm330_vm1, %v2057_v15, 0.0 }
0x1138   :  { %2066 = vadd.xlane.f32.xlu0 %v2065_v16 }
0x11bd   :  { %v2064_v17 = vpop.xlane.xlu1 %2063 }
0x11be   :  { %v2068_v19 = vmul.f32 0.03125, %v2064_v17 }
0x11c0   :  { %v2070_v22 = vsub.f32 %v2056_v26, %v2068_v19 }
0x11c1   :  { %v2067_v27 = vpop.xlane.xlu0 %2066 }
0x11c2   :  { %v2069_v33 = vmul.f32 0.03125, %v2067_v27  ;;  %v2072_v28 = vmul.f32 %v2070_v22, %v2070_v22  ;;  %v2483_v27 = vld [vmem:[%s3986_s20] ss:$0 sm:$0xff] }
0x11c4   :  { %v2071_v29 = vsub.f32 %v2057_v15, %v2069_v33  ;;  %v2074_v10 = vsel %vm330_vm1, %v2072_v28, 0.0 }
0x11c5   :  { %2075 = vadd.xlane.f32.xlu1 %v2074_v10 }
0x11c6   :  { %v2073_v50 = vmul.f32 %v2071_v29, %v2071_v29 }
0x11c8   :  { %v2077_v51 = vsel %vm330_vm1, %v2073_v50, 0.0 }
0x11c9   :  { %2078 = vadd.xlane.f32.xlu0 %v2077_v51 }
0x124e   :  { %v2076_v35 = vpop.xlane.xlu1 %2075 }
0x124f   :  { %v2080_v41 = vmul.f32 0.03125, %v2076_v35 }
0x1251   :  { %v2082_v37 = vadd.f32 1e-05, %v2080_v41 }
0x1252   :  { %v2079_v38 = vpop.xlane.xlu0 %2078 }
0x1253   :  { %2879 = vrsqrt.f32 %v2082_v37  ;;  %v2081_v40 = vmul.f32 0.03125, %v2079_v38 }
0x1255   :  { %v2083_v43 = vadd.f32 1e-05, %v2081_v40 }
0x1257   :  { %2881 = vrsqrt.f32 %v2083_v43 }
0x1260   :  { %v2880_v45 = vpop.eup %2879 }
0x1261   :  { %v2086_v32 = vmul.f32 %v2880_v45, %v2070_v22 }
0x1263   :  { %v2094_v52 = vmul.f32 %v2477_v39, %v2086_v32 }
0x1264   :  { %v2882_v47 = vpop.eup %2881 }
0x1265   :  { %v2087_v49 = vmul.f32 %v2882_v47, %v2071_v29  ;;  %v2102_v23 = vadd.f32 %v2478_v53, %v2094_v52 }
0x1267   :  { %v2095_v54 = vmul.f32 %v2477_v39, %v2087_v49 }
0x1269   :  { %v2103_v55 = vadd.f32 %v2478_v53, %v2095_v54 }
0x126b   :  { %v2109_v56 = vpack.c.bf16 %v2103_v55, %v2102_v23 }
0x126d   :  { %2701 = vmatmul.mubr.msk.bf16.vlgmr.msra.gmra.mxu0 %vm330_vm1, %v2109_v56 }
0x132d   :  { %v2165_v62 = vpop.f32.mrf.mxu0 }
0x132e   :  { %v2166_v63 = vadd.f32 %v2479_v61, %v2165_v62 }
0x132f   :  { %v2702_v1 = vpop.f32.mrf.mxu0 }
0x1330   :  { %v2174_v8 = vmul.f32 0.044715, %v2166_v63  ;;  %v2172_v31 = vmul.f32 0.5, %v2166_v63 }
0x1331   :  { %v2168_v2 = vpop.f32.mrf.mxu0 }
0x1332   :  { %v2176_v4 = vmul.f32 %v2174_v8, %v2166_v63  ;;  %v2169_v5 = vadd.f32 %v2479_v61, %v2168_v2  ;;  %v2489_v61 = vld [vmem:[#allocation23 + $0x3] ss:$0 sm:$0xff] }
0x1333   :  { %v2703_v9 = vpop.f32.mrf.mxu0 }
0x1334   :  { %v2178_v6 = vmul.f32 %v2176_v4, %v2166_v63  ;;  %v2175_v7 = vmul.f32 0.044715, %v2169_v5  ;;  %v2173_v15 = vmul.f32 0.5, %v2169_v5 }
0x1336   :  { %v2180_v18 = vadd.f32 %v2178_v6, %v2166_v63  ;;  %v2177_v11 = vmul.f32 %v2175_v7, %v2169_v5  ;;  %v2490_v63 = vld [vmem:[#allocation25 + $0x3] ss:$0 sm:$0xff] }
0x1338   :  { %v2182_v20 = vmul.f32 0.7978846, %v2180_v18  ;;  %v2179_v13 = vmul.f32 %v2177_v11, %v2169_v5 }
0x133a   :  { %2883 = vtanh.f32 %v2182_v20  ;;  %v2181_v26 = vadd.f32 %v2179_v13, %v2169_v5 }
0x133c   :  { %v2183_v60 = vmul.f32 0.7978846, %v2181_v26 }
0x133e   :  { %2885 = vtanh.f32 %v2183_v60 }
0x1347   :  { %v2884_v0 = vpop.eup %2883 }
0x1348   :  { %v2186_v14 = vadd.f32 1.0, %v2884_v0 }
0x134a   :  { %v2188_v17 = vmul.f32 %v2186_v14, %v2172_v31 }
0x134b   :  { %v2886_v34 = vpop.eup %2885 }
0x134c   :  { %v2187_v16 = vadd.f32 1.0, %v2886_v34 }
0x134e   :  { %v2189_v19 = vmul.f32 %v2187_v16, %v2173_v15 }
0x1350   :  { %v2199_v22 = vpack.c.bf16 %v2189_v19, %v2188_v17 }
0x1352   :  { %2713 = vmatmul.mubr.msk.bf16.vlgmr.msra.gmra.mxu1 %vm2230_vm5, %v2199_v22 }
0x1412   :  { %v2268_v33 = vpop.f32.mrf.mxu1 }
0x1413   :  { %v2269_v28 = vadd.f32 %v2483_v27, %v2268_v33 }
0x1414   :  { %v2714_v29 = vpop.f32.mrf.mxu1 }
0x1415   :  { %v2275_v10 = vadd.f32 %v2269_v28, %v2102_v23 }
0x1416   :  { %v2271_v50 = vpop.f32.mrf.mxu1 }
0x1417   :  { %v2272_v51 = vadd.f32 %v2483_v27, %v2271_v50  ;;  %v2281_v3 = vsel %vm330_vm1, %v2275_v10, 0.0 }
0x1418   :  { %2282 = vadd.xlane.f32.xlu1 %v2281_v3  ;;  %v2715_v12 = vpop.f32.mrf.mxu1 }
0x1419   :  { %v2276_v35 = vadd.f32 %v2272_v51, %v2103_v55 }
0x141b   :  { %v2284_v41 = vsel %vm330_vm1, %v2276_v35, 0.0 }
0x141c   :  { %2285 = vadd.xlane.f32.xlu0 %v2284_v41 }
0x1429   :  { %2326 = vrot.lane.b32.xlu1 %v3555_v30, %s3300_s2 }
0x142d   :  { %2336 = vrot.lane.b32.xlu1 %v3537_v21, %s3300_s2 }
0x1431   :  { %2344 = vrot.lane.b32.xlu1 %v3583_v44, %s3300_s2 }
0x1432   :  { %2330 = vrot.lane.b32.xlu0 %v3555_v30, %s3288_s4 }
0x14a1   :  { %v2283_v37 = vpop.xlane.xlu1 %2282 }
0x14a2   :  { %v2287_v38 = vmul.f32 0.03125, %v2283_v37 }
0x14a4   :  { %v2289_v40 = vsub.f32 %v2275_v10, %v2287_v38 }
0x14a5   :  { %v2327_v43 = vpop.permute.xlu1 %2326  ;;  %v2286_v45 = vpop.xlane.xlu0 %2285 }
0x14a6   :  { %2329 = vst.msk [vmem:[%s3988_s22] sm:$0xff] %vm330_vm1, %v2327_v43  ;;  %v2288_v32 = vmul.f32 0.03125, %v2286_v45  ;;  %v2291_v39 = vmul.f32 %v2289_v40, %v2289_v40 }
0x14a8   :  { %v2290_v47 = vsub.f32 %v2276_v35, %v2288_v32  ;;  %v2293_v21 = vsel %vm330_vm1, %v2291_v39, 0.0 }
0x14a9   :  { %2294 = vadd.xlane.f32.xlu1 %v2293_v21  ;;  %v2337_v44 = vpop.permute.xlu1 %2336  ;;  %v2331_v49 = vpop.permute.xlu0 %2330 }
0x14aa   :  { %2339 = vst.msk [vmem:[%s3988_s22 + $0x18] sm:$0xff] %vm330_vm1, %v2337_v44  ;;  %2333 = vst.msk [vmem:[%s3988_s22 + $0x8] sm:$0xff] %vm330_vm1, %v2331_v49  ;;  %v2292_v30 = vmul.f32 %v2290_v47, %v2290_v47 }
0x14ac   :  { %v2296_v52 = vsel %vm330_vm1, %v2292_v30, 0.0 }
0x14ad   :  { %v2345_v53 = vpop.permute.xlu1 %2344  ;;  %2297 = vadd.xlane.f32.xlu0 %v2296_v52 }
0x14ae   :  { %2350 = vst.msk [vmem:[%s3988_s22 + $0x30] sm:$0xff] %vm330_vm1, %v2345_v53 }
0x14ba   :  { %2353 = vrot.lane.b32.xlu1 %v3565_v36, %s3300_s2 }
0x14be   :  { %2363 = vrot.lane.b32.xlu1 %v3544_v24, %s3300_s2 }
0x14c2   :  { %2373 = vrot.lane.b32.xlu1 %v3590_v46, %s3300_s2 }
0x14c3   :  { %2346 = vrot.lane.b32.xlu0 %v3597_v48, %s3300_s2 }
0x14c7   :  { %2357 = vrot.lane.b32.xlu0 %v3565_v36, %s3288_s4 }
0x14cb   :  { %2371 = vrot.lane.b32.xlu0 %v3576_v42, %s3300_s2 }
0x1532   :  { %v2295_v54 = vpop.xlane.xlu1 %2294 }
0x1533   :  { %v2299_v23 = vmul.f32 0.03125, %v2295_v54 }
0x1535   :  { %v2301_v55 = vadd.f32 1e-05, %v2299_v23 }
0x1536   :  { %v2354_v56 = vpop.permute.xlu1 %2353  ;;  %v2298_v57 = vpop.xlane.xlu0 %2297 }
0x1537   :  { %2887 = vrsqrt.f32 %v2301_v55  ;;  %2356 = vst.msk [vmem:[%s3988_s22 + $0x40] sm:$0xff] %vm330_vm1, %v2354_v56  ;;  %v2300_v24 = vmul.f32 0.03125, %v2298_v57 }
0x1539   :  { %v2302_v46 = vadd.f32 1e-05, %v2300_v24 }
0x153a   :  { %v2364_v48 = vpop.permute.xlu1 %2363  ;;  %v2347_v25 = vpop.permute.xlu0 %2346 }
0x153b   :  { %2889 = vrsqrt.f32 %v2302_v46  ;;  %2366 = vst.msk [vmem:[%s3988_s22 + $0x58] sm:$0xff] %vm330_vm1, %v2364_v48  ;;  %2351 = vst.msk [vmem:[%s3988_s22 + $0x38] sm:$0xff] %vm330_vm1, %v2347_v25 }
0x153e   :  { %v2374_v36 = vpop.permute.xlu1 %2373  ;;  %v2358_v42 = vpop.permute.xlu0 %2357 }
0x153f   :  { %2378 = vst.msk [vmem:[%s3988_s22 + $0x78] sm:$0xff] %vm330_vm1, %v2374_v36  ;;  %2360 = vst.msk [vmem:[%s3988_s22 + $0x48] sm:$0xff] %vm330_vm1, %v2358_v42 }
0x1542   :  { %v2372_v58 = vpop.permute.xlu0 %2371 }
0x1543   :  { %2377 = vst.msk [vmem:[%s3988_s22 + $0x70] sm:$0xff] %vm330_vm1, %v2372_v58 }
0x1544   :  { %v2888_v59 = vpop.eup %2887 }
0x1545   :  { %v2305_v62 = vmul.f32 %v2888_v59, %v2289_v40 }
0x1547   :  { %v2313_v1 = vmul.f32 %v2489_v61, %v2305_v62 }
0x1548   :  { %v2890_v8 = vpop.eup %2889 }
0x1549   :  { %v2306_v2 = vmul.f32 %v2890_v8, %v2290_v47  ;;  %v2321_v4 = vadd.f32 %v2490_v63, %v2313_v1 }
0x154b   :  { %v2314_v5 = vmul.f32 %v2489_v61, %v2306_v2  ;;  %2323 = vst.msk [vmem:[#allocation29] sm:$0xff] %vm330_vm1, %v2321_v4 }
0x154d   :  { %v2322_v9 = vadd.f32 %v2490_v63, %v2314_v5 }
0x154f   :  { %2324 = vst.msk [vmem:[#allocation29 + $0x8] sm:$0xff] %vm330_vm1, %v2322_v9 }
0x1550   :  { %3246 = shalt.err (!%p3243_p5)
}
0x1551   :  { %2390 = dma.vmem_to_hbm [thread:$0]  %s2385_s29, 256, %s3987_s21, [#allocation4], %s3277_s0, %s3277_s0, %s3278_s23  }
0x1552   :  { %3273 = dma.done.wait [#allocation4], 256  }
0x1553   :  { %3274 = vsyncadd [#allocation4], 4294967040 }
0x1554   :  { %2398 = vsyncpa [#allocation3], 1 }
0x1555   :  { %2399 = vsyncpa [#allocation6], 1 }
0x1556   :  { %2400 = vsyncpa [#allocation9], 1 }
0x1557   :  { %2401 = vsyncpa [#allocation12], 1 }
0x1558   :  { %2402 = vsyncpa [#allocation15], 1 }
0x1559   :  { %2403 = vsyncpa [#allocation18], 1 }
0x155a   :  { %2404 = vsyncpa [#allocation21], 1 }
0x155b   :  { %2405 = vsyncpa [#allocation24], 1 }
0x155c   :  { %2406 = vsyncpa [#allocation27], 1 }
0x155d   :  { %2407 = vsyncpa [#allocation4], 1 }

</bundles_post_ra>
